<compile_context>
chip_gen: v7x
topology: tpu7x:2x2x1
jax: 0.10.0
libtpu: 0.0.40
codegen_flags: <defaults>
</compile_context>

<pallas_src>
import functools
import math

import jax
import jax.numpy as jnp
import numpy as np
from jax.experimental import pallas as pl
from jax.experimental.pallas import tpu as pltpu

# ---- small ViT hyperparameters -------------------------------------------
B = 2                          # batch
C = 4                          # input channels
H = W = 16                     # spatial
P = 4                          # patch size
NPATCH = (H // P) * (W // P)   # 16 patches
PATCH_DIM = C * P * P          # 64 (Conv2d(C, D, P, stride=P) flattened)
D = 32                         # hidden size
NH = 4                         # attention heads
HD = D // NH                   # 8 head dim
SEQ = NPATCH + 1               # 17 tokens (cls + patches)
MLP = 2 * D                    # 64
DEPTH = 2                      # transformer blocks
NC = 2                         # logits
EPS = 1e-6
NEG_INF = -1e30                # additive mask for cross-sample / pad attention
LANES = 128                    # slab / output lane width

# padded row count: [cls_0..cls_{B-1} | patches_0 | patches_1 | pad]
NROWS = B + B * NPATCH                     # 34
RPAD = ((NROWS + 7) // 8) * 8              # 40 -> integral sublane chunks

# ---- slab layouts (static row offsets, all sublane-aligned) ----------------
# per-layer matmul-weight slab (bf16), LW_ROWS rows / layer, 128 lanes:
OFF_WQ, OFF_WK, OFF_WV, OFF_WP, OFF_W1, OFF_W2 = 0, 32, 64, 96, 128, 160
LW_ROWS = 224                              # 160 + MLP(64) rows for fc2

# global-weight slab (bf16): patch embed, padded head, per-head lane masks
GW_PATCH, GW_HEAD, GW_HMASK = 0, PATCH_DIM, PATCH_DIM + D      # 0, 64, 96
GW_ROWS = GW_HMASK + ((NH + 7) // 8) * 8                       # 104

# vector slab (f32): LN params / biases, one row each
V_PER_LAYER = 10
V_LN1W, V_LN1B, V_BQ, V_BK, V_BV, V_PB, V_LN2W, V_LN2B, V_B1, V_B2 = range(10)
V_GLOBAL = DEPTH * V_PER_LAYER                                 # 20
V_LNFW, V_LNFB, V_HEADB = V_GLOBAL, V_GLOBAL + 1, V_GLOBAL + 2
VSLAB_ROWS = ((V_GLOBAL + 3 + 7) // 8) * 8                     # 24


# ---- kernel-side helpers ----------------------------------------------------
def _layernorm(x, w, b):
    mu = jnp.mean(x, axis=-1, keepdims=True)
    xc = x - mu
    var = jnp.mean(xc * xc, axis=-1, keepdims=True)       # centered form (robust)
    return xc * jax.lax.rsqrt(var + EPS) * w + b


def _softmax_eup(s):
    m = jnp.max(s, axis=-1, keepdims=True)
    e = jnp.exp(s - m)
    return e * pl.reciprocal(jnp.sum(e, axis=-1, keepdims=True), approx=True)


def _dot(a_bf16, b_bf16):
    # bf16 operands, f32 accumulation — native MXU datapath on all gens.
    return jnp.dot(a_bf16, b_bf16, preferred_element_type=jnp.float32)


def _dot_t(a_bf16, b_bf16):
    # a @ b^T via dot_general (contract last dims of both) — no explicit .T.
    return jax.lax.dot_general(a_bf16, b_bf16, (((1,), (1,)), ((), ())),
                               preferred_element_type=jnp.float32)


# ---- the Pallas kernel: whole-batch ViT forward in one invocation ----------
def vit_kernel(patches_ref, tokadd_ref, mask_ref, lw_ref, gw_ref, vec_ref, out_ref):
    mask = mask_ref[...]                                       # (RPAD, RPAD) f32

    def vrow(r, n=D):                                          # (1, n) f32 bias/LN row
        return vec_ref[r: r + 1, 0:n]

    # per-head 0/1 lane masks (bf16, precomputed host-side) — loaded once
    hmasks = [gw_ref[GW_HMASK + hh: GW_HMASK + hh + 1, 0:D] for hh in range(NH)]

    # patch embedding for all rows at once; cls / pad rows of `patches` are
    # zero, and cls / pos / patch-bias were folded host-side into tok_add.
    patch_w = gw_ref[GW_PATCH: GW_PATCH + PATCH_DIM, 0:D]      # (64, 32) bf16
    tok = _dot(patches_ref[...].astype(jnp.bfloat16), patch_w) + tokadd_ref[...]

    for l in range(DEPTH):
        wb = l * LW_ROWS
        vb = l * V_PER_LAYER
        wq = lw_ref[wb + OFF_WQ: wb + OFF_WQ + D, 0:D]         # bf16, scale folded
        wk = lw_ref[wb + OFF_WK: wb + OFF_WK + D, 0:D]
        wv = lw_ref[wb + OFF_WV: wb + OFF_WV + D, 0:D]
        wp = lw_ref[wb + OFF_WP: wb + OFF_WP + D, 0:D]
        w1 = lw_ref[wb + OFF_W1: wb + OFF_W1 + D, 0:MLP]
        w2 = lw_ref[wb + OFF_W2: wb + OFF_W2 + MLP, 0:D]

        h = tok
        hn_bf = _layernorm(h, vrow(vb + V_LN1W), vrow(vb + V_LN1B)).astype(jnp.bfloat16)

        q = _dot(hn_bf, wq) + vrow(vb + V_BQ)                  # (RPAD, D) f32
        k = _dot(hn_bf, wk) + vrow(vb + V_BK)
        v = _dot(hn_bf, wv) + vrow(vb + V_BV)
        qb = q.astype(jnp.bfloat16)                            # cast once, reuse
        kb = k.astype(jnp.bfloat16)
        vbf = v.astype(jnp.bfloat16)

        # per-head attention via lane masks: (q*mask_h)·k == q_h·k_h, and the
        # masked pattn@v contributions land in disjoint lanes, so summing them
        # reconstructs concat_h(O_h) with NO unaligned 8-lane slices.
        ov = None
        for hh in range(NH):
            hm = hmasks[hh]                                    # (1, D) bf16 0/1
            sc = _dot_t(qb * hm, kb) + mask                    # (RPAD, RPAD)
            pattn = _softmax_eup(sc)
            contrib = _dot(pattn.astype(jnp.bfloat16), vbf * hm)
            ov = contrib if ov is None else ov + contrib

        h = h + _dot(ov.astype(jnp.bfloat16), wp) + vrow(vb + V_PB)

        hn2_bf = _layernorm(h, vrow(vb + V_LN2W), vrow(vb + V_LN2B)).astype(jnp.bfloat16)
        m = _dot(hn2_bf, w1) + vrow(vb + V_B1, MLP)
        m = jax.nn.gelu(m)   # TODO(synk): torch.nn.GELU default is exact erf; tanh approx used here
        m = _dot(m.astype(jnp.bfloat16), w2) + vrow(vb + V_B2)
        tok = h + m

    # final LN + head on the first sublane chunk only (cls rows are 0..B-1);
    # single aligned, lane-dense (8, 128) store.
    fin = _layernorm(tok[0:8], vrow(V_LNFW), vrow(V_LNFB)).astype(jnp.bfloat16)
    head_w = gw_ref[GW_HEAD: GW_HEAD + D, :]                   # (D, 128) bf16, zero-padded
    out_ref[...] = _dot(fin, head_w) + vec_ref[V_HEADB: V_HEADB + 1, :]


# ---- host-side glue ---------------------------------------------------------
def extract_patches(x):
    # x: (B, C, H, W) NCHW  ->  (B, NPATCH, C*P*P)
    b = x.shape[0]
    p = x.reshape(b, C, H // P, P, W // P, P)
    p = p.transpose(0, 2, 4, 1, 3, 5)                          # (B, H/P, W/P, C, P, P)
    return p.reshape(b, NPATCH, PATCH_DIM)


def init_params(key):
    ks = jax.random.split(key, 8)
    s = jnp.float32(0.02)
    return dict(
        patch_w=jax.random.normal(ks[0], (PATCH_DIM, D), jnp.float32) * s,
        patch_b=jnp.zeros((1, D), jnp.float32),
        cls=jax.random.normal(ks[1], (1, D), jnp.float32) * s,
        pos=jax.random.normal(ks[2], (SEQ, D), jnp.float32) * s,
        ln1_w=jnp.ones((DEPTH, 1, D), jnp.float32),
        ln1_b=jnp.zeros((DEPTH, 1, D), jnp.float32),
        qkv_w=jax.random.normal(ks[3], (DEPTH, D, 3 * D), jnp.float32) * s,
        qkv_b=jnp.zeros((DEPTH, 1, 3 * D), jnp.float32),
        proj_w=jax.random.normal(ks[4], (DEPTH, D, D), jnp.float32) * s,
        proj_b=jnp.zeros((DEPTH, 1, D), jnp.float32),
        ln2_w=jnp.ones((DEPTH, 1, D), jnp.float32),
        ln2_b=jnp.zeros((DEPTH, 1, D), jnp.float32),
        fc1_w=jax.random.normal(ks[5], (DEPTH, D, MLP), jnp.float32) * s,
        fc1_b=jnp.zeros((DEPTH, 1, MLP), jnp.float32),
        fc2_w=jax.random.normal(ks[6], (DEPTH, MLP, D), jnp.float32) * s,
        fc2_b=jnp.zeros((DEPTH, 1, D), jnp.float32),
        lnf_w=jnp.ones((1, D), jnp.float32),
        lnf_b=jnp.zeros((1, D), jnp.float32),
        head_w=jax.random.normal(ks[7], (D, NC), jnp.float32) * s,
        head_b=jnp.zeros((1, NC), jnp.float32),
    )


def pack_params(params):
    """One-time host-side re-layout: bf16 weight slabs, f32 vector slab,
    folded cls/pos/patch-bias token-add, block-diagonal mask."""
    scale = 1.0 / math.sqrt(HD)
    qkv_w = np.asarray(params["qkv_w"], np.float32)
    qkv_b = np.asarray(params["qkv_b"], np.float32)
    qw, kw, vw = qkv_w[:, :, :D] * scale, qkv_w[:, :, D:2 * D], qkv_w[:, :, 2 * D:]
    qb, kb, vb = qkv_b[:, :, :D] * scale, qkv_b[:, :, D:2 * D], qkv_b[:, :, 2 * D:]

    # --- per-layer matmul-weight slab (bf16) ---
    lw = np.zeros((DEPTH * LW_ROWS, LANES), np.float32)
    for l in range(DEPTH):
        b0 = l * LW_ROWS
        lw[b0 + OFF_WQ: b0 + OFF_WQ + D, :D] = qw[l]
        lw[b0 + OFF_WK: b0 + OFF_WK + D, :D] = kw[l]
        lw[b0 + OFF_WV: b0 + OFF_WV + D, :D] = vw[l]
        lw[b0 + OFF_WP: b0 + OFF_WP + D, :D] = np.asarray(params["proj_w"][l])
        lw[b0 + OFF_W1: b0 + OFF_W1 + D, :MLP] = np.asarray(params["fc1_w"][l])
        lw[b0 + OFF_W2: b0 + OFF_W2 + MLP, :D] = np.asarray(params["fc2_w"][l])
    lwslab = jnp.asarray(lw, jnp.bfloat16)

    # --- global-weight slab (bf16): patch embed, padded head, head lane masks ---
    gw = np.zeros((GW_ROWS, LANES), np.float32)
    gw[GW_PATCH: GW_PATCH + PATCH_DIM, :D] = np.asarray(params["patch_w"])
    gw[GW_HEAD: GW_HEAD + D, :NC] = np.asarray(params["head_w"])
    for hh in range(NH):
        gw[GW_HMASK + hh, hh * HD:(hh + 1) * HD] = 1.0
    gwslab = jnp.asarray(gw, jnp.bfloat16)

    # --- vector slab (f32): LN params & biases ---
    vs = np.zeros((VSLAB_ROWS, LANES), np.float32)
    for l in range(DEPTH):
        r = l * V_PER_LAYER
        vs[r + V_LN1W, :D] = np.asarray(params["ln1_w"][l, 0])
        vs[r + V_LN1B, :D] = np.asarray(params["ln1_b"][l, 0])
        vs[r + V_BQ, :D] = qb[l, 0]
        vs[r + V_BK, :D] = kb[l, 0]
        vs[r + V_BV, :D] = vb[l, 0]
        vs[r + V_PB, :D] = np.asarray(params["proj_b"][l, 0])
        vs[r + V_LN2W, :D] = np.asarray(params["ln2_w"][l, 0])
        vs[r + V_LN2B, :D] = np.asarray(params["ln2_b"][l, 0])
        vs[r + V_B1, :MLP] = np.asarray(params["fc1_b"][l, 0])
        vs[r + V_B2, :D] = np.asarray(params["fc2_b"][l, 0])
    vs[V_LNFW, :D] = np.asarray(params["lnf_w"][0])
    vs[V_LNFB, :D] = np.asarray(params["lnf_b"][0])
    vs[V_HEADB, :NC] = np.asarray(params["head_b"][0])
    vslab = jnp.asarray(vs)

    # --- additive token init in the cls-first, padded row order ---
    ta = np.zeros((RPAD, D), np.float32)
    cls_row = np.asarray(params["cls"] + params["pos"][0:1])           # (1, D)
    patch_rows = np.asarray(params["pos"][1:] + params["patch_b"])     # (NPATCH, D)
    ta[0:B] = np.tile(cls_row, (B, 1))
    ta[B:B + B * NPATCH] = np.tile(patch_rows, (B, 1))
    tok_add = jnp.asarray(ta)

    # --- block-diagonal additive attention mask (pad rows form their own group,
    #     so no query row is fully masked) ---
    bid = np.full((RPAD,), B, np.int32)
    bid[:B] = np.arange(B)
    for bb in range(B):
        bid[B + bb * NPATCH: B + (bb + 1) * NPATCH] = bb
    mask = jnp.asarray(np.where(bid[:, None] == bid[None, :], 0.0, NEG_INF)
                       .astype(np.float32))

    return tok_add, mask, lwslab, gwslab, vslab


@jax.jit
def vit_forward(x, packed):
    tok_add, mask, lwslab, gwslab, vslab = packed
    patches = extract_patches(x).astype(jnp.float32).reshape(B * NPATCH, PATCH_DIM)
    patches_pad = jnp.zeros((RPAD, PATCH_DIM), jnp.float32)
    patches_pad = patches_pad.at[B:B + B * NPATCH].set(patches)

    vmem = pl.BlockSpec(memory_space=pltpu.MemorySpace.VMEM)
    out = pl.pallas_call(
        vit_kernel,
        out_shape=jax.ShapeDtypeStruct((8, LANES), jnp.float32),
        in_specs=[vmem] * 6,
        out_specs=vmem,
        compiler_params=pltpu.CompilerParams(vmem_limit_bytes=64 * 1024 * 1024),
    )(patches_pad, tok_add, mask, lwslab, gwslab, vslab)     # single invocation

    return out[:B, :NC]                                       # (B, NC) raw logits


# ---- pure-JAX reference (ground truth for correctness) ----------------------
def _layernorm_ref(x, w, b):
    mu = jnp.mean(x, axis=-1, keepdims=True)
    var = jnp.mean((x - mu) ** 2, axis=-1, keepdims=True)
    return (x - mu) * jax.lax.rsqrt(var + EPS) * w + b


def _softmax_ref(s):
    m = jnp.max(s, axis=-1, keepdims=True)
    e = jnp.exp(s - m)
    return e / jnp.sum(e, axis=-1, keepdims=True)


def vit_reference(x, params):
    patches = extract_patches(x).astype(jnp.float32)
    hp = functools.partial(jnp.dot, precision=jax.lax.Precision.HIGHEST)
    outs = []
    for bi in range(B):
        emb = hp(patches[bi], params["patch_w"]) + params["patch_b"]
        tok = jnp.concatenate([params["cls"], emb], axis=0) + params["pos"]
        for l in range(DEPTH):
            h = tok
            hn = _layernorm_ref(h, params["ln1_w"][l], params["ln1_b"][l])
            qkv = hp(hn, params["qkv_w"][l]) + params["qkv_b"][l]
            heads = []
            for hh in range(NH):
                q = qkv[:, hh * HD:(hh + 1) * HD]
                k = qkv[:, D + hh * HD: D + (hh + 1) * HD]
                v = qkv[:, 2 * D + hh * HD: 2 * D + (hh + 1) * HD]
                s = hp(q, k.T) * (1.0 / math.sqrt(HD))
                heads.append(hp(_softmax_ref(s), v))
            attn = hp(jnp.concatenate(heads, -1), params["proj_w"][l]) + params["proj_b"][l]
            h = h + attn
            hn2 = _layernorm_ref(h, params["ln2_w"][l], params["ln2_b"][l])
            m = hp(hn2, params["fc1_w"][l]) + params["fc1_b"][l]
            m = jax.nn.gelu(m)
            m = hp(m, params["fc2_w"][l]) + params["fc2_b"][l]
            tok = h + m
        final = _layernorm_ref(tok, params["lnf_w"], params["lnf_b"])
        outs.append(hp(final[0:1], params["head_w"]) + params["head_b"])
    return jnp.concatenate(outs, axis=0)


if __name__ == "__main__":
    key = jax.random.PRNGKey(0)
    kx, kp = jax.random.split(key)
    x = jax.random.normal(kx, (B, C, H, W), jnp.float32)       # NCHW like PyTorch
    params = init_params(kp)
    packed = pack_params(params)                               # one-time host-side packing

    out = vit_forward(x, packed)
    jax.block_until_ready(out)

    ref = vit_reference(x, params)
    np.testing.assert_allclose(np.asarray(out), np.asarray(ref),
                               atol=2e-2, rtol=2e-2)
    print("KERNEL_OK")
</pallas_src>

<mosaic_0001>
module attributes {stable_mosaic.version = 11 : i64} {
  func.func @vit_kernel(%arg0: memref<40x64xf32, #tpu.memory_space<vmem>>, %arg1: memref<40x32xf32, #tpu.memory_space<vmem>>, %arg2: memref<40x40xf32, #tpu.memory_space<vmem>>, %arg3: memref<448x128xbf16, #tpu.memory_space<vmem>>, %arg4: memref<104x128xbf16, #tpu.memory_space<vmem>>, %arg5: memref<24x128xf32, #tpu.memory_space<vmem>>, %arg6: memref<8x128xf32, #tpu.memory_space<vmem>>) attributes {dimension_semantics = [], scalar_prefetch = 0 : i64, scratch_operands = 0 : i64, tpu.core_type = #tpu.core_type<tc>} {
    %c0 = arith.constant 0 : index
    %c0_0 = arith.constant 0 : index
    %0 = vector.load %arg2[%c0, %c0_0] : memref<40x40xf32, #tpu.memory_space<vmem>>, vector<40x40xf32>
    %c96 = arith.constant 96 : index
    %c0_1 = arith.constant 0 : index
    %1 = vector.load %arg4[%c96, %c0_1] : memref<104x128xbf16, #tpu.memory_space<vmem>>, vector<1x32xbf16>
    %c97 = arith.constant 97 : index
    %c0_2 = arith.constant 0 : index
    %2 = vector.load %arg4[%c97, %c0_2] : memref<104x128xbf16, #tpu.memory_space<vmem>>, vector<1x32xbf16>
    %c98 = arith.constant 98 : index
    %c0_3 = arith.constant 0 : index
    %3 = vector.load %arg4[%c98, %c0_3] : memref<104x128xbf16, #tpu.memory_space<vmem>>, vector<1x32xbf16>
    %c99 = arith.constant 99 : index
    %c0_4 = arith.constant 0 : index
    %4 = vector.load %arg4[%c99, %c0_4] : memref<104x128xbf16, #tpu.memory_space<vmem>>, vector<1x32xbf16>
    %c0_5 = arith.constant 0 : index
    %c0_6 = arith.constant 0 : index
    %5 = vector.load %arg4[%c0_5, %c0_6] : memref<104x128xbf16, #tpu.memory_space<vmem>>, vector<64x32xbf16>
    %c0_7 = arith.constant 0 : index
    %c0_8 = arith.constant 0 : index
    %6 = vector.load %arg0[%c0_7, %c0_8] : memref<40x64xf32, #tpu.memory_space<vmem>>, vector<40x64xf32>
    %7 = arith.truncf %6 : vector<40x64xf32> to vector<40x64xbf16>
    %cst = arith.constant dense<0.000000e+00> : vector<40x32xf32>
    %8 = tpu.matmul %7, %5, %cst {dimension_numbers = #tpu.dot_dimension_numbers<[1], [0], [0], [1], [0, 0, 1, 1], [], []>} : vector<40x64xbf16>, vector<64x32xbf16>, vector<40x32xf32> -> vector<40x32xf32>
    %c0_9 = arith.constant 0 : index
    %c0_10 = arith.constant 0 : index
    %9 = vector.load %arg1[%c0_9, %c0_10] : memref<40x32xf32, #tpu.memory_space<vmem>>, vector<40x32xf32>
    %10 = arith.addf %8, %9 : vector<40x32xf32>
    %c0_11 = arith.constant 0 : index
    %c0_12 = arith.constant 0 : index
    %11 = vector.load %arg3[%c0_11, %c0_12] : memref<448x128xbf16, #tpu.memory_space<vmem>>, vector<32x32xbf16>
    %c32 = arith.constant 32 : index
    %c0_13 = arith.constant 0 : index
    %12 = vector.load %arg3[%c32, %c0_13] : memref<448x128xbf16, #tpu.memory_space<vmem>>, vector<32x32xbf16>
    %c64 = arith.constant 64 : index
    %c0_14 = arith.constant 0 : index
    %13 = vector.load %arg3[%c64, %c0_14] : memref<448x128xbf16, #tpu.memory_space<vmem>>, vector<32x32xbf16>
    %c96_15 = arith.constant 96 : index
    %c0_16 = arith.constant 0 : index
    %14 = vector.load %arg3[%c96_15, %c0_16] : memref<448x128xbf16, #tpu.memory_space<vmem>>, vector<32x32xbf16>
    %c128 = arith.constant 128 : index
    %c0_17 = arith.constant 0 : index
    %15 = vector.load %arg3[%c128, %c0_17] : memref<448x128xbf16, #tpu.memory_space<vmem>>, vector<32x64xbf16>
    %c160 = arith.constant 160 : index
    %c0_18 = arith.constant 0 : index
    %16 = vector.load %arg3[%c160, %c0_18] : memref<448x128xbf16, #tpu.memory_space<vmem>>, vector<64x32xbf16>
    %c0_19 = arith.constant 0 : index
    %c0_20 = arith.constant 0 : index
    %17 = vector.load %arg5[%c0_19, %c0_20] : memref<24x128xf32, #tpu.memory_space<vmem>>, vector<1x32xf32>
    %c1 = arith.constant 1 : index
    %c0_21 = arith.constant 0 : index
    %18 = vector.load %arg5[%c1, %c0_21] : memref<24x128xf32, #tpu.memory_space<vmem>>, vector<1x32xf32>
    %cst_22 = arith.constant dense<0.000000e+00> : vector<40xf32>
    %19 = vector.multi_reduction <add>, %10, %cst_22 [1] : vector<40x32xf32> to vector<40xf32>
    %20 = vector.shape_cast %19 : vector<40xf32> to vector<40x1xf32>
    %cst_23 = arith.constant 3.200000e+01 : f32
    %21 = vector.broadcast %cst_23 : f32 to vector<40x1xf32>
    %22 = arith.divf %20, %21 : vector<40x1xf32>
    %23 = vector.broadcast %22 : vector<40x1xf32> to vector<40x32xf32>
    %24 = arith.subf %10, %23 : vector<40x32xf32>
    %25 = arith.mulf %24, %24 : vector<40x32xf32>
    %cst_24 = arith.constant dense<0.000000e+00> : vector<40xf32>
    %26 = vector.multi_reduction <add>, %25, %cst_24 [1] : vector<40x32xf32> to vector<40xf32>
    %27 = vector.shape_cast %26 : vector<40xf32> to vector<40x1xf32>
    %cst_25 = arith.constant 3.200000e+01 : f32
    %28 = vector.broadcast %cst_25 : f32 to vector<40x1xf32>
    %29 = arith.divf %27, %28 : vector<40x1xf32>
    %cst_26 = arith.constant 9.99999997E-7 : f32
    %30 = vector.broadcast %cst_26 : f32 to vector<40x1xf32>
    %31 = arith.addf %29, %30 : vector<40x1xf32>
    %32 = math.rsqrt %31 : vector<40x1xf32>
    %33 = vector.broadcast %32 : vector<40x1xf32> to vector<40x32xf32>
    %34 = arith.mulf %24, %33 : vector<40x32xf32>
    %35 = vector.broadcast %17 : vector<1x32xf32> to vector<40x32xf32>
    %36 = arith.mulf %34, %35 : vector<40x32xf32>
    %37 = vector.broadcast %18 : vector<1x32xf32> to vector<40x32xf32>
    %38 = arith.addf %36, %37 : vector<40x32xf32>
    %39 = arith.truncf %38 : vector<40x32xf32> to vector<40x32xbf16>
    %cst_27 = arith.constant dense<0.000000e+00> : vector<40x32xf32>
    %40 = tpu.matmul %39, %11, %cst_27 {dimension_numbers = #tpu.dot_dimension_numbers<[1], [0], [0], [1], [0, 0, 1, 1], [], []>} : vector<40x32xbf16>, vector<32x32xbf16>, vector<40x32xf32> -> vector<40x32xf32>
    %c2 = arith.constant 2 : index
    %c0_28 = arith.constant 0 : index
    %41 = vector.load %arg5[%c2, %c0_28] : memref<24x128xf32, #tpu.memory_space<vmem>>, vector<1x32xf32>
    %42 = vector.broadcast %41 : vector<1x32xf32> to vector<40x32xf32>
    %43 = arith.addf %40, %42 : vector<40x32xf32>
    %cst_29 = arith.constant dense<0.000000e+00> : vector<40x32xf32>
    %44 = tpu.matmul %39, %12, %cst_29 {dimension_numbers = #tpu.dot_dimension_numbers<[1], [0], [0], [1], [0, 0, 1, 1], [], []>} : vector<40x32xbf16>, vector<32x32xbf16>, vector<40x32xf32> -> vector<40x32xf32>
    %c3 = arith.constant 3 : index
    %c0_30 = arith.constant 0 : index
    %45 = vector.load %arg5[%c3, %c0_30] : memref<24x128xf32, #tpu.memory_space<vmem>>, vector<1x32xf32>
    %46 = vector.broadcast %45 : vector<1x32xf32> to vector<40x32xf32>
    %47 = arith.addf %44, %46 : vector<40x32xf32>
    %cst_31 = arith.constant dense<0.000000e+00> : vector<40x32xf32>
    %48 = tpu.matmul %39, %13, %cst_31 {dimension_numbers = #tpu.dot_dimension_numbers<[1], [0], [0], [1], [0, 0, 1, 1], [], []>} : vector<40x32xbf16>, vector<32x32xbf16>, vector<40x32xf32> -> vector<40x32xf32>
    %c4 = arith.constant 4 : index
    %c0_32 = arith.constant 0 : index
    %49 = vector.load %arg5[%c4, %c0_32] : memref<24x128xf32, #tpu.memory_space<vmem>>, vector<1x32xf32>
    %50 = vector.broadcast %49 : vector<1x32xf32> to vector<40x32xf32>
    %51 = arith.addf %48, %50 : vector<40x32xf32>
    %52 = arith.truncf %43 : vector<40x32xf32> to vector<40x32xbf16>
    %53 = arith.truncf %47 : vector<40x32xf32> to vector<40x32xbf16>
    %54 = arith.truncf %51 : vector<40x32xf32> to vector<40x32xbf16>
    %55 = vector.broadcast %1 : vector<1x32xbf16> to vector<40x32xbf16>
    %56 = arith.mulf %52, %55 : vector<40x32xbf16>
    %cst_33 = arith.constant dense<0.000000e+00> : vector<40x40xf32>
    %57 = tpu.matmul %56, %53, %cst_33 {dimension_numbers = #tpu.dot_dimension_numbers<[1], [1], [0], [0], [0, 0, 1, 0], [], []>} : vector<40x32xbf16>, vector<40x32xbf16>, vector<40x40xf32> -> vector<40x40xf32>
    %58 = arith.addf %57, %0 : vector<40x40xf32>
    %cst_34 = arith.constant dense<0xFF800000> : vector<40xf32>
    %59 = vector.multi_reduction <maximumf>, %58, %cst_34 [1] : vector<40x40xf32> to vector<40xf32>
    %60 = vector.shape_cast %59 : vector<40xf32> to vector<40x1xf32>
    %61 = vector.broadcast %60 : vector<40x1xf32> to vector<40x40xf32>
    %62 = arith.subf %58, %61 : vector<40x40xf32>
    %63 = math.exp %62 : vector<40x40xf32>
    %cst_35 = arith.constant dense<0.000000e+00> : vector<40xf32>
    %64 = vector.multi_reduction <add>, %63, %cst_35 [1] : vector<40x40xf32> to vector<40xf32>
    %65 = vector.shape_cast %64 : vector<40xf32> to vector<40x1xf32>
    %66 = tpu.reciprocal %65 {approx = true} : vector<40x1xf32> -> vector<40x1xf32>
    %67 = vector.broadcast %66 : vector<40x1xf32> to vector<40x40xf32>
    %68 = arith.mulf %63, %67 : vector<40x40xf32>
    %69 = arith.truncf %68 : vector<40x40xf32> to vector<40x40xbf16>
    %70 = vector.broadcast %1 : vector<1x32xbf16> to vector<40x32xbf16>
    %71 = arith.mulf %54, %70 : vector<40x32xbf16>
    %cst_36 = arith.constant dense<0.000000e+00> : vector<40x32xf32>
    %72 = tpu.matmul %69, %71, %cst_36 {dimension_numbers = #tpu.dot_dimension_numbers<[1], [0], [0], [1], [0, 0, 1, 1], [], []>} : vector<40x40xbf16>, vector<40x32xbf16>, vector<40x32xf32> -> vector<40x32xf32>
    %73 = vector.broadcast %2 : vector<1x32xbf16> to vector<40x32xbf16>
    %74 = arith.mulf %52, %73 : vector<40x32xbf16>
    %cst_37 = arith.constant dense<0.000000e+00> : vector<40x40xf32>
    %75 = tpu.matmul %74, %53, %cst_37 {dimension_numbers = #tpu.dot_dimension_numbers<[1], [1], [0], [0], [0, 0, 1, 0], [], []>} : vector<40x32xbf16>, vector<40x32xbf16>, vector<40x40xf32> -> vector<40x40xf32>
    %76 = arith.addf %75, %0 : vector<40x40xf32>
    %cst_38 = arith.constant dense<0xFF800000> : vector<40xf32>
    %77 = vector.multi_reduction <maximumf>, %76, %cst_38 [1] : vector<40x40xf32> to vector<40xf32>
    %78 = vector.shape_cast %77 : vector<40xf32> to vector<40x1xf32>
    %79 = vector.broadcast %78 : vector<40x1xf32> to vector<40x40xf32>
    %80 = arith.subf %76, %79 : vector<40x40xf32>
    %81 = math.exp %80 : vector<40x40xf32>
    %cst_39 = arith.constant dense<0.000000e+00> : vector<40xf32>
    %82 = vector.multi_reduction <add>, %81, %cst_39 [1] : vector<40x40xf32> to vector<40xf32>
    %83 = vector.shape_cast %82 : vector<40xf32> to vector<40x1xf32>
    %84 = tpu.reciprocal %83 {approx = true} : vector<40x1xf32> -> vector<40x1xf32>
    %85 = vector.broadcast %84 : vector<40x1xf32> to vector<40x40xf32>
    %86 = arith.mulf %81, %85 : vector<40x40xf32>
    %87 = arith.truncf %86 : vector<40x40xf32> to vector<40x40xbf16>
    %88 = vector.broadcast %2 : vector<1x32xbf16> to vector<40x32xbf16>
    %89 = arith.mulf %54, %88 : vector<40x32xbf16>
    %cst_40 = arith.constant dense<0.000000e+00> : vector<40x32xf32>
    %90 = tpu.matmul %87, %89, %cst_40 {dimension_numbers = #tpu.dot_dimension_numbers<[1], [0], [0], [1], [0, 0, 1, 1], [], []>} : vector<40x40xbf16>, vector<40x32xbf16>, vector<40x32xf32> -> vector<40x32xf32>
    %91 = arith.addf %72, %90 : vector<40x32xf32>
    %92 = vector.broadcast %3 : vector<1x32xbf16> to vector<40x32xbf16>
    %93 = arith.mulf %52, %92 : vector<40x32xbf16>
    %cst_41 = arith.constant dense<0.000000e+00> : vector<40x40xf32>
    %94 = tpu.matmul %93, %53, %cst_41 {dimension_numbers = #tpu.dot_dimension_numbers<[1], [1], [0], [0], [0, 0, 1, 0], [], []>} : vector<40x32xbf16>, vector<40x32xbf16>, vector<40x40xf32> -> vector<40x40xf32>
    %95 = arith.addf %94, %0 : vector<40x40xf32>
    %cst_42 = arith.constant dense<0xFF800000> : vector<40xf32>
    %96 = vector.multi_reduction <maximumf>, %95, %cst_42 [1] : vector<40x40xf32> to vector<40xf32>
    %97 = vector.shape_cast %96 : vector<40xf32> to vector<40x1xf32>
    %98 = vector.broadcast %97 : vector<40x1xf32> to vector<40x40xf32>
    %99 = arith.subf %95, %98 : vector<40x40xf32>
    %100 = math.exp %99 : vector<40x40xf32>
    %cst_43 = arith.constant dense<0.000000e+00> : vector<40xf32>
    %101 = vector.multi_reduction <add>, %100, %cst_43 [1] : vector<40x40xf32> to vector<40xf32>
    %102 = vector.shape_cast %101 : vector<40xf32> to vector<40x1xf32>
    %103 = tpu.reciprocal %102 {approx = true} : vector<40x1xf32> -> vector<40x1xf32>
    %104 = vector.broadcast %103 : vector<40x1xf32> to vector<40x40xf32>
    %105 = arith.mulf %100, %104 : vector<40x40xf32>
    %106 = arith.truncf %105 : vector<40x40xf32> to vector<40x40xbf16>
    %107 = vector.broadcast %3 : vector<1x32xbf16> to vector<40x32xbf16>
    %108 = arith.mulf %54, %107 : vector<40x32xbf16>
    %cst_44 = arith.constant dense<0.000000e+00> : vector<40x32xf32>
    %109 = tpu.matmul %106, %108, %cst_44 {dimension_numbers = #tpu.dot_dimension_numbers<[1], [0], [0], [1], [0, 0, 1, 1], [], []>} : vector<40x40xbf16>, vector<40x32xbf16>, vector<40x32xf32> -> vector<40x32xf32>
    %110 = arith.addf %91, %109 : vector<40x32xf32>
    %111 = vector.broadcast %4 : vector<1x32xbf16> to vector<40x32xbf16>
    %112 = arith.mulf %52, %111 : vector<40x32xbf16>
    %cst_45 = arith.constant dense<0.000000e+00> : vector<40x40xf32>
    %113 = tpu.matmul %112, %53, %cst_45 {dimension_numbers = #tpu.dot_dimension_numbers<[1], [1], [0], [0], [0, 0, 1, 0], [], []>} : vector<40x32xbf16>, vector<40x32xbf16>, vector<40x40xf32> -> vector<40x40xf32>
    %114 = arith.addf %113, %0 : vector<40x40xf32>
    %cst_46 = arith.constant dense<0xFF800000> : vector<40xf32>
    %115 = vector.multi_reduction <maximumf>, %114, %cst_46 [1] : vector<40x40xf32> to vector<40xf32>
    %116 = vector.shape_cast %115 : vector<40xf32> to vector<40x1xf32>
    %117 = vector.broadcast %116 : vector<40x1xf32> to vector<40x40xf32>
    %118 = arith.subf %114, %117 : vector<40x40xf32>
    %119 = math.exp %118 : vector<40x40xf32>
    %cst_47 = arith.constant dense<0.000000e+00> : vector<40xf32>
    %120 = vector.multi_reduction <add>, %119, %cst_47 [1] : vector<40x40xf32> to vector<40xf32>
    %121 = vector.shape_cast %120 : vector<40xf32> to vector<40x1xf32>
    %122 = tpu.reciprocal %121 {approx = true} : vector<40x1xf32> -> vector<40x1xf32>
    %123 = vector.broadcast %122 : vector<40x1xf32> to vector<40x40xf32>
    %124 = arith.mulf %119, %123 : vector<40x40xf32>
    %125 = arith.truncf %124 : vector<40x40xf32> to vector<40x40xbf16>
    %126 = vector.broadcast %4 : vector<1x32xbf16> to vector<40x32xbf16>
    %127 = arith.mulf %54, %126 : vector<40x32xbf16>
    %cst_48 = arith.constant dense<0.000000e+00> : vector<40x32xf32>
    %128 = tpu.matmul %125, %127, %cst_48 {dimension_numbers = #tpu.dot_dimension_numbers<[1], [0], [0], [1], [0, 0, 1, 1], [], []>} : vector<40x40xbf16>, vector<40x32xbf16>, vector<40x32xf32> -> vector<40x32xf32>
    %129 = arith.addf %110, %128 : vector<40x32xf32>
    %130 = arith.truncf %129 : vector<40x32xf32> to vector<40x32xbf16>
    %cst_49 = arith.constant dense<0.000000e+00> : vector<40x32xf32>
    %131 = tpu.matmul %130, %14, %cst_49 {dimension_numbers = #tpu.dot_dimension_numbers<[1], [0], [0], [1], [0, 0, 1, 1], [], []>} : vector<40x32xbf16>, vector<32x32xbf16>, vector<40x32xf32> -> vector<40x32xf32>
    %132 = arith.addf %10, %131 : vector<40x32xf32>
    %c5 = arith.constant 5 : index
    %c0_50 = arith.constant 0 : index
    %133 = vector.load %arg5[%c5, %c0_50] : memref<24x128xf32, #tpu.memory_space<vmem>>, vector<1x32xf32>
    %134 = vector.broadcast %133 : vector<1x32xf32> to vector<40x32xf32>
    %135 = arith.addf %132, %134 : vector<40x32xf32>
    %c6 = arith.constant 6 : index
    %c0_51 = arith.constant 0 : index
    %136 = vector.load %arg5[%c6, %c0_51] : memref<24x128xf32, #tpu.memory_space<vmem>>, vector<1x32xf32>
    %c7 = arith.constant 7 : index
    %c0_52 = arith.constant 0 : index
    %137 = vector.load %arg5[%c7, %c0_52] : memref<24x128xf32, #tpu.memory_space<vmem>>, vector<1x32xf32>
    %cst_53 = arith.constant dense<0.000000e+00> : vector<40xf32>
    %138 = vector.multi_reduction <add>, %135, %cst_53 [1] : vector<40x32xf32> to vector<40xf32>
    %139 = vector.shape_cast %138 : vector<40xf32> to vector<40x1xf32>
    %cst_54 = arith.constant 3.200000e+01 : f32
    %140 = vector.broadcast %cst_54 : f32 to vector<40x1xf32>
    %141 = arith.divf %139, %140 : vector<40x1xf32>
    %142 = vector.broadcast %141 : vector<40x1xf32> to vector<40x32xf32>
    %143 = arith.subf %135, %142 : vector<40x32xf32>
    %144 = arith.mulf %143, %143 : vector<40x32xf32>
    %cst_55 = arith.constant dense<0.000000e+00> : vector<40xf32>
    %145 = vector.multi_reduction <add>, %144, %cst_55 [1] : vector<40x32xf32> to vector<40xf32>
    %146 = vector.shape_cast %145 : vector<40xf32> to vector<40x1xf32>
    %cst_56 = arith.constant 3.200000e+01 : f32
    %147 = vector.broadcast %cst_56 : f32 to vector<40x1xf32>
    %148 = arith.divf %146, %147 : vector<40x1xf32>
    %cst_57 = arith.constant 9.99999997E-7 : f32
    %149 = vector.broadcast %cst_57 : f32 to vector<40x1xf32>
    %150 = arith.addf %148, %149 : vector<40x1xf32>
    %151 = math.rsqrt %150 : vector<40x1xf32>
    %152 = vector.broadcast %151 : vector<40x1xf32> to vector<40x32xf32>
    %153 = arith.mulf %143, %152 : vector<40x32xf32>
    %154 = vector.broadcast %136 : vector<1x32xf32> to vector<40x32xf32>
    %155 = arith.mulf %153, %154 : vector<40x32xf32>
    %156 = vector.broadcast %137 : vector<1x32xf32> to vector<40x32xf32>
    %157 = arith.addf %155, %156 : vector<40x32xf32>
    %158 = arith.truncf %157 : vector<40x32xf32> to vector<40x32xbf16>
    %cst_58 = arith.constant dense<0.000000e+00> : vector<40x64xf32>
    %159 = tpu.matmul %158, %15, %cst_58 {dimension_numbers = #tpu.dot_dimension_numbers<[1], [0], [0], [1], [0, 0, 1, 1], [], []>} : vector<40x32xbf16>, vector<32x64xbf16>, vector<40x64xf32> -> vector<40x64xf32>
    %c8 = arith.constant 8 : index
    %c0_59 = arith.constant 0 : index
    %160 = vector.load %arg5[%c8, %c0_59] : memref<24x128xf32, #tpu.memory_space<vmem>>, vector<1x64xf32>
    %161 = vector.broadcast %160 : vector<1x64xf32> to vector<40x64xf32>
    %162 = arith.addf %159, %161 : vector<40x64xf32>
    %163 = arith.mulf %162, %162 : vector<40x64xf32>
    %164 = arith.mulf %162, %163 : vector<40x64xf32>
    %cst_60 = arith.constant 4.471500e-02 : f32
    %165 = vector.broadcast %cst_60 : f32 to vector<40x64xf32>
    %166 = arith.mulf %165, %164 : vector<40x64xf32>
    %167 = arith.addf %162, %166 : vector<40x64xf32>
    %cst_61 = arith.constant 0.797884583 : f32
    %168 = vector.broadcast %cst_61 : f32 to vector<40x64xf32>
    %169 = arith.mulf %168, %167 : vector<40x64xf32>
    %170 = math.tanh %169 : vector<40x64xf32>
    %cst_62 = arith.constant 1.000000e+00 : f32
    %171 = vector.broadcast %cst_62 : f32 to vector<40x64xf32>
    %172 = arith.addf %171, %170 : vector<40x64xf32>
    %cst_63 = arith.constant 5.000000e-01 : f32
    %173 = vector.broadcast %cst_63 : f32 to vector<40x64xf32>
    %174 = arith.mulf %173, %172 : vector<40x64xf32>
    %175 = arith.mulf %162, %174 : vector<40x64xf32>
    %176 = arith.truncf %175 : vector<40x64xf32> to vector<40x64xbf16>
    %cst_64 = arith.constant dense<0.000000e+00> : vector<40x32xf32>
    %177 = tpu.matmul %176, %16, %cst_64 {dimension_numbers = #tpu.dot_dimension_numbers<[1], [0], [0], [1], [0, 0, 1, 1], [], []>} : vector<40x64xbf16>, vector<64x32xbf16>, vector<40x32xf32> -> vector<40x32xf32>
    %c9 = arith.constant 9 : index
    %c0_65 = arith.constant 0 : index
    %178 = vector.load %arg5[%c9, %c0_65] : memref<24x128xf32, #tpu.memory_space<vmem>>, vector<1x32xf32>
    %179 = vector.broadcast %178 : vector<1x32xf32> to vector<40x32xf32>
    %180 = arith.addf %177, %179 : vector<40x32xf32>
    %181 = arith.addf %135, %180 : vector<40x32xf32>
    %c224 = arith.constant 224 : index
    %c0_66 = arith.constant 0 : index
    %182 = vector.load %arg3[%c224, %c0_66] : memref<448x128xbf16, #tpu.memory_space<vmem>>, vector<32x32xbf16>
    %c256 = arith.constant 256 : index
    %c0_67 = arith.constant 0 : index
    %183 = vector.load %arg3[%c256, %c0_67] : memref<448x128xbf16, #tpu.memory_space<vmem>>, vector<32x32xbf16>
    %c288 = arith.constant 288 : index
    %c0_68 = arith.constant 0 : index
    %184 = vector.load %arg3[%c288, %c0_68] : memref<448x128xbf16, #tpu.memory_space<vmem>>, vector<32x32xbf16>
    %c320 = arith.constant 320 : index
    %c0_69 = arith.constant 0 : index
    %185 = vector.load %arg3[%c320, %c0_69] : memref<448x128xbf16, #tpu.memory_space<vmem>>, vector<32x32xbf16>
    %c352 = arith.constant 352 : index
    %c0_70 = arith.constant 0 : index
    %186 = vector.load %arg3[%c352, %c0_70] : memref<448x128xbf16, #tpu.memory_space<vmem>>, vector<32x64xbf16>
    %c384 = arith.constant 384 : index
    %c0_71 = arith.constant 0 : index
    %187 = vector.load %arg3[%c384, %c0_71] : memref<448x128xbf16, #tpu.memory_space<vmem>>, vector<64x32xbf16>
    %c10 = arith.constant 10 : index
    %c0_72 = arith.constant 0 : index
    %188 = vector.load %arg5[%c10, %c0_72] : memref<24x128xf32, #tpu.memory_space<vmem>>, vector<1x32xf32>
    %c11 = arith.constant 11 : index
    %c0_73 = arith.constant 0 : index
    %189 = vector.load %arg5[%c11, %c0_73] : memref<24x128xf32, #tpu.memory_space<vmem>>, vector<1x32xf32>
    %cst_74 = arith.constant dense<0.000000e+00> : vector<40xf32>
    %190 = vector.multi_reduction <add>, %181, %cst_74 [1] : vector<40x32xf32> to vector<40xf32>
    %191 = vector.shape_cast %190 : vector<40xf32> to vector<40x1xf32>
    %cst_75 = arith.constant 3.200000e+01 : f32
    %192 = vector.broadcast %cst_75 : f32 to vector<40x1xf32>
    %193 = arith.divf %191, %192 : vector<40x1xf32>
    %194 = vector.broadcast %193 : vector<40x1xf32> to vector<40x32xf32>
    %195 = arith.subf %181, %194 : vector<40x32xf32>
    %196 = arith.mulf %195, %195 : vector<40x32xf32>
    %cst_76 = arith.constant dense<0.000000e+00> : vector<40xf32>
    %197 = vector.multi_reduction <add>, %196, %cst_76 [1] : vector<40x32xf32> to vector<40xf32>
    %198 = vector.shape_cast %197 : vector<40xf32> to vector<40x1xf32>
    %cst_77 = arith.constant 3.200000e+01 : f32
    %199 = vector.broadcast %cst_77 : f32 to vector<40x1xf32>
    %200 = arith.divf %198, %199 : vector<40x1xf32>
    %cst_78 = arith.constant 9.99999997E-7 : f32
    %201 = vector.broadcast %cst_78 : f32 to vector<40x1xf32>
    %202 = arith.addf %200, %201 : vector<40x1xf32>
    %203 = math.rsqrt %202 : vector<40x1xf32>
    %204 = vector.broadcast %203 : vector<40x1xf32> to vector<40x32xf32>
    %205 = arith.mulf %195, %204 : vector<40x32xf32>
    %206 = vector.broadcast %188 : vector<1x32xf32> to vector<40x32xf32>
    %207 = arith.mulf %205, %206 : vector<40x32xf32>
    %208 = vector.broadcast %189 : vector<1x32xf32> to vector<40x32xf32>
    %209 = arith.addf %207, %208 : vector<40x32xf32>
    %210 = arith.truncf %209 : vector<40x32xf32> to vector<40x32xbf16>
    %cst_79 = arith.constant dense<0.000000e+00> : vector<40x32xf32>
    %211 = tpu.matmul %210, %182, %cst_79 {dimension_numbers = #tpu.dot_dimension_numbers<[1], [0], [0], [1], [0, 0, 1, 1], [], []>} : vector<40x32xbf16>, vector<32x32xbf16>, vector<40x32xf32> -> vector<40x32xf32>
    %c12 = arith.constant 12 : index
    %c0_80 = arith.constant 0 : index
    %212 = vector.load %arg5[%c12, %c0_80] : memref<24x128xf32, #tpu.memory_space<vmem>>, vector<1x32xf32>
    %213 = vector.broadcast %212 : vector<1x32xf32> to vector<40x32xf32>
    %214 = arith.addf %211, %213 : vector<40x32xf32>
    %cst_81 = arith.constant dense<0.000000e+00> : vector<40x32xf32>
    %215 = tpu.matmul %210, %183, %cst_81 {dimension_numbers = #tpu.dot_dimension_numbers<[1], [0], [0], [1], [0, 0, 1, 1], [], []>} : vector<40x32xbf16>, vector<32x32xbf16>, vector<40x32xf32> -> vector<40x32xf32>
    %c13 = arith.constant 13 : index
    %c0_82 = arith.constant 0 : index
    %216 = vector.load %arg5[%c13, %c0_82] : memref<24x128xf32, #tpu.memory_space<vmem>>, vector<1x32xf32>
    %217 = vector.broadcast %216 : vector<1x32xf32> to vector<40x32xf32>
    %218 = arith.addf %215, %217 : vector<40x32xf32>
    %cst_83 = arith.constant dense<0.000000e+00> : vector<40x32xf32>
    %219 = tpu.matmul %210, %184, %cst_83 {dimension_numbers = #tpu.dot_dimension_numbers<[1], [0], [0], [1], [0, 0, 1, 1], [], []>} : vector<40x32xbf16>, vector<32x32xbf16>, vector<40x32xf32> -> vector<40x32xf32>
    %c14 = arith.constant 14 : index
    %c0_84 = arith.constant 0 : index
    %220 = vector.load %arg5[%c14, %c0_84] : memref<24x128xf32, #tpu.memory_space<vmem>>, vector<1x32xf32>
    %221 = vector.broadcast %220 : vector<1x32xf32> to vector<40x32xf32>
    %222 = arith.addf %219, %221 : vector<40x32xf32>
    %223 = arith.truncf %214 : vector<40x32xf32> to vector<40x32xbf16>
    %224 = arith.truncf %218 : vector<40x32xf32> to vector<40x32xbf16>
    %225 = arith.truncf %222 : vector<40x32xf32> to vector<40x32xbf16>
    %226 = vector.broadcast %1 : vector<1x32xbf16> to vector<40x32xbf16>
    %227 = arith.mulf %223, %226 : vector<40x32xbf16>
    %cst_85 = arith.constant dense<0.000000e+00> : vector<40x40xf32>
    %228 = tpu.matmul %227, %224, %cst_85 {dimension_numbers = #tpu.dot_dimension_numbers<[1], [1], [0], [0], [0, 0, 1, 0], [], []>} : vector<40x32xbf16>, vector<40x32xbf16>, vector<40x40xf32> -> vector<40x40xf32>
    %229 = arith.addf %228, %0 : vector<40x40xf32>
    %cst_86 = arith.constant dense<0xFF800000> : vector<40xf32>
    %230 = vector.multi_reduction <maximumf>, %229, %cst_86 [1] : vector<40x40xf32> to vector<40xf32>
    %231 = vector.shape_cast %230 : vector<40xf32> to vector<40x1xf32>
    %232 = vector.broadcast %231 : vector<40x1xf32> to vector<40x40xf32>
    %233 = arith.subf %229, %232 : vector<40x40xf32>
    %234 = math.exp %233 : vector<40x40xf32>
    %cst_87 = arith.constant dense<0.000000e+00> : vector<40xf32>
    %235 = vector.multi_reduction <add>, %234, %cst_87 [1] : vector<40x40xf32> to vector<40xf32>
    %236 = vector.shape_cast %235 : vector<40xf32> to vector<40x1xf32>
    %237 = tpu.reciprocal %236 {approx = true} : vector<40x1xf32> -> vector<40x1xf32>
    %238 = vector.broadcast %237 : vector<40x1xf32> to vector<40x40xf32>
    %239 = arith.mulf %234, %238 : vector<40x40xf32>
    %240 = arith.truncf %239 : vector<40x40xf32> to vector<40x40xbf16>
    %241 = vector.broadcast %1 : vector<1x32xbf16> to vector<40x32xbf16>
    %242 = arith.mulf %225, %241 : vector<40x32xbf16>
    %cst_88 = arith.constant dense<0.000000e+00> : vector<40x32xf32>
    %243 = tpu.matmul %240, %242, %cst_88 {dimension_numbers = #tpu.dot_dimension_numbers<[1], [0], [0], [1], [0, 0, 1, 1], [], []>} : vector<40x40xbf16>, vector<40x32xbf16>, vector<40x32xf32> -> vector<40x32xf32>
    %244 = vector.broadcast %2 : vector<1x32xbf16> to vector<40x32xbf16>
    %245 = arith.mulf %223, %244 : vector<40x32xbf16>
    %cst_89 = arith.constant dense<0.000000e+00> : vector<40x40xf32>
    %246 = tpu.matmul %245, %224, %cst_89 {dimension_numbers = #tpu.dot_dimension_numbers<[1], [1], [0], [0], [0, 0, 1, 0], [], []>} : vector<40x32xbf16>, vector<40x32xbf16>, vector<40x40xf32> -> vector<40x40xf32>
    %247 = arith.addf %246, %0 : vector<40x40xf32>
    %cst_90 = arith.constant dense<0xFF800000> : vector<40xf32>
    %248 = vector.multi_reduction <maximumf>, %247, %cst_90 [1] : vector<40x40xf32> to vector<40xf32>
    %249 = vector.shape_cast %248 : vector<40xf32> to vector<40x1xf32>
    %250 = vector.broadcast %249 : vector<40x1xf32> to vector<40x40xf32>
    %251 = arith.subf %247, %250 : vector<40x40xf32>
    %252 = math.exp %251 : vector<40x40xf32>
    %cst_91 = arith.constant dense<0.000000e+00> : vector<40xf32>
    %253 = vector.multi_reduction <add>, %252, %cst_91 [1] : vector<40x40xf32> to vector<40xf32>
    %254 = vector.shape_cast %253 : vector<40xf32> to vector<40x1xf32>
    %255 = tpu.reciprocal %254 {approx = true} : vector<40x1xf32> -> vector<40x1xf32>
    %256 = vector.broadcast %255 : vector<40x1xf32> to vector<40x40xf32>
    %257 = arith.mulf %252, %256 : vector<40x40xf32>
    %258 = arith.truncf %257 : vector<40x40xf32> to vector<40x40xbf16>
    %259 = vector.broadcast %2 : vector<1x32xbf16> to vector<40x32xbf16>
    %260 = arith.mulf %225, %259 : vector<40x32xbf16>
    %cst_92 = arith.constant dense<0.000000e+00> : vector<40x32xf32>
    %261 = tpu.matmul %258, %260, %cst_92 {dimension_numbers = #tpu.dot_dimension_numbers<[1], [0], [0], [1], [0, 0, 1, 1], [], []>} : vector<40x40xbf16>, vector<40x32xbf16>, vector<40x32xf32> -> vector<40x32xf32>
    %262 = arith.addf %243, %261 : vector<40x32xf32>
    %263 = vector.broadcast %3 : vector<1x32xbf16> to vector<40x32xbf16>
    %264 = arith.mulf %223, %263 : vector<40x32xbf16>
    %cst_93 = arith.constant dense<0.000000e+00> : vector<40x40xf32>
    %265 = tpu.matmul %264, %224, %cst_93 {dimension_numbers = #tpu.dot_dimension_numbers<[1], [1], [0], [0], [0, 0, 1, 0], [], []>} : vector<40x32xbf16>, vector<40x32xbf16>, vector<40x40xf32> -> vector<40x40xf32>
    %266 = arith.addf %265, %0 : vector<40x40xf32>
    %cst_94 = arith.constant dense<0xFF800000> : vector<40xf32>
    %267 = vector.multi_reduction <maximumf>, %266, %cst_94 [1] : vector<40x40xf32> to vector<40xf32>
    %268 = vector.shape_cast %267 : vector<40xf32> to vector<40x1xf32>
    %269 = vector.broadcast %268 : vector<40x1xf32> to vector<40x40xf32>
    %270 = arith.subf %266, %269 : vector<40x40xf32>
    %271 = math.exp %270 : vector<40x40xf32>
    %cst_95 = arith.constant dense<0.000000e+00> : vector<40xf32>
    %272 = vector.multi_reduction <add>, %271, %cst_95 [1] : vector<40x40xf32> to vector<40xf32>
    %273 = vector.shape_cast %272 : vector<40xf32> to vector<40x1xf32>
    %274 = tpu.reciprocal %273 {approx = true} : vector<40x1xf32> -> vector<40x1xf32>
    %275 = vector.broadcast %274 : vector<40x1xf32> to vector<40x40xf32>
    %276 = arith.mulf %271, %275 : vector<40x40xf32>
    %277 = arith.truncf %276 : vector<40x40xf32> to vector<40x40xbf16>
    %278 = vector.broadcast %3 : vector<1x32xbf16> to vector<40x32xbf16>
    %279 = arith.mulf %225, %278 : vector<40x32xbf16>
    %cst_96 = arith.constant dense<0.000000e+00> : vector<40x32xf32>
    %280 = tpu.matmul %277, %279, %cst_96 {dimension_numbers = #tpu.dot_dimension_numbers<[1], [0], [0], [1], [0, 0, 1, 1], [], []>} : vector<40x40xbf16>, vector<40x32xbf16>, vector<40x32xf32> -> vector<40x32xf32>
    %281 = arith.addf %262, %280 : vector<40x32xf32>
    %282 = vector.broadcast %4 : vector<1x32xbf16> to vector<40x32xbf16>
    %283 = arith.mulf %223, %282 : vector<40x32xbf16>
    %cst_97 = arith.constant dense<0.000000e+00> : vector<40x40xf32>
    %284 = tpu.matmul %283, %224, %cst_97 {dimension_numbers = #tpu.dot_dimension_numbers<[1], [1], [0], [0], [0, 0, 1, 0], [], []>} : vector<40x32xbf16>, vector<40x32xbf16>, vector<40x40xf32> -> vector<40x40xf32>
    %285 = arith.addf %284, %0 : vector<40x40xf32>
    %cst_98 = arith.constant dense<0xFF800000> : vector<40xf32>
    %286 = vector.multi_reduction <maximumf>, %285, %cst_98 [1] : vector<40x40xf32> to vector<40xf32>
    %287 = vector.shape_cast %286 : vector<40xf32> to vector<40x1xf32>
    %288 = vector.broadcast %287 : vector<40x1xf32> to vector<40x40xf32>
    %289 = arith.subf %285, %288 : vector<40x40xf32>
    %290 = math.exp %289 : vector<40x40xf32>
    %cst_99 = arith.constant dense<0.000000e+00> : vector<40xf32>
    %291 = vector.multi_reduction <add>, %290, %cst_99 [1] : vector<40x40xf32> to vector<40xf32>
    %292 = vector.shape_cast %291 : vector<40xf32> to vector<40x1xf32>
    %293 = tpu.reciprocal %292 {approx = true} : vector<40x1xf32> -> vector<40x1xf32>
    %294 = vector.broadcast %293 : vector<40x1xf32> to vector<40x40xf32>
    %295 = arith.mulf %290, %294 : vector<40x40xf32>
    %296 = arith.truncf %295 : vector<40x40xf32> to vector<40x40xbf16>
    %297 = vector.broadcast %4 : vector<1x32xbf16> to vector<40x32xbf16>
    %298 = arith.mulf %225, %297 : vector<40x32xbf16>
    %cst_100 = arith.constant dense<0.000000e+00> : vector<40x32xf32>
    %299 = tpu.matmul %296, %298, %cst_100 {dimension_numbers = #tpu.dot_dimension_numbers<[1], [0], [0], [1], [0, 0, 1, 1], [], []>} : vector<40x40xbf16>, vector<40x32xbf16>, vector<40x32xf32> -> vector<40x32xf32>
    %300 = arith.addf %281, %299 : vector<40x32xf32>
    %301 = arith.truncf %300 : vector<40x32xf32> to vector<40x32xbf16>
    %cst_101 = arith.constant dense<0.000000e+00> : vector<40x32xf32>
    %302 = tpu.matmul %301, %185, %cst_101 {dimension_numbers = #tpu.dot_dimension_numbers<[1], [0], [0], [1], [0, 0, 1, 1], [], []>} : vector<40x32xbf16>, vector<32x32xbf16>, vector<40x32xf32> -> vector<40x32xf32>
    %303 = arith.addf %181, %302 : vector<40x32xf32>
    %c15 = arith.constant 15 : index
    %c0_102 = arith.constant 0 : index
    %304 = vector.load %arg5[%c15, %c0_102] : memref<24x128xf32, #tpu.memory_space<vmem>>, vector<1x32xf32>
    %305 = vector.broadcast %304 : vector<1x32xf32> to vector<40x32xf32>
    %306 = arith.addf %303, %305 : vector<40x32xf32>
    %c16 = arith.constant 16 : index
    %c0_103 = arith.constant 0 : index
    %307 = vector.load %arg5[%c16, %c0_103] : memref<24x128xf32, #tpu.memory_space<vmem>>, vector<1x32xf32>
    %c17 = arith.constant 17 : index
    %c0_104 = arith.constant 0 : index
    %308 = vector.load %arg5[%c17, %c0_104] : memref<24x128xf32, #tpu.memory_space<vmem>>, vector<1x32xf32>
    %cst_105 = arith.constant dense<0.000000e+00> : vector<40xf32>
    %309 = vector.multi_reduction <add>, %306, %cst_105 [1] : vector<40x32xf32> to vector<40xf32>
    %310 = vector.shape_cast %309 : vector<40xf32> to vector<40x1xf32>
    %cst_106 = arith.constant 3.200000e+01 : f32
    %311 = vector.broadcast %cst_106 : f32 to vector<40x1xf32>
    %312 = arith.divf %310, %311 : vector<40x1xf32>
    %313 = vector.broadcast %312 : vector<40x1xf32> to vector<40x32xf32>
    %314 = arith.subf %306, %313 : vector<40x32xf32>
    %315 = arith.mulf %314, %314 : vector<40x32xf32>
    %cst_107 = arith.constant dense<0.000000e+00> : vector<40xf32>
    %316 = vector.multi_reduction <add>, %315, %cst_107 [1] : vector<40x32xf32> to vector<40xf32>
    %317 = vector.shape_cast %316 : vector<40xf32> to vector<40x1xf32>
    %cst_108 = arith.constant 3.200000e+01 : f32
    %318 = vector.broadcast %cst_108 : f32 to vector<40x1xf32>
    %319 = arith.divf %317, %318 : vector<40x1xf32>
    %cst_109 = arith.constant 9.99999997E-7 : f32
    %320 = vector.broadcast %cst_109 : f32 to vector<40x1xf32>
    %321 = arith.addf %319, %320 : vector<40x1xf32>
    %322 = math.rsqrt %321 : vector<40x1xf32>
    %323 = vector.broadcast %322 : vector<40x1xf32> to vector<40x32xf32>
    %324 = arith.mulf %314, %323 : vector<40x32xf32>
    %325 = vector.broadcast %307 : vector<1x32xf32> to vector<40x32xf32>
    %326 = arith.mulf %324, %325 : vector<40x32xf32>
    %327 = vector.broadcast %308 : vector<1x32xf32> to vector<40x32xf32>
    %328 = arith.addf %326, %327 : vector<40x32xf32>
    %329 = arith.truncf %328 : vector<40x32xf32> to vector<40x32xbf16>
    %cst_110 = arith.constant dense<0.000000e+00> : vector<40x64xf32>
    %330 = tpu.matmul %329, %186, %cst_110 {dimension_numbers = #tpu.dot_dimension_numbers<[1], [0], [0], [1], [0, 0, 1, 1], [], []>} : vector<40x32xbf16>, vector<32x64xbf16>, vector<40x64xf32> -> vector<40x64xf32>
    %c18 = arith.constant 18 : index
    %c0_111 = arith.constant 0 : index
    %331 = vector.load %arg5[%c18, %c0_111] : memref<24x128xf32, #tpu.memory_space<vmem>>, vector<1x64xf32>
    %332 = vector.broadcast %331 : vector<1x64xf32> to vector<40x64xf32>
    %333 = arith.addf %330, %332 : vector<40x64xf32>
    %334 = arith.mulf %333, %333 : vector<40x64xf32>
    %335 = arith.mulf %333, %334 : vector<40x64xf32>
    %cst_112 = arith.constant 4.471500e-02 : f32
    %336 = vector.broadcast %cst_112 : f32 to vector<40x64xf32>
    %337 = arith.mulf %336, %335 : vector<40x64xf32>
    %338 = arith.addf %333, %337 : vector<40x64xf32>
    %cst_113 = arith.constant 0.797884583 : f32
    %339 = vector.broadcast %cst_113 : f32 to vector<40x64xf32>
    %340 = arith.mulf %339, %338 : vector<40x64xf32>
    %341 = math.tanh %340 : vector<40x64xf32>
    %cst_114 = arith.constant 1.000000e+00 : f32
    %342 = vector.broadcast %cst_114 : f32 to vector<40x64xf32>
    %343 = arith.addf %342, %341 : vector<40x64xf32>
    %cst_115 = arith.constant 5.000000e-01 : f32
    %344 = vector.broadcast %cst_115 : f32 to vector<40x64xf32>
    %345 = arith.mulf %344, %343 : vector<40x64xf32>
    %346 = arith.mulf %333, %345 : vector<40x64xf32>
    %347 = arith.truncf %346 : vector<40x64xf32> to vector<40x64xbf16>
    %cst_116 = arith.constant dense<0.000000e+00> : vector<40x32xf32>
    %348 = tpu.matmul %347, %187, %cst_116 {dimension_numbers = #tpu.dot_dimension_numbers<[1], [0], [0], [1], [0, 0, 1, 1], [], []>} : vector<40x64xbf16>, vector<64x32xbf16>, vector<40x32xf32> -> vector<40x32xf32>
    %c19 = arith.constant 19 : index
    %c0_117 = arith.constant 0 : index
    %349 = vector.load %arg5[%c19, %c0_117] : memref<24x128xf32, #tpu.memory_space<vmem>>, vector<1x32xf32>
    %350 = vector.broadcast %349 : vector<1x32xf32> to vector<40x32xf32>
    %351 = arith.addf %348, %350 : vector<40x32xf32>
    %352 = arith.addf %306, %351 : vector<40x32xf32>
    %353 = vector.extract_strided_slice %352 {offsets = [0, 0], sizes = [8, 32], strides = [1, 1]} : vector<40x32xf32> to vector<8x32xf32>
    %c20 = arith.constant 20 : index
    %c0_118 = arith.constant 0 : index
    %354 = vector.load %arg5[%c20, %c0_118] : memref<24x128xf32, #tpu.memory_space<vmem>>, vector<1x32xf32>
    %c21 = arith.constant 21 : index
    %c0_119 = arith.constant 0 : index
    %355 = vector.load %arg5[%c21, %c0_119] : memref<24x128xf32, #tpu.memory_space<vmem>>, vector<1x32xf32>
    %cst_120 = arith.constant dense<0.000000e+00> : vector<8xf32>
    %356 = vector.multi_reduction <add>, %353, %cst_120 [1] : vector<8x32xf32> to vector<8xf32>
    %357 = vector.shape_cast %356 : vector<8xf32> to vector<8x1xf32>
    %cst_121 = arith.constant 3.200000e+01 : f32
    %358 = vector.broadcast %cst_121 : f32 to vector<8x1xf32>
    %359 = arith.divf %357, %358 : vector<8x1xf32>
    %360 = vector.broadcast %359 : vector<8x1xf32> to vector<8x32xf32>
    %361 = arith.subf %353, %360 : vector<8x32xf32>
    %362 = arith.mulf %361, %361 : vector<8x32xf32>
    %cst_122 = arith.constant dense<0.000000e+00> : vector<8xf32>
    %363 = vector.multi_reduction <add>, %362, %cst_122 [1] : vector<8x32xf32> to vector<8xf32>
    %364 = vector.shape_cast %363 : vector<8xf32> to vector<8x1xf32>
    %cst_123 = arith.constant 3.200000e+01 : f32
    %365 = vector.broadcast %cst_123 : f32 to vector<8x1xf32>
    %366 = arith.divf %364, %365 : vector<8x1xf32>
    %cst_124 = arith.constant 9.99999997E-7 : f32
    %367 = vector.broadcast %cst_124 : f32 to vector<8x1xf32>
    %368 = arith.addf %366, %367 : vector<8x1xf32>
    %369 = math.rsqrt %368 : vector<8x1xf32>
    %370 = vector.broadcast %369 : vector<8x1xf32> to vector<8x32xf32>
    %371 = arith.mulf %361, %370 : vector<8x32xf32>
    %372 = vector.broadcast %354 : vector<1x32xf32> to vector<8x32xf32>
    %373 = arith.mulf %371, %372 : vector<8x32xf32>
    %374 = vector.broadcast %355 : vector<1x32xf32> to vector<8x32xf32>
    %375 = arith.addf %373, %374 : vector<8x32xf32>
    %376 = arith.truncf %375 : vector<8x32xf32> to vector<8x32xbf16>
    %c64_125 = arith.constant 64 : index
    %c0_126 = arith.constant 0 : index
    %377 = vector.load %arg4[%c64_125, %c0_126] : memref<104x128xbf16, #tpu.memory_space<vmem>>, vector<32x128xbf16>
    %cst_127 = arith.constant dense<0.000000e+00> : vector<8x128xf32>
    %378 = tpu.matmul %376, %377, %cst_127 {dimension_numbers = #tpu.dot_dimension_numbers<[1], [0], [0], [1], [0, 0, 1, 1], [], []>} : vector<8x32xbf16>, vector<32x128xbf16>, vector<8x128xf32> -> vector<8x128xf32>
    %c22 = arith.constant 22 : index
    %c0_128 = arith.constant 0 : index
    %379 = vector.load %arg5[%c22, %c0_128] : memref<24x128xf32, #tpu.memory_space<vmem>>, vector<1x128xf32>
    %380 = vector.broadcast %379 : vector<1x128xf32> to vector<8x128xf32>
    %381 = arith.addf %378, %380 : vector<8x128xf32>
    %c0_129 = arith.constant 0 : index
    %c0_130 = arith.constant 0 : index
    %382 = vector.load %arg6[%c0_129, %c0_130] : memref<8x128xf32, #tpu.memory_space<vmem>>, vector<8x128xf32>
    tpu.vector_store %arg6[%c0_129, %c0_130], %381 {strides = array<i32>} : memref<8x128xf32, #tpu.memory_space<vmem>>, vector<8x128xf32>,
    return
  }
}

</mosaic_0001>

<bundles_post_ra>
// kernel: vit_forward.1
= control target key start
LH: loop header
LB: loop body
LE: loop exit
PB: predicated region body
PF: predicated region fallthrough
CT: control target
= control target key end

     0   :  { %11 = vsyncpa [#allocation3], 0  ;;  %s6138_s0 = inlined_call_operand.hbm [shape: f32[40,64], index: 0, kind: input, shape index: {}]   ;;  %s6139_s1 = inlined_call_operand.hbm [shape: f32[40,32], index: 1, kind: input, shape index: {}]   ;;  %s6140_s2 = inlined_call_operand.hbm [shape: f32[40,40], index: 2, kind: input, shape index: {}]   ;;  %s6141_s3 = inlined_call_operand.hbm [shape: bf16[448,128], index: 3, kind: input, shape index: {}]   ;;  %s6142_s4 = inlined_call_operand.hbm [shape: bf16[104,128], index: 4, kind: input, shape index: {}]   ;;  %s6143_s5 = inlined_call_operand.hbm [shape: f32[24,128], index: 5, kind: input, shape index: {}]   ;;  %s6144_s6 = inlined_call_operand.hbm [shape: f32[8,128], index: 6, kind: output, shape index: {}]  }
   0x1   :  { %12 = vsyncpa [#allocation6], 0 }
   0x2   :  { %13 = vsyncpa [#allocation9], 0 }
   0x3   :  { %14 = vsyncpa [#allocation12], 0 }
   0x4   :  { %15 = vsyncpa [#allocation4], 0  ;;  %s4843_s21 = smov [#allocation5]   ;;  %s4844_s23 = smov [#allocation8]  }
   0x5   :  { %s33_s22 = sshll.u32 %s4843_s21, 4  ;;  %s57_s24 = sshll.u32 %s4844_s23, 4  ;;  %s34_s22 = int_to_ptr.vmem [resolvable:$true] %s33_s22  ;;  %s4891_s24 = int_to_ptr.vmem [resolvable:$true] %s57_s24 }
   0x6   :  { %s4679_s27 = scalar_lea.hbm %s6139_s1, 640 }
   0x7   :  { %p4680_p0 = scmp.ne.s32.totalorder %s6139_s1, %s4679_s27  ;;  %p4683_p1 = scmp.lt.u32.totalorder %s4679_s27, %s6139_s1 }
   0x9   :  { %p4685_p2 = pnand %p4683_p1, %p4680_p0 }
   0xb   :  { %4688 = shalt.err (!%p4685_p2)
}
   0xc   :  { %s4689_s8 = scalar_lea.vmem %s34_s22, 640  ;;  %p4694_p4 = scmp.lt.s32.totalorder %s34_s22, %s34_s22 }
   0xd   :  { %p4690_p3 = scmp.ne.s32.totalorder %s34_s22, %s4689_s8  ;;  %p4695_p5 = scmp.lt.s32.totalorder %s4689_s8, %s4689_s8 }
   0xf   :  { %p4696_p6 = por %p4695_p5, %p4694_p4 }
  0x11   :  { %p4697_p7 = pnand %p4696_p6, %p4690_p3 }
  0x13   :  { %4700 = shalt.err (!%p4697_p7)
}
  0x14   :  { %s4845_s9 = smov 128   ;;  %s4846_s10 = smov 8  }
  0x15   :  { %39 = dma.hbm_to_vmem [thread:$0]  %s6139_s1, 640, %s34_s22, [#allocation6], %s4845_s9, %s4845_s9, %s4846_s10  }
  0x16   :  { %s4701_s15 = scalar_lea.hbm %s6141_s3, 3584 }
  0x17   :  { %p4702_p8 = scmp.ne.s32.totalorder %s6141_s3, %s4701_s15  ;;  %p4705_p9 = scmp.lt.u32.totalorder %s4701_s15, %s6141_s3 }
  0x19   :  { %p4707_p10 = pnand %p4705_p9, %p4702_p8 }
  0x1b   :  { %4710 = shalt.err (!%p4707_p10)
}
  0x1c   :  { %s4711_s20 = scalar_lea.vmem %s4891_s24, 3584  ;;  %p4716_p12 = scmp.lt.s32.totalorder %s4891_s24, %s4891_s24 }
  0x1d   :  { %p4712_p11 = scmp.ne.s32.totalorder %s4891_s24, %s4711_s20  ;;  %p4717_p13 = scmp.lt.s32.totalorder %s4711_s20, %s4711_s20 }
  0x1f   :  { %p4718_p0 = por %p4717_p13, %p4716_p12 }
  0x21   :  { %p4719_p1 = pnand %p4718_p0, %p4712_p11 }
  0x23   :  { %4722 = shalt.err (!%p4719_p1)
}
  0x24   :  { %s4847_s1 = smov 64   ;;  %s4848_s21 = smov 4  }
  0x25   :  { %63 = dma.hbm_to_vmem [thread:$0]  %s6141_s3, 3584, %s4891_s24, [#allocation9], %s4847_s1, %s4847_s1, %s4848_s21  }
  0x26   :  { %s4849_s25 = smov [#allocation2]   ;;  %s4850_s27 = smov [#allocation7]  }
  0x27   :  { %s21_s26 = sshll.u32 %s4849_s25, 4  ;;  %s45_s28 = sshll.u32 %s4850_s27, 4  ;;  %s22_s26 = int_to_ptr.vmem [resolvable:$true] %s21_s26  ;;  %s4928_s28 = int_to_ptr.vmem [resolvable:$true] %s45_s28 }
  0x28   :  { %s4723_s7 = scalar_lea.hbm %s6138_s0, 640 }
  0x29   :  { %p4724_p2 = scmp.ne.s32.totalorder %s6138_s0, %s4723_s7  ;;  %p4727_p3 = scmp.lt.u32.totalorder %s4723_s7, %s6138_s0 }
  0x2b   :  { %p4729_p4 = pnand %p4727_p3, %p4724_p2 }
  0x2d   :  { %4732 = shalt.err (!%p4729_p4)
}
  0x2e   :  { %s4733_s3 = scalar_lea.vmem %s22_s26, 640  ;;  %p4738_p6 = scmp.lt.s32.totalorder %s22_s26, %s22_s26 }
  0x2f   :  { %p4734_p5 = scmp.ne.s32.totalorder %s22_s26, %s4733_s3  ;;  %p4739_p7 = scmp.lt.s32.totalorder %s4733_s3, %s4733_s3 }
  0x31   :  { %p4740_p8 = por %p4739_p7, %p4738_p6 }
  0x33   :  { %p4741_p9 = pnand %p4740_p8, %p4734_p5 }
  0x35   :  { %4744 = shalt.err (!%p4741_p9)
}
  0x36   :  { %27 = dma.hbm_to_vmem [thread:$0]  %s6138_s0, 640, %s22_s26, [#allocation3], %s4845_s9, %s4845_s9, %s4846_s10  }
  0x37   :  { %s4745_s17 = scalar_lea.hbm %s6140_s2, 640 }
  0x38   :  { %p4746_p10 = scmp.ne.s32.totalorder %s6140_s2, %s4745_s17  ;;  %p4749_p11 = scmp.lt.u32.totalorder %s4745_s17, %s6140_s2 }
  0x3a   :  { %p4751_p12 = pnand %p4749_p11, %p4746_p10 }
  0x3c   :  { %4754 = shalt.err (!%p4751_p12)
}
  0x3d   :  { %s4755_s23 = scalar_lea.vmem %s4928_s28, 640  ;;  %p4760_p0 = scmp.lt.s32.totalorder %s4928_s28, %s4928_s28 }
  0x3e   :  { %p4756_p13 = scmp.ne.s32.totalorder %s4928_s28, %s4755_s23  ;;  %p4761_p1 = scmp.lt.s32.totalorder %s4755_s23, %s4755_s23 }
  0x40   :  { %p4762_p2 = por %p4761_p1, %p4760_p0 }
  0x42   :  { %p4763_p3 = pnand %p4762_p2, %p4756_p13 }
  0x44   :  { %4766 = shalt.err (!%p4763_p3)
}
  0x45   :  { %51 = dma.hbm_to_vmem [thread:$0]  %s6140_s2, 640, %s4928_s28, [#allocation6], %s4845_s9, %s4845_s9, %s4846_s10  }
  0x46   :  { %s4851_s26 = smov [#allocation10]   ;;  %s4852_s29 = smov [#allocation11]  }
  0x47   :  { %s69_s27 = sshll.u32 %s4851_s26, 4  ;;  %s81_s30 = sshll.u32 %s4852_s29, 4  ;;  %s70_s27 = int_to_ptr.vmem [resolvable:$true] %s69_s27  ;;  %s4965_s30 = int_to_ptr.vmem [resolvable:$true] %s81_s30 }
  0x48   :  { %s4767_s11 = scalar_lea.hbm %s6142_s4, 832 }
  0x49   :  { %p4768_p4 = scmp.ne.s32.totalorder %s6142_s4, %s4767_s11  ;;  %p4771_p5 = scmp.lt.u32.totalorder %s4767_s11, %s6142_s4 }
  0x4b   :  { %p4773_p6 = pnand %p4771_p5, %p4768_p4 }
  0x4d   :  { %4776 = shalt.err (!%p4773_p6)
}
  0x4e   :  { %s4777_s2 = scalar_lea.vmem %s70_s27, 832  ;;  %p4782_p8 = scmp.lt.s32.totalorder %s70_s27, %s70_s27 }
  0x4f   :  { %p4778_p7 = scmp.ne.s32.totalorder %s70_s27, %s4777_s2  ;;  %p4783_p9 = scmp.lt.s32.totalorder %s4777_s2, %s4777_s2 }
  0x51   :  { %p4784_p10 = por %p4783_p9, %p4782_p8 }
  0x53   :  { %p4785_p11 = pnand %p4784_p10, %p4778_p7 }
  0x55   :  { %4788 = shalt.err (!%p4785_p11)
}
  0x56   :  { %75 = dma.hbm_to_vmem [thread:$0]  %s6142_s4, 832, %s70_s27, [#allocation9], %s4847_s1, %s4847_s1, %s4848_s21  }
  0x57   :  { %s4789_s17 = scalar_lea.hbm %s6143_s5, 384 }
  0x58   :  { %p4790_p12 = scmp.ne.s32.totalorder %s6143_s5, %s4789_s17  ;;  %p4793_p13 = scmp.lt.u32.totalorder %s4789_s17, %s6143_s5 }
  0x5a   :  { %p4795_p0 = pnand %p4793_p13, %p4790_p12 }
  0x5c   :  { %4798 = shalt.err (!%p4795_p0)
}
  0x5d   :  { %s4799_s23 = scalar_lea.vmem %s4965_s30, 384  ;;  %p4804_p2 = scmp.lt.s32.totalorder %s4965_s30, %s4965_s30 }
  0x5e   :  { %p4800_p1 = scmp.ne.s32.totalorder %s4965_s30, %s4799_s23  ;;  %p4805_p3 = scmp.lt.s32.totalorder %s4799_s23, %s4799_s23 }
  0x60   :  { %p4806_p4 = por %p4805_p3, %p4804_p2 }
  0x62   :  { %p4807_p5 = pnand %p4806_p4, %p4800_p1 }
  0x64   :  { %4810 = shalt.err (!%p4807_p5)
}
  0x65   :  { %87 = dma.hbm_to_vmem [thread:$0]  %s6143_s5, 384, %s4965_s30, [#allocation12], %s4845_s9, %s4845_s9, %s4846_s10  }
  0x66   :  { %4833 = dma.done.wait [#allocation3], 640  }
  0x67   :  { %4834 = vsyncadd [#allocation3], 4294966656 }
  0x68   :  { %4835 = dma.done.wait [#allocation6], 1280  }
  0x69   :  { %4836 = vsyncadd [#allocation6], 4294966016 }
  0x6a   :  { %4837 = dma.done.wait [#allocation9], 4416  }
  0x6b   :  { %4838 = vsyncadd [#allocation9], 4294962880 }
  0x6c   :  { %4839 = dma.done.wait [#allocation12], 384  }
  0x6d   :  { %4840 = vsyncadd [#allocation12], 4294966912  ;;  %v4853_v0 = vmov 0.0   ;;  %vm4854_vm0 = vmmov 0   ;;  %v4418_v1 = vld [vmem:[#allocation10] sm:$0xff]   ;;  %v4419_v2 = vld [vmem:[#allocation10 + $0x8] sm:$0xff]  }
  0x6e   :  { %3817 = vmatprep.subr.bf16.mxu0 %v4853_v0  ;;  %3825 = vmatprep.mubr.msk.bf16.mxu0 %vm4854_vm0, %v4853_v0  ;;  %v4420_v3 = vld [vmem:[#allocation10 + $0x10] sm:$0xff]   ;;  %vm159_vm1 = vcmask 523264   ;;  %v4421_v4 = vld [vmem:[#allocation10 + $0x18] sm:$0xff]   ;;  %v122_v5 = vld [vmem:[#allocation2] sm:$0xff]  ;;  %vm255_vm2 = vcmask 261120   ;;  %vm871_vm3 = vcmask 1043456  }
  0x6f   :  { %3837 = vmatprep.subr.bf16.mxu1 %v4853_v0  ;;  %3841 = vmatprep.mubr.msk.bf16.mxu1 %vm4854_vm0, %v4853_v0  ;;  %v123_v6 = vld [vmem:[#allocation2 + $0x8] sm:$0xff]  ;;  %v124_v8 = vld [vmem:[#allocation2 + $0x10] sm:$0xff]  ;;  %v125_v9 = vld [vmem:[#allocation2 + $0x18] sm:$0xff]  ;;  %vm664_vm4 = vcmask 326656   ;;  %s4855_s5 = smov [#allocation13]  }
  0x70   :  { %3818 = vmatpush3.bf16.msra.mxu0 %v4418_v1  ;;  %v127_v7 = vpack.c.bf16 %v123_v6, %v122_v5  ;;  %v128_v10 = vpack.c.bf16 %v125_v9, %v124_v8  ;;  %v126_v11 = vld [vmem:[#allocation2 + $0x20] sm:$0xff]  ;;  %v130_v13 = vld [vmem:[#allocation5] sm:$0xff]  ;;  %v131_v15 = vld [vmem:[#allocation5 + $0x8] sm:$0xff]  ;;  %s3490_s9 = sshll.u32 %s4855_s5, 4  ;;  %s3491_s9 = int_to_ptr.vmem [resolvable:$true] %s3490_s9 }
  0x71   :  { %3819 = vmatprep.subr.bf16.mxu0 %v4853_v0  ;;  %v129_v12 = vpack.c.bf16 %v126_v11, %v126_v11  ;;  %v132_v22 = vld [vmem:[#allocation5 + $0x10] sm:$0xff]  ;;  %v133_v25 = vld [vmem:[#allocation5 + $0x18] sm:$0xff]  ;;  %v134_v32 = vld [vmem:[#allocation5 + $0x20] sm:$0xff]  ;;  %s4811_s10 = scalar_lea.vmem %s3491_s9, 128  ;;  %p4816_p7 = scmp.lt.s32.totalorder %s3491_s9, %s3491_s9 }
  0x72   :  { %v4425_v5 = vld [vmem:[#allocation8 + $0x28] sm:$0xff]   ;;  %p4812_p6 = scmp.ne.s32.totalorder %s3491_s9, %s4811_s10  ;;  %p4817_p8 = scmp.lt.s32.totalorder %s4811_s10, %s4811_s10 }
  0x74   :  { %3820 = vmatpush3.bf16.msra.mxu0 %v4419_v2  ;;  %v4422_v2 = vld [vmem:[#allocation8] sm:$0xff]   ;;  %p4818_p9 = por %p4817_p8, %p4816_p7 }
  0x75   :  { %3821 = vmatprep.subr.bf16.mxu0 %v4853_v0  ;;  %3838 = vmatpush3.bf16.msra.mxu1 %v4422_v2 }
  0x76   :  { %3839 = vmatprep.subr.bf16.mxu1 %v4853_v0  ;;  %p4819_p10 = pnand %p4818_p9, %p4812_p6 }
  0x78   :  { %3822 = vmatpush3.bf16.msra.mxu0 %v4420_v3  ;;  %v4423_v3 = vld [vmem:[#allocation8 + $0x20] sm:$0xff]  }
  0x79   :  { %3823 = vmatprep.subr.bf16.mxu0 %v4853_v0 }
  0x7c   :  { %3824 = vmatpush3.bf16.msra.mxu0 %v4421_v4  ;;  %v4424_v4 = vld [vmem:[#allocation8 + $0x8] sm:$0xff]  }
  0x7d   :  { %3869 = vmatprep.subr.bf16.mxu0 %v4853_v0  ;;  %3840 = vmatpush3.bf16.msra.mxu1 %v4424_v4 }
  0x7e   :  { %3853 = vmatprep.subr.bf16.mxu1 %v4853_v0 }
  0x7f   :  { %3826 = vmatmul.mubr.msk.bf16.vlgmr.msra.gmra.mrb[0].mxu0 %vm159_vm1, %v127_v7 }
  0x80   :  { %3829 = vmatprep.mubr.msk.bf16.mxu0 %vm4854_vm0, %v4853_v0  ;;  %3870 = vmatpush3.bf16.msra.mxu0 %v4423_v3 }
  0x81   :  { %3871 = vmatprep.subr.bf16.mxu0 %v4853_v0 }
  0x84   :  { %3872 = vmatpush3.bf16.msra.mxu0 %v4425_v5 }
  0x85   :  { %3903 = vmatprep.subr.bf16.mxu0 %v4853_v0 }
  0x87   :  { %3830 = vmatmul.mubr.msk.bf16.gmra.mrb[4].mxu0 %vm159_vm1, %v128_v10 }
  0x88   :  { %3833 = vmatprep.mubr.msk.bf16.mxu0 %vm4854_vm0, %v4853_v0 }
  0x8f   :  { %3834 = vmatmul.mubr.msk.bf16.gmra.mrb[8].mxu0 %vm159_vm1, %v129_v12 }
  0x90   :  { %3873 = vmatprep.mubr.msk.bf16.mxu0 %vm4854_vm0, %v4853_v0 }
 0x152   :  { %v203_v14 = vpop.f32.mrb[0].mxu0 }
 0x153   :  { %v5021_v16 = vadd.f32 %v203_v14, %v130_v13  ;;  %v3827_v17 = vpop.f32.mrb[1].mxu0 }
 0x154   :  { %v206_v18 = vpop.f32.mrb[2].mxu0 }
 0x155   :  { %v5023_v19 = vadd.f32 %v206_v18, %v131_v15  ;;  %v3828_v20 = vpop.f32.mrb[3].mxu0  ;;  %v256_v21 = vsel %vm255_vm2, %v5021_v16, 0.0 }
 0x156   :  { %257 = vadd.xlane.f32.xlu0 %v256_v21 }
 0x157   :  { %v259_v23 = vsel %vm255_vm2, %v5023_v19, 0.0 }
 0x15a   :  { %260 = vadd.xlane.f32.xlu0 %v259_v23  ;;  %v211_v24 = vpop.f32.mrb[4].mxu0 }
 0x15b   :  { %v5029_v26 = vadd.f32 %v211_v24, %v132_v22  ;;  %v3831_v27 = vpop.f32.mrb[5].mxu0  ;;  %v3509_v24 = vld [vmem:[#allocation11] ss:$0 sm:$0xff] }
 0x15c   :  { %v214_v28 = vpop.f32.mrb[6].mxu0 }
 0x15d   :  { %v5031_v29 = vadd.f32 %v214_v28, %v133_v25  ;;  %v3832_v30 = vpop.f32.mrb[7].mxu0  ;;  %v262_v31 = vsel %vm255_vm2, %v5029_v26, 0.0 }
 0x15e   :  { %263 = vadd.xlane.f32.xlu1 %v262_v31  ;;  %v3510_v31 = vld [vmem:[#allocation11 + $0x1] ss:$0 sm:$0xff] }
 0x15f   :  { %v265_v33 = vsel %vm255_vm2, %v5031_v29, 0.0 }
 0x162   :  { %266 = vadd.xlane.f32.xlu1 %v265_v33  ;;  %v219_v34 = vpop.f32.mrb[8].mxu0 }
 0x163   :  { %v5037_v35 = vadd.f32 %v219_v34, %v134_v32  ;;  %v3835_v36 = vpop.f32.mrb[9].mxu0 }
 0x164   :  { %v222_v37 = vpop.f32.mrb[10].mxu0 }
 0x165   :  { %v268_v38 = vsel %vm255_vm2, %v5037_v35, 0.0  ;;  %v3836_v39 = vpop.f32.mrb[11].mxu0 }
 0x166   :  { %269 = vadd.xlane.f32.xlu0 %v268_v38  ;;  %v4426_v38 = vld [vmem:[#allocation8 + $0x10] sm:$0xff]  }
 0x1e3   :  { %v258_v40 = vpop.xlane.xlu0 %257 }
 0x1e4   :  { %v272_v41 = vmul.f32 0.03125, %v258_v40 }
 0x1e6   :  { %v277_v42 = vsub.f32 %v5021_v16, %v272_v41 }
 0x1e7   :  { %v261_v43 = vpop.xlane.xlu0 %260 }
 0x1e8   :  { %v273_v44 = vmul.f32 0.03125, %v261_v43  ;;  %v282_v45 = vmul.f32 %v277_v42, %v277_v42  ;;  %v4427_v43 = vld [vmem:[#allocation8 + $0x18] sm:$0xff]  }
 0x1ea   :  { %v278_v46 = vsub.f32 %v5023_v19, %v273_v44  ;;  %v287_v47 = vsel %vm255_vm2, %v282_v45, 0.0 }
 0x1eb   :  { %v264_v48 = vpop.xlane.xlu1 %263  ;;  %288 = vadd.xlane.f32.xlu1 %v287_v47 }
 0x1ec   :  { %v274_v49 = vmul.f32 0.03125, %v264_v48  ;;  %v283_v50 = vmul.f32 %v278_v46, %v278_v46 }
 0x1ee   :  { %v279_v51 = vsub.f32 %v5029_v26, %v274_v49  ;;  %v290_v52 = vsel %vm255_vm2, %v283_v50, 0.0 }
 0x1ef   :  { %v267_v53 = vpop.xlane.xlu1 %266  ;;  %291 = vadd.xlane.f32.xlu0 %v290_v52 }
 0x1f0   :  { %v275_v54 = vmul.f32 0.03125, %v267_v53  ;;  %v284_v55 = vmul.f32 %v279_v51, %v279_v51  ;;  %v5089_v53 = vld [vmem:[#allocation11 + $0x2] ss:$0 sm:$0xff] }
 0x1f2   :  { %v280_v56 = vsub.f32 %v5031_v29, %v275_v54  ;;  %v293_v57 = vsel %vm255_vm2, %v284_v55, 0.0  ;;  %v5091_v55 = vld [vmem:[#allocation11 + $0x4] ss:$0 sm:$0xff] }
 0x1f3   :  { %294 = vadd.xlane.f32.xlu1 %v293_v57  ;;  %v270_v58 = vpop.xlane.xlu0 %269 }
 0x1f4   :  { %v276_v59 = vmul.f32 0.03125, %v270_v58  ;;  %v285_v60 = vmul.f32 %v280_v56, %v280_v56 }
 0x1f6   :  { %v5049_v61 = vsub.f32 %v5037_v35, %v276_v59  ;;  %v296_v62 = vsel %vm255_vm2, %v285_v60, 0.0 }
 0x1f7   :  { %297 = vadd.xlane.f32.xlu0 %v296_v62 }
 0x1f8   :  { %v286_v63 = vmul.f32 %v5049_v61, %v5049_v61 }
 0x1fa   :  { %v299_v1 = vsel %vm255_vm2, %v286_v63, 0.0 }
 0x1fb   :  { %300 = vadd.xlane.f32.xlu1 %v299_v1 }
 0x278   :  { %v289_v6 = vpop.xlane.xlu1 %288 }
 0x279   :  { %v302_v7 = vmul.f32 0.03125, %v289_v6 }
 0x27b   :  { %v307_v8 = vadd.f32 1e-06, %v302_v7 }
 0x27c   :  { %v292_v9 = vpop.xlane.xlu0 %291 }
 0x27d   :  { %4452 = vrsqrt.f32 %v307_v8  ;;  %v303_v10 = vmul.f32 0.03125, %v292_v9 }
 0x27f   :  { %v308_v11 = vadd.f32 1e-06, %v303_v10 }
 0x280   :  { %v295_v12 = vpop.xlane.xlu1 %294 }
 0x281   :  { %4454 = vrsqrt.f32 %v308_v11  ;;  %v304_v13 = vmul.f32 0.03125, %v295_v12 }
 0x283   :  { %v309_v14 = vadd.f32 1e-06, %v304_v13 }
 0x284   :  { %v298_v15 = vpop.xlane.xlu0 %297 }
 0x285   :  { %4456 = vrsqrt.f32 %v309_v14  ;;  %v305_v17 = vmul.f32 0.03125, %v298_v15 }
 0x287   :  { %v4453_v18 = vpop.eup %4452  ;;  %v310_v20 = vadd.f32 1e-06, %v305_v17 }
 0x288   :  { %v301_v21 = vpop.xlane.xlu1 %300  ;;  %v317_v22 = vmul.f32 %v4453_v18, %v277_v42 }
 0x289   :  { %4458 = vrsqrt.f32 %v310_v20  ;;  %v306_v23 = vmul.f32 0.03125, %v301_v21 }
 0x28a   :  { %v326_v30 = vmul.f32 %v3509_v24, %v317_v22 }
 0x28b   :  { %v4455_v25 = vpop.eup %4454  ;;  %v311_v27 = vadd.f32 1e-06, %v306_v23 }
 0x28c   :  { %v318_v28 = vmul.f32 %v4455_v25, %v278_v46  ;;  %v335_v34 = vadd.f32 %v3510_v31, %v326_v30 }
 0x28d   :  { %4460 = vrsqrt.f32 %v311_v27 }
 0x28e   :  { %v327_v32 = vmul.f32 %v3509_v24, %v318_v28 }
 0x28f   :  { %v4457_v33 = vpop.eup %4456 }
 0x290   :  { %v336_v36 = vadd.f32 %v3510_v31, %v327_v32  ;;  %v319_v37 = vmul.f32 %v4457_v33, %v279_v51  ;;  %v3517_v32 = vld [vmem:[#allocation11 + $0x3] ss:$0 sm:$0xff] }
 0x292   :  { %v340_v39 = vpack.c.bf16 %v336_v36, %v335_v34  ;;  %v328_v42 = vmul.f32 %v3509_v24, %v319_v37 }
 0x293   :  { %v4459_v40 = vpop.eup %4458 }
 0x294   :  { %3842 = vmatmul.mubr.msk.bf16.vlgmr.msra.gmra.mrb[0].mxu1 %vm255_vm2, %v340_v39  ;;  %3874 = vmatmul.mubr.msk.bf16.vlgmr.msra.gmra.mrb[12].mxu0 %vm255_vm2, %v340_v39  ;;  %v320_v41 = vmul.f32 %v4459_v40, %v280_v56  ;;  %v337_v46 = vadd.f32 %v3510_v31, %v328_v42 }
 0x295   :  { %3854 = vmatpush3.bf16.msra.mxu1 %v4426_v38  ;;  %3845 = vmatprep.mubr.msk.bf16.mxu1 %vm4854_vm0, %v4853_v0 }
 0x296   :  { %3877 = vmatprep.mubr.msk.bf16.mxu0 %vm4854_vm0, %v4853_v0  ;;  %v329_v44 = vmul.f32 %v3509_v24, %v320_v41  ;;  %3855 = vmatprep.subr.bf16.mxu1 %v4853_v0 }
 0x297   :  { %v4461_v45 = vpop.eup %4460 }
 0x298   :  { %v338_v47 = vadd.f32 %v3510_v31, %v329_v44  ;;  %v321_v48 = vmul.f32 %v4461_v45, %v5049_v61 }
 0x299   :  { %3856 = vmatpush3.bf16.msra.mxu1 %v4427_v43 }
 0x29a   :  { %v341_v49 = vpack.c.bf16 %v338_v47, %v337_v46  ;;  %v330_v50 = vmul.f32 %v3509_v24, %v321_v48  ;;  %3885 = vmatprep.subr.bf16.mxu1 %v4853_v0  ;;  %v583_v48 = vlaneseq }
 0x29c   :  { %3846 = vmatmul.mubr.msk.bf16.gmra.mrb[4].mxu1 %vm255_vm2, %v341_v49  ;;  %3878 = vmatmul.mubr.msk.bf16.gmra.mrb[16].mxu0 %vm255_vm2, %v341_v49  ;;  %v339_v51 = vadd.f32 %v3510_v31, %v330_v50  ;;  %v112_v50 = vld [vmem:[#allocation10 + $0x30] sm:$0x1] }
 0x29d   :  { %3849 = vmatprep.mubr.msk.bf16.mxu1 %vm4854_vm0, %v4853_v0  ;;  %3881 = vmatprep.mubr.msk.bf16.mxu0 %vm4854_vm0, %v4853_v0 }
 0x29e   :  { %v342_v52 = vpack.c.bf16 %v339_v51, %v339_v51 }
 0x2a4   :  { %3850 = vmatmul.mubr.msk.bf16.gmra.mrb[8].mxu1 %vm255_vm2, %v342_v52  ;;  %3882 = vmatmul.mubr.msk.bf16.gmra.mrb[20].mxu0 %vm255_vm2, %v342_v52 }
 0x2a5   :  { %3857 = vmatprep.mubr.msk.bf16.mxu1 %vm4854_vm0, %v4853_v0  ;;  %3909 = vmatprep.mubr.msk.bf16.mxu0 %vm4854_vm0, %v4853_v0 }
 0x2ac   :  { %3858 = vmatmul.mubr.msk.bf16.vlgmr.msra.gmra.mrb[12].mxu1 %vm255_vm2, %v340_v39 }
 0x2ad   :  { %3861 = vmatprep.mubr.msk.bf16.mxu1 %vm4854_vm0, %v4853_v0 }
 0x2b4   :  { %3862 = vmatmul.mubr.msk.bf16.gmra.mrb[16].mxu1 %vm255_vm2, %v341_v49 }
 0x2b5   :  { %3865 = vmatprep.mubr.msk.bf16.mxu1 %vm4854_vm0, %v4853_v0 }
 0x2bc   :  { %3866 = vmatmul.mubr.msk.bf16.gmra.mrb[20].mxu1 %vm255_vm2, %v342_v52 }
 0x2bd   :  { %3891 = vmatprep.mubr.msk.bf16.mxu1 %vm4854_vm0, %v4853_v0 }
 0x367   :  { %v403_v54 = vpop.f32.mrb[0].mxu1  ;;  %v549_v56 = vpop.f32.mrb[12].mxu0 }
 0x368   :  { %v3843_v57 = vpop.f32.mrb[1].mxu1  ;;  %v3875_v58 = vpop.f32.mrb[13].mxu0  ;;  %v404_v61 = vadd.f32 %v5089_v53, %v403_v54  ;;  %v550_v62 = vadd.f32 %v5091_v55, %v549_v56  ;;  %v5123_v54 = vshrl.u32 %v583_v48, 7  ;;  %v726_v56 = vshrl.u32 %v112_v50, 16 }
 0x369   :  { %v406_v59 = vpop.f32.mrb[2].mxu1  ;;  %v552_v60 = vpop.f32.mrb[14].mxu0 }
 0x36a   :  { %v407_v63 = vadd.f32 %v5089_v53, %v406_v59  ;;  %v553_v1 = vadd.f32 %v5091_v55, %v552_v60  ;;  %v3844_v2 = vpop.f32.mrb[3].mxu1  ;;  %v3876_v3 = vpop.f32.mrb[15].mxu0 }
 0x36c   :  { %v5097_v4 = vpack.c.bf16 %v407_v63, %v404_v61  ;;  %v5099_v5 = vpack.c.bf16 %v553_v1, %v550_v62  ;;  %v581_v62 = vpack.i.b16 %v112_v50, %v112_v50  ;;  %v585_v63 = vsub.s32 0, %v5123_v54 }
 0x36d   :  { %v727_v1 = vpack.i.b16 %v726_v56, %v726_v56  ;;  %v5243_v56 = vld [vmem:[#allocation7 + $0x18] sm:$0xff] }
 0x36e   :  { %v5133_v3 = vrot.slane %v581_v62, %v585_v63 }
 0x36f   :  { %v411_v6 = vpop.f32.mrb[4].mxu1  ;;  %v557_v7 = vpop.f32.mrb[16].mxu0 }
 0x370   :  { %v3847_v8 = vpop.f32.mrb[5].mxu1  ;;  %v3879_v9 = vpop.f32.mrb[17].mxu0  ;;  %v412_v12 = vadd.f32 %v5089_v53, %v411_v6  ;;  %v558_v13 = vadd.f32 %v5091_v55, %v557_v7  ;;  %v5135_v6 = vrot.slane %v727_v1, %v585_v63 }
 0x371   :  { %v414_v10 = vpop.f32.mrb[6].mxu1  ;;  %v560_v11 = vpop.f32.mrb[18].mxu0  ;;  %v587_v8 = vmul.bf16 %v5133_v3, %v5097_v4 }
 0x372   :  { %v415_v14 = vadd.f32 %v5089_v53, %v414_v10  ;;  %v561_v15 = vadd.f32 %v5091_v55, %v560_v11  ;;  %v3848_v17 = vpop.f32.mrb[7].mxu1  ;;  %v3880_v18 = vpop.f32.mrb[19].mxu0  ;;  %v733_v9 = vmul.bf16 %v5135_v6, %v5097_v4  ;;  %v859_v10 = vmul.bf16 %v5135_v6, %v5099_v5 }
 0x374   :  { %v5105_v20 = vpack.c.bf16 %v415_v14, %v412_v12  ;;  %v5107_v21 = vpack.c.bf16 %v561_v15, %v558_v13 }
 0x376   :  { %v588_v14 = vmul.bf16 %v5133_v3, %v5105_v20  ;;  %v734_v15 = vmul.bf16 %v5135_v6, %v5105_v20 }
 0x377   :  { %v5109_v22 = vpop.f32.mrb[8].mxu1  ;;  %v565_v23 = vpop.f32.mrb[20].mxu0 }
 0x378   :  { %v3851_v24 = vpop.f32.mrb[9].mxu1  ;;  %v3883_v25 = vpop.f32.mrb[21].mxu0  ;;  %v566_v7 = vadd.f32 %v5091_v55, %v565_v23  ;;  %v860_v55 = vmul.bf16 %v5135_v6, %v5107_v21  ;;  %v420_v13 = vadd.f32 %v5089_v53, %v5109_v22  ;;  %v113_v53 = vld [vmem:[#allocation10 + $0x30] sm:$0x2]  ;;  %v1004_v23 = vsub.s32 1, %v5123_v54 }
 0x379   :  { %v422_v27 = vpop.f32.mrb[10].mxu1  ;;  %v568_v28 = vpop.f32.mrb[22].mxu0  ;;  %v1000_v22 = vpack.i.b16 %v113_v53, %v113_v53 }
 0x37a   :  { %v3852_v30 = vpop.f32.mrb[11].mxu1  ;;  %v3884_v31 = vpop.f32.mrb[23].mxu0  ;;  %v5146_v11 = vpack.c.bf16 %v566_v7, %v566_v7  ;;  %v573_v18 = vpack.c.bf16 %v420_v13, %v420_v13 }
 0x37b   :  { %v5186_v27 = vrot.slane %v1000_v22, %v1004_v23  ;;  %v1208_v31 = vshrl.u32 %v113_v53, 16 }
 0x37c   :  { %v861_v12 = vmul.bf16 %v5135_v6, %v5146_v11  ;;  %v589_v24 = vmul.bf16 %v5133_v3, %v573_v18  ;;  %v735_v25 = vmul.bf16 %v5135_v6, %v573_v18 }
 0x37d   :  { %v1006_v28 = vmul.bf16 %v5186_v27, %v5097_v4  ;;  %v1007_v30 = vmul.bf16 %v5186_v27, %v5105_v20 }
 0x37e   :  { %v873_v17 = vsel %vm871_vm3, %v861_v12, 0 }
 0x37f   :  { %v476_v33 = vpop.f32.mrb[12].mxu1 }
 0x380   :  { %v3859_v34 = vpop.f32.mrb[13].mxu1  ;;  %v477_v37 = vadd.f32 %v3517_v32, %v476_v33  ;;  %v1008_v33 = vmul.bf16 %v5186_v27, %v573_v18 }
 0x381   :  { %v479_v36 = vpop.f32.mrb[14].mxu1 }
 0x382   :  { %v480_v38 = vadd.f32 %v3517_v32, %v479_v36  ;;  %v3860_v39 = vpop.f32.mrb[15].mxu1 }
 0x384   :  { %v574_v40 = vpack.c.bf16 %v480_v38, %v477_v37 }
 0x386   :  { %v5112_v41 = vsel %vm255_vm2, %v574_v40, 0 }
 0x387   :  { %v484_v42 = vpop.f32.mrb[16].mxu1  ;;  %3886 = vmatpush3.bf16.xpose.msra.mxu1 %v5112_v41  ;;  %3904 = vmatpush3.bf16.xpose.msra.mxu0 %v5112_v41 }
 0x388   :  { %v3863_v43 = vpop.f32.mrb[17].mxu1  ;;  %3887 = vmatprep.subr.bf16.mxu1 %v4853_v0  ;;  %3905 = vmatprep.subr.bf16.mxu0 %v4853_v0  ;;  %v485_v45 = vadd.f32 %v3517_v32, %v484_v42 }
 0x389   :  { %v487_v44 = vpop.f32.mrb[18].mxu1 }
 0x38a   :  { %v488_v46 = vadd.f32 %v3517_v32, %v487_v44  ;;  %v3864_v47 = vpop.f32.mrb[19].mxu1 }
 0x38c   :  { %v575_v49 = vpack.c.bf16 %v488_v46, %v485_v45 }
 0x38e   :  { %v5119_v51 = vsel %vm255_vm2, %v575_v49, 0 }
 0x38f   :  { %v492_v52 = vpop.f32.mrb[20].mxu1  ;;  %3888 = vmatpush3.bf16.xpose.msra.mxu1 %v5119_v51  ;;  %3906 = vmatpush3.bf16.xpose.msra.mxu0 %v5119_v51 }
 0x390   :  { %v493_v57 = vadd.f32 %v3517_v32, %v492_v52  ;;  %v3867_v58 = vpop.f32.mrb[21].mxu1  ;;  %3889 = vmatprep.subr.bf16.mxu1 %v4853_v0  ;;  %3907 = vmatprep.subr.bf16.mxu0 %v4853_v0  ;;  %v1209_v32 = vpack.i.b16 %v1208_v31, %v1208_v31 }
 0x391   :  { %v495_v59 = vpop.f32.mrb[22].mxu1 }
 0x392   :  { %v576_v60 = vpack.c.bf16 %v493_v57, %v493_v57  ;;  %v3868_v61 = vpop.f32.mrb[23].mxu1  ;;  %v5210_v34 = vrot.slane %v1209_v32, %v1004_v23 }
 0x394   :  { %v5129_v2 = vsel %vm255_vm2, %v576_v60, 0  ;;  %v1215_v36 = vmul.bf16 %v5210_v34, %v5097_v4  ;;  %v1216_v37 = vmul.bf16 %v5210_v34, %v5105_v20  ;;  %v1217_v38 = vmul.bf16 %v5210_v34, %v573_v18  ;;  %v5227_v4 = vld [vmem:[#allocation7] sm:$0xff] }
 0x397   :  { %3890 = vmatpush3.bf16.xpose.msra.mxu1 %v5129_v2  ;;  %3908 = vmatpush3.bf16.xpose.msra.mxu0 %v5129_v2 }
 0x398   :  { %3921 = vmatprep.subr.bf16.mxu1 %v4853_v0  ;;  %3957 = vmatprep.subr.bf16.mxu0 %v4853_v0 }
 0x39e   :  { %3892 = vmatmul.mubr.msk.bf16.vlgmr.msra.gmra.mrb[24].mxu1 %vm255_vm2, %v587_v8  ;;  %3910 = vmatmul.mubr.msk.bf16.vlgmr.msra.gmra.mrb[24].mxu0 %vm255_vm2, %v733_v9  ;;  %v5258_v9 = vld [vmem:[#allocation7 + $0x20] sm:$0xff] }
 0x39f   :  { %3922 = vmatpush3.bf16.msra.mxu1 %v859_v10  ;;  %3958 = vmatpush3.bf16.xpose.msra.mxu0 %v5112_v41 }
 0x3a0   :  { %3923 = vmatprep.subr.bf16.mxu1 %v4853_v0  ;;  %3895 = vmatprep.mubr.msk.bf16.mxu1 %vm4854_vm0, %v4853_v0 }
 0x3a1   :  { %3913 = vmatprep.mubr.msk.bf16.mxu0 %vm4854_vm0, %v4853_v0  ;;  %3959 = vmatprep.subr.bf16.mxu0 %v4853_v0 }
 0x3a3   :  { %3924 = vmatpush3.bf16.msra.mxu1 %v860_v55 }
 0x3a4   :  { %3925 = vmatprep.subr.bf16.mxu1 %v4853_v0 }
 0x3a6   :  { %3896 = vmatmul.mubr.msk.bf16.gmra.mrb[28].mxu1 %vm255_vm2, %v588_v14  ;;  %3914 = vmatmul.mubr.msk.bf16.gmra.mrb[28].mxu0 %vm255_vm2, %v734_v15 }
 0x3a7   :  { %3926 = vmatpush3.bf16.msra.mxu1 %v873_v17  ;;  %3960 = vmatpush3.bf16.xpose.msra.mxu0 %v5119_v51 }
 0x3a8   :  { %3899 = vmatprep.mubr.msk.bf16.mxu1 %vm4854_vm0, %v4853_v0  ;;  %3917 = vmatprep.mubr.msk.bf16.mxu0 %vm4854_vm0, %v4853_v0 }
 0x3a9   :  { %3961 = vmatprep.subr.bf16.mxu0 %v4853_v0  ;;  %3939 = vmatprep.subr.bf16.mxu1 %v4853_v0 }
 0x3ae   :  { %3900 = vmatmul.mubr.msk.bf16.gmra.mrb[32].mxu1 %vm255_vm2, %v589_v24  ;;  %3918 = vmatmul.mubr.msk.bf16.gmra.mrb[32].mxu0 %vm255_vm2, %v735_v25 }
 0x3af   :  { %3962 = vmatpush3.bf16.xpose.msra.mxu0 %v5129_v2  ;;  %3963 = vmatprep.mubr.msk.bf16.mxu0 %vm4854_vm0, %v4853_v0 }
 0x3b0   :  { %3993 = vmatprep.subr.bf16.mxu0 %v4853_v0  ;;  %3927 = vmatprep.mubr.msk.bf16.mxu1 %vm4854_vm0, %v4853_v0 }
 0x3b6   :  { %3964 = vmatmul.mubr.msk.bf16.vlgmr.msra.gmra.mrb[36].mxu0 %vm255_vm2, %v1006_v28 }
 0x3b7   :  { %3994 = vmatpush3.bf16.xpose.msra.mxu0 %v5112_v41  ;;  %3967 = vmatprep.mubr.msk.bf16.mxu0 %vm4854_vm0, %v4853_v0  ;;  %v5229_v41 = vld [vmem:[#allocation7 + $0x8] sm:$0xff] }
 0x3b8   :  { %3995 = vmatprep.subr.bf16.mxu0 %v4853_v0 }
 0x3be   :  { %3968 = vmatmul.mubr.msk.bf16.gmra.mrb[40].mxu0 %vm255_vm2, %v1007_v30 }
 0x3bf   :  { %3996 = vmatpush3.bf16.xpose.msra.mxu0 %v5119_v51  ;;  %3971 = vmatprep.mubr.msk.bf16.mxu0 %vm4854_vm0, %v4853_v0  ;;  %v5241_v51 = vld [vmem:[#allocation7 + $0x10] sm:$0xff] }
 0x3c0   :  { %3997 = vmatprep.subr.bf16.mxu0 %v4853_v0 }
 0x3c6   :  { %3972 = vmatmul.mubr.msk.bf16.gmra.mrb[44].mxu0 %vm255_vm2, %v1008_v33 }
 0x3c7   :  { %3998 = vmatpush3.bf16.xpose.msra.mxu0 %v5129_v2  ;;  %3999 = vmatprep.mubr.msk.bf16.mxu0 %vm4854_vm0, %v4853_v0 }
 0x3c8   :  { %4029 = vmatprep.subr.bf16.mxu0 %v4853_v0 }
 0x3ce   :  { %4000 = vmatmul.mubr.msk.bf16.vlgmr.msra.gmra.mrb[48].mxu0 %vm255_vm2, %v1215_v36 }
 0x3cf   :  { %4003 = vmatprep.mubr.msk.bf16.mxu0 %vm4854_vm0, %v4853_v0 }
 0x3d6   :  { %4004 = vmatmul.mubr.msk.bf16.gmra.mrb[52].mxu0 %vm255_vm2, %v1216_v37 }
 0x3d7   :  { %4007 = vmatprep.mubr.msk.bf16.mxu0 %vm4854_vm0, %v4853_v0 }
 0x3de   :  { %4008 = vmatmul.mubr.msk.bf16.gmra.mrb[56].mxu0 %vm255_vm2, %v1217_v38 }
 0x3df   :  { %4033 = vmatprep.mubr.msk.bf16.mxu0 %vm4854_vm0, %v4853_v0 }
 0x471   :  { %v642_v39 = vpop.f32.mrb[24].mxu1  ;;  %v779_v40 = vpop.f32.mrb[24].mxu0 }
 0x472   :  { %v5232_v20 = vadd.f32 %v779_v40, %v5227_v4  ;;  %v3893_v42 = vpop.f32.mrb[25].mxu1  ;;  %v3911_v43 = vpop.f32.mrb[25].mxu0  ;;  %v5254_v7 = vadd.f32 %v642_v39, %v5227_v4 }
 0x473   :  { %v645_v44 = vpop.f32.mrb[26].mxu1  ;;  %v782_v45 = vpop.f32.mrb[26].mxu0 }
 0x474   :  { %v5235_v46 = vadd.f32 %v782_v45, %v5229_v41  ;;  %v3894_v47 = vpop.f32.mrb[27].mxu1  ;;  %v3912_v48 = vpop.f32.mrb[27].mxu0  ;;  %v801_v49 = vsel %vm664_vm4, %v5232_v20, -inf  ;;  %v665_v17 = vsel %vm664_vm4, %v5254_v7, -inf  ;;  %v5269_v22 = vadd.f32 %v645_v44, %v5229_v41 }
 0x475   :  { %802 = vmax.xlane.f32.xlu0 %v801_v49 }
 0x476   :  { %v804_v50 = vsel %vm664_vm4, %v5235_v46, -inf  ;;  %v668_v32 = vsel %vm664_vm4, %v5269_v22, -inf }
 0x477   :  { %805 = vmax.xlane.f32.xlu1 %v804_v50 }
 0x479   :  { %v650_v52 = vpop.f32.mrb[28].mxu1  ;;  %v787_v54 = vpop.f32.mrb[28].mxu0 }
 0x47a   :  { %v5246_v57 = vadd.f32 %v787_v54, %v5241_v51  ;;  %v3897_v58 = vpop.f32.mrb[29].mxu1  ;;  %v3915_v59 = vpop.f32.mrb[29].mxu0  ;;  %v5261_v12 = vadd.f32 %v650_v52, %v5241_v51 }
 0x47b   :  { %v653_v60 = vpop.f32.mrb[30].mxu1  ;;  %v790_v61 = vpop.f32.mrb[30].mxu0 }
 0x47c   :  { %v5249_v62 = vadd.f32 %v790_v61, %v5243_v56  ;;  %v3898_v63 = vpop.f32.mrb[31].mxu1  ;;  %v3916_v1 = vpop.f32.mrb[31].mxu0  ;;  %v807_v2 = vsel %vm664_vm4, %v5246_v57, -inf  ;;  %v671_v30 = vsel %vm664_vm4, %v5261_v12, -inf  ;;  %v5279_v31 = vadd.f32 %v653_v60, %v5243_v56 }
 0x47d   :  { %808 = vmax.xlane.f32.xlu0 %v807_v2 }
 0x47e   :  { %v810_v8 = vsel %vm664_vm4, %v5249_v62, -inf  ;;  %v674_v43 = vsel %vm664_vm4, %v5279_v31, -inf }
 0x47f   :  { %811 = vmax.xlane.f32.xlu1 %v810_v8 }
 0x481   :  { %v658_v10 = vpop.f32.mrb[32].mxu1  ;;  %v795_v55 = vpop.f32.mrb[32].mxu0 }
 0x482   :  { %v5264_v13 = vadd.f32 %v795_v55, %v5258_v9  ;;  %v3901_v14 = vpop.f32.mrb[33].mxu1  ;;  %v3919_v15 = vpop.f32.mrb[33].mxu0  ;;  %v5274_v28 = vadd.f32 %v658_v10, %v5258_v9 }
 0x483   :  { %v661_v18 = vpop.f32.mrb[34].mxu1  ;;  %v798_v53 = vpop.f32.mrb[34].mxu0  ;;  %666 = vmax.xlane.f32.xlu1 %v665_v17 }
 0x484   :  { %v3902_v23 = vpop.f32.mrb[35].mxu1  ;;  %v3920_v24 = vpop.f32.mrb[35].mxu0  ;;  %v813_v25 = vsel %vm664_vm4, %v5264_v13, -inf  ;;  %v677_v37 = vsel %vm664_vm4, %v5274_v28, -inf }
 0x485   :  { %814 = vmax.xlane.f32.xlu0 %v813_v25 }
 0x487   :  { %672 = vmax.xlane.f32.xlu1 %v671_v30 }
 0x489   :  { %v1052_v33 = vpop.f32.mrb[36].mxu0  ;;  %669 = vmax.xlane.f32.xlu0 %v668_v32 }
 0x48a   :  { %v3965_v36 = vpop.f32.mrb[37].mxu0  ;;  %v5286_v39 = vadd.f32 %v1052_v33, %v5227_v4 }
 0x48b   :  { %v1055_v38 = vpop.f32.mrb[38].mxu0  ;;  %678 = vmax.xlane.f32.xlu1 %v677_v37 }
 0x48c   :  { %v5289_v40 = vadd.f32 %v1055_v38, %v5229_v41  ;;  %v3966_v42 = vpop.f32.mrb[39].mxu0  ;;  %v1074_v45 = vsel %vm664_vm4, %v5286_v39, -inf }
 0x48d   :  { %675 = vmax.xlane.f32.xlu0 %v674_v43 }
 0x48e   :  { %v1077_v44 = vsel %vm664_vm4, %v5289_v40, -inf }
 0x48f   :  { %1078 = vmax.xlane.f32.xlu1 %v1077_v44 }
 0x491   :  { %v1060_v47 = vpop.f32.mrb[40].mxu0  ;;  %1075 = vmax.xlane.f32.xlu0 %v1074_v45 }
 0x492   :  { %v5298_v48 = vadd.f32 %v1060_v47, %v5241_v51  ;;  %v3969_v49 = vpop.f32.mrb[41].mxu0 }
 0x493   :  { %v1063_v50 = vpop.f32.mrb[42].mxu0 }
 0x494   :  { %v5301_v52 = vadd.f32 %v1063_v50, %v5243_v56  ;;  %v3970_v54 = vpop.f32.mrb[43].mxu0  ;;  %v1080_v58 = vsel %vm664_vm4, %v5298_v48, -inf }
 0x495   :  { %1081 = vmax.xlane.f32.xlu0 %v1080_v58 }
 0x496   :  { %v1083_v59 = vsel %vm664_vm4, %v5301_v52, -inf }
 0x497   :  { %1084 = vmax.xlane.f32.xlu1 %v1083_v59 }
 0x499   :  { %v1068_v60 = vpop.f32.mrb[44].mxu0 }
 0x49a   :  { %v5308_v61 = vadd.f32 %v1068_v60, %v5258_v9  ;;  %v3973_v63 = vpop.f32.mrb[45].mxu0 }
 0x49b   :  { %v1071_v1 = vpop.f32.mrb[46].mxu0 }
 0x49c   :  { %v3974_v2 = vpop.f32.mrb[47].mxu0  ;;  %v1086_v8 = vsel %vm664_vm4, %v5308_v61, -inf }
 0x49d   :  { %1087 = vmax.xlane.f32.xlu0 %v1086_v8 }
 0x4a1   :  { %v1261_v10 = vpop.f32.mrb[48].mxu0 }
 0x4a2   :  { %v5313_v55 = vadd.f32 %v1261_v10, %v5227_v4  ;;  %v4001_v14 = vpop.f32.mrb[49].mxu0 }
 0x4a3   :  { %v1264_v15 = vpop.f32.mrb[50].mxu0 }
 0x4a4   :  { %v5316_v17 = vadd.f32 %v1264_v15, %v5229_v41  ;;  %v4002_v18 = vpop.f32.mrb[51].mxu0  ;;  %v1283_v53 = vsel %vm664_vm4, %v5313_v55, -inf }
 0x4a5   :  { %1284 = vmax.xlane.f32.xlu1 %v1283_v53 }
 0x4a6   :  { %v1286_v23 = vsel %vm664_vm4, %v5316_v17, -inf }
 0x4a7   :  { %1287 = vmax.xlane.f32.xlu0 %v1286_v23 }
 0x4a9   :  { %v1269_v24 = vpop.f32.mrb[52].mxu0 }
 0x4aa   :  { %v5323_v25 = vadd.f32 %v1269_v24, %v5241_v51  ;;  %v4005_v4 = vpop.f32.mrb[53].mxu0 }
 0x4ab   :  { %v1272_v30 = vpop.f32.mrb[54].mxu0 }
 0x4ac   :  { %v5326_v32 = vadd.f32 %v1272_v30, %v5243_v56  ;;  %v4006_v41 = vpop.f32.mrb[55].mxu0  ;;  %v1289_v33 = vsel %vm664_vm4, %v5323_v25, -inf }
 0x4ad   :  { %1290 = vmax.xlane.f32.xlu1 %v1289_v33 }
 0x4ae   :  { %v1292_v36 = vsel %vm664_vm4, %v5326_v32, -inf }
 0x4af   :  { %1293 = vmax.xlane.f32.xlu0 %v1292_v36 }
 0x4b1   :  { %v1277_v37 = vpop.f32.mrb[56].mxu0 }
 0x4b2   :  { %v4009_v38 = vpop.f32.mrb[57].mxu0  ;;  %v5352_v33 = vadd.f32 %v1277_v37, %v5258_v9 }
 0x4b3   :  { %v1280_v42 = vpop.f32.mrb[58].mxu0 }
 0x4b4   :  { %v4010_v43 = vpop.f32.mrb[59].mxu0 }
 0x502   :  { %v803_v51 = vpop.xlane.xlu0 %802 }
 0x503   :  { %v816_v44 = vsub.f32 %v5232_v20, %v803_v51 }
 0x504   :  { %v806_v45 = vpop.xlane.xlu1 %805 }
 0x505   :  { %v821_v47 = vmul.f32 1.442695, %v816_v44  ;;  %v817_v56 = vsub.f32 %v5235_v46, %v806_v45  ;;  %v1295_v44 = vsel %vm664_vm4, %v5352_v33, -inf }
 0x507   :  { %4462 = vpow2.f32 %v821_v47  ;;  %v823_v49 = vmul.f32 1.442695, %v817_v56 }
 0x509   :  { %4464 = vpow2.f32 %v823_v49 }
 0x50a   :  { %v809_v50 = vpop.xlane.xlu0 %808 }
 0x50b   :  { %v818_v54 = vsub.f32 %v5246_v57, %v809_v50 }
 0x50c   :  { %v812_v58 = vpop.xlane.xlu1 %811 }
 0x50d   :  { %v825_v59 = vmul.f32 1.442695, %v818_v54  ;;  %v819_v60 = vsub.f32 %v5249_v62, %v812_v58 }
 0x50f   :  { %4466 = vpow2.f32 %v825_v59  ;;  %v827_v63 = vmul.f32 1.442695, %v819_v60 }
 0x510   :  { %v667_v1 = vpop.xlane.xlu1 %666 }
 0x511   :  { %v5336_v2 = vpop.eup %4462  ;;  %4468 = vpow2.f32 %v827_v63  ;;  %v680_v20 = vsub.f32 %v5254_v7, %v667_v1 }
 0x512   :  { %v815_v8 = vpop.xlane.xlu0 %814  ;;  %v831_v46 = vsel %vm664_vm4, %v5336_v2, 0.0 }
 0x513   :  { %v5341_v10 = vpop.eup %4464  ;;  %v685_v14 = vmul.f32 1.442695, %v680_v20  ;;  %v820_v57 = vsub.f32 %v5264_v13, %v815_v8  ;;  %832 = vadd.xlane.f32.xlu1 %v831_v46 }
 0x514   :  { %v673_v15 = vpop.xlane.xlu1 %672  ;;  %v834_v62 = vsel %vm664_vm4, %v5341_v10, 0.0 }
 0x515   :  { %4470 = vpow2.f32 %v685_v14  ;;  %v829_v18 = vmul.f32 1.442695, %v820_v57  ;;  %v682_v53 = vsub.f32 %v5261_v12, %v673_v15  ;;  %835 = vadd.xlane.f32.xlu0 %v834_v62 }
 0x516   :  { %v670_v7 = vpop.xlane.xlu0 %669 }
 0x517   :  { %4472 = vpow2.f32 %v829_v18  ;;  %v689_v23 = vmul.f32 1.442695, %v682_v53  ;;  %v681_v24 = vsub.f32 %v5269_v22, %v670_v7 }
 0x518   :  { %v679_v4 = vpop.xlane.xlu1 %678 }
 0x519   :  { %v5348_v30 = vpop.eup %4466  ;;  %4474 = vpow2.f32 %v689_v23  ;;  %v687_v13 = vmul.f32 1.442695, %v681_v24  ;;  %v684_v41 = vsub.f32 %v5274_v28, %v679_v4 }
 0x51a   :  { %v676_v36 = vpop.xlane.xlu0 %675  ;;  %v837_v12 = vsel %vm664_vm4, %v5348_v30, 0.0 }
 0x51b   :  { %v5356_v38 = vpop.eup %4468  ;;  %4476 = vpow2.f32 %v687_v13  ;;  %v693_v42 = vmul.f32 1.442695, %v684_v41  ;;  %v683_v22 = vsub.f32 %v5279_v31, %v676_v36  ;;  %838 = vadd.xlane.f32.xlu1 %v837_v12 }
 0x51c   :  { %v1079_v43 = vpop.xlane.xlu1 %1078  ;;  %v840_v51 = vsel %vm664_vm4, %v5356_v38, 0.0 }
 0x51d   :  { %4478 = vpow2.f32 %v693_v42  ;;  %v691_v28 = vmul.f32 1.442695, %v683_v22  ;;  %v1090_v9 = vsub.f32 %v5289_v40, %v1079_v43  ;;  %841 = vadd.xlane.f32.xlu0 %v840_v51 }
 0x51e   :  { %v1076_v37 = vpop.xlane.xlu0 %1075 }
 0x51f   :  { %v5364_v45 = vpop.eup %4470  ;;  %4480 = vpow2.f32 %v691_v28  ;;  %v1096_v47 = vmul.f32 1.442695, %v1090_v9  ;;  %v1089_v31 = vsub.f32 %v5286_v39, %v1076_v37  ;;  %1296 = vmax.xlane.f32.xlu1 %v1295_v44 }
 0x520   :  { %v695_v54 = vsel %vm664_vm4, %v5364_v45, 0.0 }
 0x521   :  { %v5367_v56 = vpop.eup %4472  ;;  %4482 = vpow2.f32 %v1096_v47  ;;  %v1094_v49 = vmul.f32 1.442695, %v1089_v31 }
 0x522   :  { %v1082_v50 = vpop.xlane.xlu0 %1081  ;;  %v843_v40 = vsel %vm664_vm4, %v5367_v56, 0.0 }
 0x523   :  { %v5373_v58 = vpop.eup %4474  ;;  %4484 = vpow2.f32 %v1094_v49  ;;  %v1091_v59 = vsub.f32 %v5298_v48, %v1082_v50  ;;  %844 = vadd.xlane.f32.xlu0 %v843_v40  ;;  %696 = vadd.xlane.f32.xlu1 %v695_v54 }
 0x524   :  { %v1085_v39 = vpop.xlane.xlu1 %1084  ;;  %v701_v8 = vsel %vm664_vm4, %v5373_v58, 0.0 }
 0x525   :  { %v5376_v60 = vpop.eup %4476  ;;  %v1098_v63 = vmul.f32 1.442695, %v1091_v59  ;;  %v1092_v1 = vsub.f32 %v5301_v52, %v1085_v39 }
 0x526   :  { %v698_v20 = vsel %vm664_vm4, %v5376_v60, 0.0 }
 0x527   :  { %v5383_v46 = vpop.eup %4478  ;;  %4486 = vpow2.f32 %v1098_v63  ;;  %v1100_v14 = vmul.f32 1.442695, %v1092_v1  ;;  %699 = vadd.xlane.f32.xlu0 %v698_v20  ;;  %702 = vadd.xlane.f32.xlu1 %v701_v8 }
 0x528   :  { %v707_v52 = vsel %vm664_vm4, %v5383_v46, 0.0 }
 0x529   :  { %v5385_v48 = vpop.eup %4480  ;;  %4488 = vpow2.f32 %v1100_v14 }
 0x52a   :  { %v1088_v57 = vpop.xlane.xlu0 %1087  ;;  %v704_v15 = vsel %vm664_vm4, %v5385_v48, 0.0 }
 0x52b   :  { %v5391_v62 = vpop.eup %4482  ;;  %v1093_v18 = vsub.f32 %v5308_v61, %v1088_v57  ;;  %705 = vadd.xlane.f32.xlu0 %v704_v15  ;;  %708 = vadd.xlane.f32.xlu1 %v707_v52 }
 0x52c   :  { %v1107_v24 = vsel %vm664_vm4, %v5391_v62, 0.0 }
 0x52d   :  { %v5394_v53 = vpop.eup %4484  ;;  %v1102_v7 = vmul.f32 1.442695, %v1093_v18 }
 0x52e   :  { %v1104_v23 = vsel %vm664_vm4, %v5394_v53, 0.0 }
 0x52f   :  { %4490 = vpow2.f32 %v1102_v7  ;;  %1105 = vadd.xlane.f32.xlu0 %v1104_v23  ;;  %1108 = vadd.xlane.f32.xlu1 %v1107_v24 }
 0x531   :  { %v5400_v4 = vpop.eup %4486 }
 0x532   :  { %v1285_v13 = vpop.xlane.xlu1 %1284  ;;  %v1110_v61 = vsel %vm664_vm4, %v5400_v4, 0.0 }
 0x533   :  { %v5404_v41 = vpop.eup %4488  ;;  %v1298_v36 = vsub.f32 %v5313_v55, %v1285_v13  ;;  %1111 = vadd.xlane.f32.xlu0 %v1110_v61  ;;  %v723_v61 = vmul.bf16 %v5133_v3, %v5099_v5 }
 0x534   :  { %v1288_v12 = vpop.xlane.xlu0 %1287  ;;  %v1113_v42 = vsel %vm664_vm4, %v5404_v41, 0.0 }
 0x535   :  { %v1303_v22 = vmul.f32 1.442695, %v1298_v36  ;;  %v1299_v43 = vsub.f32 %v5316_v17, %v1288_v12  ;;  %1114 = vadd.xlane.f32.xlu1 %v1113_v42 }
 0x537   :  { %4492 = vpow2.f32 %v1303_v22  ;;  %v1305_v51 = vmul.f32 1.442695, %v1299_v43  ;;  %v725_v43 = vmul.bf16 %v5133_v3, %v5146_v11 }
 0x539   :  { %v5410_v28 = vpop.eup %4490  ;;  %4494 = vpow2.f32 %v1305_v51 }
 0x53a   :  { %v1291_v9 = vpop.xlane.xlu1 %1290  ;;  %v1116_v37 = vsel %vm664_vm4, %v5410_v28, 0.0 }
 0x53b   :  { %v1300_v55 = vsub.f32 %v5323_v25, %v1291_v9  ;;  %1117 = vadd.xlane.f32.xlu0 %v1116_v37  ;;  %v941_v9 = vsel %vm871_vm3, %v725_v43, 0  ;;  %v1342_v43 = vmul.bf16 %v5210_v34, %v5107_v21 }
 0x53c   :  { %v1294_v44 = vpop.xlane.xlu0 %1293 }
 0x53d   :  { %v1307_v47 = vmul.f32 1.442695, %v1300_v55  ;;  %v1301_v31 = vsub.f32 %v5326_v32, %v1294_v44 }
 0x53f   :  { %4496 = vpow2.f32 %v1307_v47  ;;  %v1309_v49 = vmul.f32 1.442695, %v1301_v31 }
 0x541   :  { %v5416_v17 = vpop.eup %4492  ;;  %4498 = vpow2.f32 %v1309_v49 }
 0x542   :  { %v1313_v50 = vsel %vm664_vm4, %v5416_v17, 0.0 }
 0x543   :  { %v5420_v40 = vpop.eup %4494  ;;  %1314 = vadd.xlane.f32.xlu1 %v1313_v50 }
 0x544   :  { %v1316_v54 = vsel %vm664_vm4, %v5420_v40, 0.0 }
 0x545   :  { %1317 = vadd.xlane.f32.xlu0 %v1316_v54 }
 0x549   :  { %v5424_v25 = vpop.eup %4496 }
 0x54a   :  { %v1319_v32 = vsel %vm664_vm4, %v5424_v25, 0.0 }
 0x54b   :  { %v5428_v59 = vpop.eup %4498  ;;  %1320 = vadd.xlane.f32.xlu1 %v1319_v32 }
 0x54c   :  { %v1322_v39 = vsel %vm664_vm4, %v5428_v59, 0.0 }
 0x54d   :  { %1323 = vadd.xlane.f32.xlu0 %v1322_v39 }
 0x5a0   :  { %v833_v63 = vpop.xlane.xlu1 %832 }
 0x5a1   :  { %4500 = vrcp.f32 %v833_v63 }
 0x5a2   :  { %v836_v1 = vpop.xlane.xlu0 %835 }
 0x5a3   :  { %4502 = vrcp.f32 %v836_v1 }
 0x5a8   :  { %v839_v20 = vpop.xlane.xlu1 %838 }
 0x5a9   :  { %4504 = vrcp.f32 %v839_v20 }
 0x5aa   :  { %v842_v8 = vpop.xlane.xlu0 %841 }
 0x5ab   :  { %v4501_v14 = vpop.eup %4500  ;;  %4506 = vrcp.f32 %v842_v8 }
 0x5ac   :  { %v1297_v57 = vpop.xlane.xlu1 %1296  ;;  %v851_v18 = vmul.f32 %v4501_v14, %v5336_v2 }
 0x5ad   :  { %v4503_v15 = vpop.eup %4502  ;;  %v1302_v52 = vsub.f32 %v5352_v33, %v1297_v57 }
 0x5ae   :  { %v852_v7 = vmul.f32 %v4503_v15, %v5341_v10  ;;  %v724_v10 = vmul.bf16 %v5133_v3, %v5107_v21  ;;  %v1134_v15 = vmul.bf16 %v5186_v27, %v5146_v11 }
 0x5af   :  { %v1311_v23 = vmul.f32 1.442695, %v1302_v52 }
 0x5b0   :  { %v856_v24 = vpack.c.bf16 %v852_v7, %v851_v18  ;;  %v845_v13 = vpop.xlane.xlu0 %844  ;;  %v697_v12 = vpop.xlane.xlu1 %696  ;;  %v1145_v7 = vsel %vm871_vm3, %v1134_v15, 0 }
 0x5b1   :  { %4508 = vpow2.f32 %v1311_v23 }
 0x5b2   :  { %4510 = vrcp.f32 %v845_v13  ;;  %3928 = vmatmul.mubr.msk.bf16.vlgmr.msra.gmra.mrb[36].mxu1 %vm664_vm4, %v856_v24 }
 0x5b3   :  { %v4505_v36 = vpop.eup %4504  ;;  %3940 = vmatpush3.bf16.msra.mxu1 %v723_v61  ;;  %3931 = vmatprep.mubr.msk.bf16.mxu1 %vm4854_vm0, %v4853_v0 }
 0x5b4   :  { %v700_v33 = vpop.xlane.xlu0 %699  ;;  %3941 = vmatprep.subr.bf16.mxu1 %v4853_v0  ;;  %v853_v42 = vmul.f32 %v4505_v36, %v5348_v30  ;;  %v703_v47 = vpop.xlane.xlu1 %702  ;;  %v4428_v36 = vld [vmem:[#allocation8 + $0x30] sm:$0xff]  }
 0x5b5   :  { %v4507_v2 = vpop.eup %4506  ;;  %4512 = vrcp.f32 %v700_v33  ;;  %4030 = vmatpush3.bf16.msra.mxu0 %v4428_v36 }
 0x5b6   :  { %v854_v22 = vmul.f32 %v4507_v2, %v5356_v38  ;;  %4514 = vrcp.f32 %v697_v12  ;;  %4031 = vmatprep.subr.bf16.mxu0 %v4853_v0 }
 0x5b7   :  { %3942 = vmatpush3.bf16.msra.mxu1 %v724_v10 }
 0x5b8   :  { %3943 = vmatprep.subr.bf16.mxu1 %v4853_v0  ;;  %v857_v51 = vpack.c.bf16 %v854_v22, %v853_v42  ;;  %v706_v38 = vpop.xlane.xlu0 %705  ;;  %v709_v32 = vpop.xlane.xlu1 %708  ;;  %v1341_v42 = vmul.bf16 %v5210_v34, %v5099_v5 }
 0x5b9   :  { %4516 = vrcp.f32 %v706_v38 }
 0x5ba   :  { %3932 = vmatmul.mubr.msk.bf16.gmra.mrb[40].mxu1 %vm664_vm4, %v857_v51  ;;  %4518 = vrcp.f32 %v703_v47 }
 0x5bb   :  { %v5450_v37 = vpop.eup %4508  ;;  %3944 = vmatpush3.bf16.msra.mxu1 %v941_v9  ;;  %3935 = vmatprep.mubr.msk.bf16.mxu1 %vm4854_vm0, %v4853_v0  ;;  %4520 = vrcp.f32 %v709_v32 }
 0x5bc   :  { %v4511_v30 = vpop.eup %4510  ;;  %v1325_v55 = vsel %vm664_vm4, %v5450_v37, 0.0  ;;  %3975 = vmatprep.subr.bf16.mxu1 %v4853_v0  ;;  %v1106_v8 = vpop.xlane.xlu0 %1105 }
 0x5bd   :  { %1326 = vadd.xlane.f32.xlu1 %v1325_v55  ;;  %v855_v44 = vmul.f32 %v4511_v30, %v5367_v56  ;;  %v1132_v56 = vmul.bf16 %v5186_v27, %v5099_v5  ;;  %v1109_v14 = vpop.xlane.xlu1 %1108  ;;  %4522 = vrcp.f32 %v1106_v8  ;;  %v1343_v5 = vmul.bf16 %v5210_v34, %v5146_v11 }
 0x5be   :  { %4524 = vrcp.f32 %v1109_v14 }
 0x5bf   :  { %v858_v31 = vpack.c.bf16 %v855_v44, %v855_v44  ;;  %v4513_v49 = vpop.eup %4512 }
 0x5c0   :  { %v4515_v50 = vpop.eup %4514  ;;  %v716_v54 = vmul.f32 %v4513_v49, %v5376_v60  ;;  %v1112_v23 = vpop.xlane.xlu0 %1111 }
 0x5c1   :  { %v715_v39 = vmul.f32 %v4515_v50, %v5364_v45  ;;  %v1133_v45 = vmul.bf16 %v5186_v27, %v5107_v21 }
 0x5c2   :  { %3936 = vmatmul.mubr.msk.bf16.gmra.mrb[44].mxu1 %vm664_vm4, %v858_v31 }
 0x5c3   :  { %3945 = vmatprep.mubr.msk.bf16.mxu1 %vm4854_vm0, %v4853_v0  ;;  %v720_v63 = vpack.c.bf16 %v716_v54, %v715_v39  ;;  %v4517_v1 = vpop.eup %4516 }
 0x5c4   :  { %v4519_v20 = vpop.eup %4518  ;;  %v718_v60 = vmul.f32 %v4517_v1, %v5385_v48  ;;  %v1115_v48 = vpop.xlane.xlu1 %1114 }
 0x5c5   :  { %v717_v57 = vmul.f32 %v4519_v20, %v5373_v58  ;;  %v4521_v18 = vpop.eup %4520  ;;  %4526 = vrcp.f32 %v1115_v48 }
 0x5c6   :  { %v719_v58 = vmul.f32 %v4521_v18, %v5383_v46  ;;  %4528 = vrcp.f32 %v1112_v23 }
 0x5c7   :  { %v721_v52 = vpack.c.bf16 %v718_v60, %v717_v57  ;;  %v4523_v24 = vpop.eup %4522 }
 0x5c8   :  { %v722_v13 = vpack.c.bf16 %v719_v58, %v719_v58  ;;  %v4525_v61 = vpop.eup %4524  ;;  %v1124_v33 = vmul.f32 %v4523_v24, %v5394_v53  ;;  %v1118_v10 = vpop.xlane.xlu0 %1117 }
 0x5c9   :  { %v1125_v2 = vmul.f32 %v4525_v61, %v5391_v62  ;;  %4530 = vrcp.f32 %v1118_v10 }
 0x5ca   :  { %3946 = vmatmul.mubr.msk.bf16.vlgmr.msra.gmra.mrb[36].mxu1 %vm664_vm4, %v720_v63 }
 0x5cb   :  { %3976 = vmatpush3.bf16.msra.mxu1 %v1132_v56  ;;  %3949 = vmatprep.mubr.msk.bf16.mxu1 %vm4854_vm0, %v4853_v0  ;;  %v1129_v46 = vpack.c.bf16 %v1125_v2, %v1124_v33 }
 0x5cc   :  { %3977 = vmatprep.subr.bf16.mxu1 %v4853_v0 }
 0x5cf   :  { %3978 = vmatpush3.bf16.msra.mxu1 %v1133_v45  ;;  %v4527_v12 = vpop.eup %4526 }
 0x5d0   :  { %3979 = vmatprep.subr.bf16.mxu1 %v4853_v0  ;;  %v4529_v22 = vpop.eup %4528  ;;  %v1127_v62 = vmul.f32 %v4527_v12, %v5404_v41  ;;  %v1315_v51 = vpop.xlane.xlu1 %1314  ;;  %v1354_v41 = vsel %vm871_vm3, %v1343_v5, 0 }
 0x5d1   :  { %v1126_v9 = vmul.f32 %v4529_v22, %v5400_v4 }
 0x5d2   :  { %3950 = vmatmul.mubr.msk.bf16.gmra.mrb[40].mxu1 %vm664_vm4, %v721_v52  ;;  %v1318_v53 = vpop.xlane.xlu0 %1317 }
 0x5d3   :  { %3980 = vmatpush3.bf16.msra.mxu1 %v1145_v7  ;;  %3953 = vmatprep.mubr.msk.bf16.mxu1 %vm4854_vm0, %v4853_v0  ;;  %4532 = vrcp.f32 %v1318_v53  ;;  %v1130_v30 = vpack.c.bf16 %v1127_v62, %v1126_v9  ;;  %v4531_v38 = vpop.eup %4530 }
 0x5d4   :  { %4011 = vmatprep.subr.bf16.mxu1 %v4853_v0  ;;  %4534 = vrcp.f32 %v1315_v51  ;;  %v1128_v4 = vmul.f32 %v4531_v38, %v5410_v28 }
 0x5d6   :  { %v1131_v55 = vpack.c.bf16 %v1128_v4, %v1128_v4 }
 0x5d8   :  { %v1321_v11 = vpop.xlane.xlu1 %1320 }
 0x5da   :  { %3954 = vmatmul.mubr.msk.bf16.gmra.mrb[44].mxu1 %vm664_vm4, %v722_v13  ;;  %v1324_v21 = vpop.xlane.xlu0 %1323  ;;  %v3558_v13 = vld [vmem:[#allocation11 + $0x5] ss:$0 sm:$0xff] }
 0x5db   :  { %3981 = vmatprep.mubr.msk.bf16.mxu1 %vm4854_vm0, %v4853_v0  ;;  %4536 = vrcp.f32 %v1324_v21 }
 0x5dc   :  { %4538 = vrcp.f32 %v1321_v11 }
 0x5dd   :  { %v4533_v44 = vpop.eup %4532 }
 0x5de   :  { %v4535_v47 = vpop.eup %4534  ;;  %v1334_v31 = vmul.f32 %v4533_v44, %v5420_v40 }
 0x5df   :  { %v1333_v49 = vmul.f32 %v4535_v47, %v5416_v17  ;;  %v4429_v17 = vld [vmem:[#allocation8 + $0x38] sm:$0xff]  }
 0x5e0   :  { %4032 = vmatpush3.bf16.msra.mxu0 %v4429_v17 }
 0x5e1   :  { %v1338_v50 = vpack.c.bf16 %v1334_v31, %v1333_v49  ;;  %4045 = vmatprep.subr.bf16.mxu0 %v4853_v0 }
 0x5e2   :  { %3982 = vmatmul.mubr.msk.bf16.vlgmr.msra.gmra.mrb[36].mxu1 %vm664_vm4, %v1129_v46 }
 0x5e3   :  { %4012 = vmatpush3.bf16.msra.mxu1 %v1341_v42  ;;  %3985 = vmatprep.mubr.msk.bf16.mxu1 %vm4854_vm0, %v4853_v0 }
 0x5e4   :  { %4013 = vmatprep.subr.bf16.mxu1 %v4853_v0 }
 0x5e5   :  { %v4537_v54 = vpop.eup %4536 }
 0x5e6   :  { %v4539_v28 = vpop.eup %4538  ;;  %v1336_v32 = vmul.f32 %v4537_v54, %v5428_v59 }
 0x5e7   :  { %4014 = vmatpush3.bf16.msra.mxu1 %v1342_v43  ;;  %v1335_v39 = vmul.f32 %v4539_v28, %v5424_v25 }
 0x5e8   :  { %4015 = vmatprep.subr.bf16.mxu1 %v4853_v0 }
 0x5e9   :  { %v1339_v63 = vpack.c.bf16 %v1336_v32, %v1335_v39 }
 0x5ea   :  { %3986 = vmatmul.mubr.msk.bf16.gmra.mrb[40].mxu1 %vm664_vm4, %v1130_v30 }
 0x5eb   :  { %4016 = vmatpush3.bf16.msra.mxu1 %v1354_v41  ;;  %3989 = vmatprep.mubr.msk.bf16.mxu1 %vm4854_vm0, %v4853_v0 }
 0x5ec   :  { %4061 = vmatprep.subr.bf16.mxu1 %v4853_v0 }
 0x5f2   :  { %3990 = vmatmul.mubr.msk.bf16.gmra.mrb[44].mxu1 %vm664_vm4, %v1131_v55 }
 0x5f3   :  { %4017 = vmatprep.mubr.msk.bf16.mxu1 %vm4854_vm0, %v4853_v0 }
 0x5fa   :  { %4018 = vmatmul.mubr.msk.bf16.vlgmr.msra.gmra.mrb[36].mxu1 %vm664_vm4, %v1338_v50 }
 0x5fb   :  { %4021 = vmatprep.mubr.msk.bf16.mxu1 %vm4854_vm0, %v4853_v0 }
 0x602   :  { %4022 = vmatmul.mubr.msk.bf16.gmra.mrb[40].mxu1 %vm664_vm4, %v1339_v63 }
 0x603   :  { %4025 = vmatprep.mubr.msk.bf16.mxu1 %vm4854_vm0, %v4853_v0 }
 0x64a   :  { %v1327_v40 = vpop.xlane.xlu1 %1326 }
 0x64b   :  { %4540 = vrcp.f32 %v1327_v40 }
 0x655   :  { %v4541_v1 = vpop.eup %4540 }
 0x656   :  { %v1337_v56 = vmul.f32 %v4541_v1, %v5450_v37 }
 0x658   :  { %v1340_v20 = vpack.c.bf16 %v1337_v56, %v1337_v56 }
 0x65a   :  { %4026 = vmatmul.mubr.msk.bf16.gmra.mrb[44].mxu1 %vm664_vm4, %v1340_v20 }
 0x65b   :  { %4069 = vmatprep.mubr.msk.bf16.mxu1 %vm4854_vm0, %v4853_v0 }
 0x6cd   :  { %v1390_v25 = vpop.f32.mrb[36].mxu1 }
 0x6ce   :  { %v4019_v59 = vpop.f32.mrb[37].mxu1 }
 0x6cf   :  { %v1393_v8 = vpop.f32.mrb[38].mxu1 }
 0x6d0   :  { %v1417_v14 = vpack.c.bf16 %v1393_v8, %v1390_v25  ;;  %v4020_v60 = vpop.f32.mrb[39].mxu1 }
 0x6d1   :  { %v4430_v60 = vld [vmem:[#allocation8 + $0x40] sm:$0xff]  }
 0x6d2   :  { %4034 = vmatmul.mubr.msk.bf16.vlgmr.msra.gmra.mrb[60].mxu0 %vm255_vm2, %v1417_v14 }
 0x6d3   :  { %4037 = vmatprep.mubr.msk.bf16.mxu0 %vm4854_vm0, %v4853_v0  ;;  %4046 = vmatpush3.bf16.msra.mxu0 %v4430_v60 }
 0x6d4   :  { %4047 = vmatprep.subr.bf16.mxu0 %v4853_v0 }
 0x6d5   :  { %v1398_v45 = vpop.f32.mrb[40].mxu1 }
 0x6d6   :  { %v4023_v57 = vpop.f32.mrb[41].mxu1 }
 0x6d7   :  { %v1401_v15 = vpop.f32.mrb[42].mxu1 }
 0x6d8   :  { %v1418_v37 = vpack.c.bf16 %v1401_v15, %v1398_v45  ;;  %v4024_v52 = vpop.f32.mrb[43].mxu1  ;;  %v4431_v45 = vld [vmem:[#allocation8 + $0x48] sm:$0xff]  }
 0x6d9   :  { %4048 = vmatpush3.bf16.msra.mxu0 %v4431_v45 }
 0x6da   :  { %4038 = vmatmul.mubr.msk.bf16.gmra.mrb[64].mxu0 %vm255_vm2, %v1418_v37  ;;  %4081 = vmatprep.subr.bf16.mxu0 %v4853_v0 }
 0x6db   :  { %4041 = vmatprep.mubr.msk.bf16.mxu0 %vm4854_vm0, %v4853_v0 }
 0x72d   :  { %v1406_v18 = vpop.f32.mrb[44].mxu1 }
 0x72e   :  { %v1419_v7 = vpack.c.bf16 %v1406_v18, %v1406_v18  ;;  %v4027_v48 = vpop.f32.mrb[45].mxu1 }
 0x72f   :  { %v1409_v58 = vpop.f32.mrb[46].mxu1 }
 0x730   :  { %v4028_v23 = vpop.f32.mrb[47].mxu1  ;;  %4042 = vmatmul.mubr.msk.bf16.gmra.mrb[68].mxu0 %vm255_vm2, %v1419_v7 }
 0x731   :  { %4049 = vmatprep.mubr.msk.bf16.mxu0 %vm4854_vm0, %v4853_v0 }
 0x7a5   :  { %v1475_v24 = vpop.f32.mrb[60].mxu0 }
 0x7a6   :  { %v1497_v61 = vadd.f32 %v1475_v24, %v5021_v16  ;;  %v4035_v36 = vpop.f32.mrb[61].mxu0 }
 0x7a7   :  { %v1478_v33 = vpop.f32.mrb[62].mxu0 }
 0x7a8   :  { %v5535_v2 = vadd.f32 %v3558_v13, %v1497_v61  ;;  %v1498_v10 = vadd.f32 %v1478_v33, %v5023_v19  ;;  %v4036_v46 = vpop.f32.mrb[63].mxu0 }
 0x7aa   :  { %v5538_v12 = vadd.f32 %v3558_v13, %v1498_v10  ;;  %v1514_v42 = vsel %vm255_vm2, %v5535_v2, 0.0 }
 0x7ab   :  { %1515 = vadd.xlane.f32.xlu0 %v1514_v42 }
 0x7ac   :  { %v1517_v22 = vsel %vm255_vm2, %v5538_v12, 0.0 }
 0x7ad   :  { %1518 = vadd.xlane.f32.xlu1 %v1517_v22  ;;  %v1483_v53 = vpop.f32.mrb[64].mxu0 }
 0x7ae   :  { %v1499_v16 = vadd.f32 %v1483_v53, %v5029_v26  ;;  %v4039_v62 = vpop.f32.mrb[65].mxu0  ;;  %v3559_v53 = vld [vmem:[#allocation11 + $0x6] ss:$0 sm:$0xff] }
 0x7af   :  { %v1486_v43 = vpop.f32.mrb[66].mxu0 }
 0x7b0   :  { %v5545_v51 = vadd.f32 %v3558_v13, %v1499_v16  ;;  %v1500_v19 = vadd.f32 %v1486_v43, %v5031_v29  ;;  %v4040_v9 = vpop.f32.mrb[67].mxu0 }
 0x7b1   :  { %v3560_v9 = vld [vmem:[#allocation11 + $0x7] ss:$0 sm:$0xff] }
 0x7b2   :  { %v5548_v5 = vadd.f32 %v3558_v13, %v1500_v19  ;;  %v1520_v30 = vsel %vm255_vm2, %v5545_v51, 0.0 }
 0x7b3   :  { %1521 = vadd.xlane.f32.xlu0 %v1520_v30 }
 0x7b4   :  { %v1523_v38 = vsel %vm255_vm2, %v5548_v5, 0.0 }
 0x7b5   :  { %1524 = vadd.xlane.f32.xlu1 %v1523_v38 }
 0x803   :  { %v1491_v41 = vpop.f32.mrb[68].mxu0 }
 0x804   :  { %v1501_v26 = vadd.f32 %v1491_v41, %v5037_v35  ;;  %v4043_v21 = vpop.f32.mrb[69].mxu0 }
 0x805   :  { %v1494_v4 = vpop.f32.mrb[70].mxu0 }
 0x806   :  { %v5555_v11 = vadd.f32 %v3558_v13, %v1501_v26  ;;  %v4044_v55 = vpop.f32.mrb[71].mxu0 }
 0x808   :  { %v1526_v29 = vsel %vm255_vm2, %v5555_v11, 0.0 }
 0x809   :  { %1527 = vadd.xlane.f32.xlu0 %v1526_v29 }
 0x838   :  { %v1516_v44 = vpop.xlane.xlu0 %1515 }
 0x839   :  { %v1529_v47 = vmul.f32 0.03125, %v1516_v44 }
 0x83a   :  { %v1519_v31 = vpop.xlane.xlu1 %1518 }
 0x83b   :  { %v1534_v49 = vsub.f32 %v5535_v2, %v1529_v47  ;;  %v1530_v50 = vmul.f32 0.03125, %v1519_v31 }
 0x83d   :  { %v1535_v54 = vsub.f32 %v5538_v12, %v1530_v50  ;;  %v1539_v28 = vmul.f32 %v1534_v49, %v1534_v49 }
 0x83f   :  { %v1544_v35 = vsel %vm255_vm2, %v1539_v28, 0.0  ;;  %v1540_v32 = vmul.f32 %v1535_v54, %v1535_v54 }
 0x840   :  { %v1522_v39 = vpop.xlane.xlu0 %1521  ;;  %1545 = vadd.xlane.f32.xlu1 %v1544_v35 }
 0x841   :  { %v1531_v63 = vmul.f32 0.03125, %v1522_v39  ;;  %v1547_v40 = vsel %vm255_vm2, %v1540_v32, 0.0 }
 0x842   :  { %1548 = vadd.xlane.f32.xlu0 %v1547_v40  ;;  %v1525_v17 = vpop.xlane.xlu1 %1524 }
 0x843   :  { %v1536_v1 = vsub.f32 %v5545_v51, %v1531_v63  ;;  %v1532_v56 = vmul.f32 0.03125, %v1525_v17 }
 0x845   :  { %v1537_v20 = vsub.f32 %v5548_v5, %v1532_v56  ;;  %v1541_v25 = vmul.f32 %v1536_v1, %v1536_v1  ;;  %v4433_v56 = vld [vmem:[#allocation8 + $0x58] sm:$0xff]  }
 0x847   :  { %v1550_v59 = vsel %vm255_vm2, %v1541_v25, 0.0  ;;  %v1542_v8 = vmul.f32 %v1537_v20, %v1537_v20  ;;  %v4435_v25 = vld [vmem:[#allocation8 + $0x68] sm:$0xff]  }
 0x848   :  { %1551 = vadd.xlane.f32.xlu1 %v1550_v59  ;;  %v3561_v59 = vld [vmem:[#allocation11 + $0x8] ss:$0 sm:$0xff] }
 0x849   :  { %v1553_v14 = vsel %vm255_vm2, %v1542_v8, 0.0 }
 0x84a   :  { %1554 = vadd.xlane.f32.xlu0 %v1553_v14 }
 0x896   :  { %v1528_v57 = vpop.xlane.xlu0 %1527 }
 0x897   :  { %v1533_v15 = vmul.f32 0.03125, %v1528_v57 }
 0x899   :  { %v1538_v37 = vsub.f32 %v5555_v11, %v1533_v15 }
 0x89b   :  { %v1543_v52 = vmul.f32 %v1538_v37, %v1538_v37 }
 0x89d   :  { %v1556_v18 = vsel %vm255_vm2, %v1543_v52, 0.0 }
 0x89e   :  { %1557 = vadd.xlane.f32.xlu1 %v1556_v18 }
 0x8cd   :  { %v1546_v7 = vpop.xlane.xlu1 %1545 }
 0x8ce   :  { %v1559_v48 = vmul.f32 0.03125, %v1546_v7 }
 0x8cf   :  { %v1549_v58 = vpop.xlane.xlu0 %1548 }
 0x8d0   :  { %v1564_v23 = vadd.f32 1e-06, %v1559_v48  ;;  %v1560_v24 = vmul.f32 0.03125, %v1549_v58 }
 0x8d2   :  { %4542 = vrsqrt.f32 %v1564_v23  ;;  %v1565_v13 = vadd.f32 1e-06, %v1560_v24 }
 0x8d4   :  { %4544 = vrsqrt.f32 %v1565_v13 }
 0x8d5   :  { %v1552_v61 = vpop.xlane.xlu1 %1551 }
 0x8d6   :  { %v1561_v36 = vmul.f32 0.03125, %v1552_v61 }
 0x8d7   :  { %v1555_v33 = vpop.xlane.xlu0 %1554 }
 0x8d8   :  { %v1566_v10 = vadd.f32 1e-06, %v1561_v36  ;;  %v1562_v46 = vmul.f32 0.03125, %v1555_v33 }
 0x8da   :  { %4546 = vrsqrt.f32 %v1566_v10  ;;  %v1567_v42 = vadd.f32 1e-06, %v1562_v46 }
 0x8dc   :  { %v4543_v22 = vpop.eup %4542  ;;  %4548 = vrsqrt.f32 %v1567_v42 }
 0x8dd   :  { %v1574_v16 = vmul.f32 %v4543_v22, %v1534_v49 }
 0x8de   :  { %v4545_v62 = vpop.eup %4544 }
 0x8df   :  { %v1583_v43 = vmul.f32 %v3559_v53, %v1574_v16  ;;  %v1575_v19 = vmul.f32 %v4545_v62, %v1535_v54 }
 0x8e1   :  { %v1584_v30 = vmul.f32 %v3559_v53, %v1575_v19  ;;  %v1592_v38 = vadd.f32 %v3560_v9, %v1583_v43 }
 0x8e3   :  { %v1593_v41 = vadd.f32 %v3560_v9, %v1584_v30 }
 0x8e4   :  { %v4547_v26 = vpop.eup %4546 }
 0x8e5   :  { %v1576_v21 = vmul.f32 %v4547_v26, %v1536_v1  ;;  %v1597_v4 = vpack.c.bf16 %v1593_v41, %v1592_v38  ;;  %v4432_v1 = vld [vmem:[#allocation8 + $0x50] sm:$0xff]  }
 0x8e6   :  { %v4549_v55 = vpop.eup %4548  ;;  %4062 = vmatpush3.bf16.msra.mxu1 %v4432_v1 }
 0x8e7   :  { %v1577_v29 = vmul.f32 %v4549_v55, %v1537_v20  ;;  %4050 = vmatmul.mubr.msk.bf16.vlgmr.msra.gmra.mrb[72].mxu0 %vm255_vm2, %v1597_v4  ;;  %v1585_v44 = vmul.f32 %v3559_v53, %v1576_v21  ;;  %4063 = vmatprep.subr.bf16.mxu1 %v4853_v0  ;;  %v4434_v20 = vld [vmem:[#allocation8 + $0x60] sm:$0xff]  }
 0x8e8   :  { %4053 = vmatprep.mubr.msk.bf16.mxu0 %vm4854_vm0, %v4853_v0 }
 0x8e9   :  { %v1586_v47 = vmul.f32 %v3559_v53, %v1577_v29  ;;  %v1594_v31 = vadd.f32 %v3560_v9, %v1585_v44 }
 0x8ea   :  { %4064 = vmatpush3.bf16.msra.mxu1 %v4433_v56 }
 0x8eb   :  { %v1595_v49 = vadd.f32 %v3560_v9, %v1586_v47  ;;  %4065 = vmatprep.subr.bf16.mxu1 %v4853_v0 }
 0x8ed   :  { %v1598_v50 = vpack.c.bf16 %v1595_v49, %v1594_v31 }
 0x8ee   :  { %4066 = vmatpush3.bf16.msra.mxu1 %v4434_v20 }
 0x8ef   :  { %4054 = vmatmul.mubr.msk.bf16.gmra.mrb[76].mxu0 %vm255_vm2, %v1598_v50  ;;  %4067 = vmatprep.subr.bf16.mxu1 %v4853_v0 }
 0x8f0   :  { %4057 = vmatprep.mubr.msk.bf16.mxu0 %vm4854_vm0, %v4853_v0 }
 0x8f2   :  { %4068 = vmatpush3.bf16.msra.mxu1 %v4435_v25 }
 0x8f3   :  { %4097 = vmatprep.subr.bf16.mxu1 %v4853_v0 }
 0x92b   :  { %v1558_v54 = vpop.xlane.xlu1 %1557 }
 0x92c   :  { %v1563_v28 = vmul.f32 0.03125, %v1558_v54 }
 0x92e   :  { %v1568_v35 = vadd.f32 1e-06, %v1563_v28 }
 0x930   :  { %4550 = vrsqrt.f32 %v1568_v35 }
 0x93a   :  { %v4551_v32 = vpop.eup %4550 }
 0x93b   :  { %v1578_v39 = vmul.f32 %v4551_v32, %v1538_v37 }
 0x93d   :  { %v1587_v63 = vmul.f32 %v3559_v53, %v1578_v39 }
 0x93f   :  { %v1596_v40 = vadd.f32 %v3560_v9, %v1587_v63 }
 0x941   :  { %v1599_v17 = vpack.c.bf16 %v1596_v40, %v1596_v40 }
 0x943   :  { %4058 = vmatmul.mubr.msk.bf16.gmra.mrb[80].mxu0 %vm255_vm2, %v1599_v17 }
 0x944   :  { %4085 = vmatprep.mubr.msk.bf16.mxu0 %vm4854_vm0, %v4853_v0 }
 0x9ba   :  { %v1660_v8 = vpop.f32.mrb[72].mxu0 }
 0x9bb   :  { %v1661_v14 = vadd.f32 %v3561_v59, %v1660_v8  ;;  %v4051_v60 = vpop.f32.mrb[73].mxu0 }
 0x9bc   :  { %v1663_v45 = vpop.f32.mrb[74].mxu0 }
 0x9bd   :  { %v1682_v57 = vmul.f32 %v1661_v14, %v1661_v14  ;;  %v1664_v15 = vadd.f32 %v3561_v59, %v1663_v45  ;;  %v4052_v37 = vpop.f32.mrb[75].mxu0 }
 0x9bf   :  { %v1687_v52 = vmul.f32 %v1682_v57, %v1661_v14  ;;  %v1683_v18 = vmul.f32 %v1664_v15, %v1664_v15 }
 0x9c1   :  { %v1692_v7 = vmul.f32 0.044715, %v1687_v52  ;;  %v1688_v48 = vmul.f32 %v1683_v18, %v1664_v15 }
 0x9c2   :  { %v1668_v58 = vpop.f32.mrb[76].mxu0 }
 0x9c3   :  { %v1697_v23 = vadd.f32 %v1692_v7, %v1661_v14  ;;  %v1693_v24 = vmul.f32 0.044715, %v1688_v48  ;;  %v1669_v13 = vadd.f32 %v3561_v59, %v1668_v58  ;;  %v4055_v61 = vpop.f32.mrb[77].mxu0 }
 0x9c4   :  { %v1671_v36 = vpop.f32.mrb[78].mxu0 }
 0x9c5   :  { %v1702_v33 = vmul.f32 0.7978846, %v1697_v23  ;;  %v1698_v10 = vadd.f32 %v1693_v24, %v1664_v15  ;;  %v1684_v46 = vmul.f32 %v1669_v13, %v1669_v13  ;;  %v1672_v42 = vadd.f32 %v3561_v59, %v1671_v36  ;;  %v4056_v22 = vpop.f32.mrb[79].mxu0 }
 0x9c7   :  { %4552 = vtanh.f32 %v1702_v33  ;;  %v1703_v53 = vmul.f32 0.7978846, %v1698_v10  ;;  %v1689_v16 = vmul.f32 %v1684_v46, %v1669_v13  ;;  %v1685_v62 = vmul.f32 %v1672_v42, %v1672_v42 }
 0x9c9   :  { %4554 = vtanh.f32 %v1703_v53  ;;  %v1694_v43 = vmul.f32 0.044715, %v1689_v16  ;;  %v1690_v19 = vmul.f32 %v1685_v62, %v1672_v42 }
 0x9cb   :  { %v1699_v9 = vadd.f32 %v1694_v43, %v1669_v13  ;;  %v1695_v30 = vmul.f32 0.044715, %v1690_v19 }
 0x9cd   :  { %v1704_v38 = vmul.f32 0.7978846, %v1699_v9  ;;  %v1700_v41 = vadd.f32 %v1695_v30, %v1672_v42 }
 0x9cf   :  { %4556 = vtanh.f32 %v1704_v38  ;;  %v1705_v26 = vmul.f32 0.7978846, %v1700_v41 }
 0x9d1   :  { %v4553_v21 = vpop.eup %4552  ;;  %4558 = vtanh.f32 %v1705_v26 }
 0x9d2   :  { %v1712_v4 = vadd.f32 1.0, %v4553_v21 }
 0x9d3   :  { %v4555_v55 = vpop.eup %4554 }
 0x9d4   :  { %v1717_v29 = vmul.f32 0.5, %v1712_v4  ;;  %v1713_v44 = vadd.f32 1.0, %v4555_v55 }
 0x9d6   :  { %v1718_v47 = vmul.f32 0.5, %v1713_v44  ;;  %v1722_v31 = vmul.f32 %v1717_v29, %v1661_v14 }
 0x9d8   :  { %v1723_v49 = vmul.f32 %v1718_v47, %v1664_v15 }
 0x9d9   :  { %v4557_v50 = vpop.eup %4556 }
 0x9da   :  { %v1727_v54 = vpack.c.bf16 %v1723_v49, %v1722_v31  ;;  %v1714_v28 = vadd.f32 1.0, %v4557_v50 }
 0x9db   :  { %v4559_v35 = vpop.eup %4558 }
 0x9dc   :  { %v1719_v32 = vmul.f32 0.5, %v1714_v28  ;;  %v1715_v39 = vadd.f32 1.0, %v4559_v35  ;;  %4070 = vmatmul.mubr.msk.bf16.vlgmr.msra.gmra.mrb[48].mxu1 %vm159_vm1, %v1727_v54 }
 0x9dd   :  { %4073 = vmatprep.mubr.msk.bf16.mxu1 %vm4854_vm0, %v4853_v0 }
 0x9de   :  { %v1720_v63 = vmul.f32 0.5, %v1715_v39  ;;  %v1724_v40 = vmul.f32 %v1719_v32, %v1669_v13 }
 0x9e0   :  { %v1725_v17 = vmul.f32 %v1720_v63, %v1672_v42 }
 0x9e2   :  { %v1728_v1 = vpack.c.bf16 %v1725_v17, %v1724_v40 }
 0x9e4   :  { %4074 = vmatmul.mubr.msk.bf16.gmra.mrb[52].mxu1 %vm159_vm1, %v1728_v1 }
 0x9e5   :  { %4077 = vmatprep.mubr.msk.bf16.mxu1 %vm4854_vm0, %v4853_v0 }
 0xa16   :  { %v1676_v56 = vpop.f32.mrb[80].mxu0 }
 0xa17   :  { %v1677_v20 = vadd.f32 %v3561_v59, %v1676_v56  ;;  %v4059_v25 = vpop.f32.mrb[81].mxu0  ;;  %v3567_v59 = vld [vmem:[#allocation11 + $0x9] ss:$0 sm:$0xff] }
 0xa18   :  { %v1679_v8 = vpop.f32.mrb[82].mxu0 }
 0xa19   :  { %v1686_v14 = vmul.f32 %v1677_v20, %v1677_v20  ;;  %v4060_v60 = vpop.f32.mrb[83].mxu0 }
 0xa1a   :  { %v4437_v60 = vld [vmem:[#allocation8 + $0x80] sm:$0xff]  }
 0xa1b   :  { %v1691_v45 = vmul.f32 %v1686_v14, %v1677_v20  ;;  %v4436_v14 = vld [vmem:[#allocation8 + $0x70] sm:$0xff]   ;;  %4098 = vmatpush3.bf16.msra.mxu1 %v4437_v60 }
 0xa1c   :  { %4082 = vmatpush3.bf16.msra.mxu0 %v4436_v14  ;;  %4099 = vmatprep.subr.bf16.mxu1 %v4853_v0 }
 0xa1d   :  { %v1696_v57 = vmul.f32 0.044715, %v1691_v45  ;;  %4083 = vmatprep.subr.bf16.mxu0 %v4853_v0  ;;  %v4438_v45 = vld [vmem:[#allocation8 + $0x78] sm:$0xff]  }
 0xa1f   :  { %v1701_v15 = vadd.f32 %v1696_v57, %v1677_v20  ;;  %v4439_v57 = vld [vmem:[#allocation8 + $0x88] sm:$0xff]  }
 0xa20   :  { %4084 = vmatpush3.bf16.msra.mxu0 %v4438_v45  ;;  %4100 = vmatpush3.bf16.msra.mxu1 %v4439_v57 }
 0xa21   :  { %v1706_v37 = vmul.f32 0.7978846, %v1701_v15  ;;  %4113 = vmatprep.subr.bf16.mxu0 %v4853_v0  ;;  %4129 = vmatprep.subr.bf16.mxu1 %v4853_v0 }
 0xa23   :  { %4560 = vtanh.f32 %v1706_v37 }
 0xa2d   :  { %v4561_v52 = vpop.eup %4560 }
 0xa2e   :  { %v1716_v18 = vadd.f32 1.0, %v4561_v52 }
 0xa30   :  { %v1721_v7 = vmul.f32 0.5, %v1716_v18 }
 0xa32   :  { %v1726_v48 = vmul.f32 %v1721_v7, %v1677_v20 }
 0xa34   :  { %v1729_v58 = vpack.c.bf16 %v1726_v48, %v1726_v48 }
 0xa36   :  { %4078 = vmatmul.mubr.msk.bf16.gmra.mrb[56].mxu1 %vm159_vm1, %v1729_v58 }
 0xa37   :  { %4101 = vmatprep.mubr.msk.bf16.mxu1 %vm4854_vm0, %v4853_v0 }
 0xaaf   :  { %v1802_v23 = vpop.f32.mrb[48].mxu1 }
 0xab0   :  { %v1803_v24 = vadd.f32 %v3567_v59, %v1802_v23  ;;  %v4071_v13 = vpop.f32.mrb[49].mxu1 }
 0xab1   :  { %v1805_v61 = vpop.f32.mrb[50].mxu1 }
 0xab2   :  { %v5594_v36 = vadd.f32 %v1803_v24, %v5535_v2  ;;  %v1806_v33 = vadd.f32 %v3567_v59, %v1805_v61  ;;  %v4072_v10 = vpop.f32.mrb[51].mxu1 }
 0xab4   :  { %v5597_v46 = vadd.f32 %v1806_v33, %v5538_v12  ;;  %v1859_v42 = vsel %vm255_vm2, %v5594_v36, 0.0 }
 0xab5   :  { %1860 = vadd.xlane.f32.xlu0 %v1859_v42 }
 0xab6   :  { %v1862_v22 = vsel %vm255_vm2, %v5597_v46, 0.0 }
 0xab7   :  { %1863 = vadd.xlane.f32.xlu1 %v1862_v22  ;;  %v1810_v53 = vpop.f32.mrb[52].mxu1 }
 0xab8   :  { %v1811_v16 = vadd.f32 %v3567_v59, %v1810_v53  ;;  %v4075_v62 = vpop.f32.mrb[53].mxu1 }
 0xab9   :  { %v1813_v43 = vpop.f32.mrb[54].mxu1  ;;  %v3575_v62 = vld [vmem:[#allocation11 + $0xa] ss:$0 sm:$0xff] }
 0xaba   :  { %v5604_v2 = vadd.f32 %v1811_v16, %v5545_v51  ;;  %v1814_v19 = vadd.f32 %v3567_v59, %v1813_v43  ;;  %v4076_v9 = vpop.f32.mrb[55].mxu1 }
 0xabc   :  { %v5607_v12 = vadd.f32 %v1814_v19, %v5548_v5  ;;  %v1865_v30 = vsel %vm255_vm2, %v5604_v2, 0.0 }
 0xabd   :  { %1866 = vadd.xlane.f32.xlu0 %v1865_v30 }
 0xabe   :  { %v1868_v38 = vsel %vm255_vm2, %v5607_v12, 0.0 }
 0xabf   :  { %1869 = vadd.xlane.f32.xlu1 %v1868_v38  ;;  %v3576_v38 = vld [vmem:[#allocation11 + $0xb] ss:$0 sm:$0xff] }
 0xb09   :  { %v1818_v41 = vpop.f32.mrb[56].mxu1 }
 0xb0a   :  { %v1819_v26 = vadd.f32 %v3567_v59, %v1818_v41  ;;  %v4079_v21 = vpop.f32.mrb[57].mxu1 }
 0xb0b   :  { %v1821_v4 = vpop.f32.mrb[58].mxu1 }
 0xb0c   :  { %v5614_v51 = vadd.f32 %v1819_v26, %v5555_v11  ;;  %v4080_v55 = vpop.f32.mrb[59].mxu1 }
 0xb0e   :  { %v1871_v5 = vsel %vm255_vm2, %v5614_v51, 0.0 }
 0xb0f   :  { %1872 = vadd.xlane.f32.xlu0 %v1871_v5 }
 0xb42   :  { %v1861_v29 = vpop.xlane.xlu0 %1860 }
 0xb43   :  { %v1874_v44 = vmul.f32 0.03125, %v1861_v29  ;;  %v4440_v29 = vld [vmem:[#allocation8 + $0x90] sm:$0xff]  }
 0xb44   :  { %v1864_v47 = vpop.xlane.xlu1 %1863 }
 0xb45   :  { %v1879_v31 = vsub.f32 %v5594_v36, %v1874_v44  ;;  %v1875_v49 = vmul.f32 0.03125, %v1864_v47 }
 0xb47   :  { %v1880_v50 = vsub.f32 %v5597_v46, %v1875_v49  ;;  %v1884_v54 = vmul.f32 %v1879_v31, %v1879_v31 }
 0xb49   :  { %v1889_v28 = vsel %vm255_vm2, %v1884_v54, 0.0  ;;  %v1885_v35 = vmul.f32 %v1880_v50, %v1880_v50 }
 0xb4a   :  { %v1867_v32 = vpop.xlane.xlu0 %1866  ;;  %1890 = vadd.xlane.f32.xlu1 %v1889_v28 }
 0xb4b   :  { %v1876_v11 = vmul.f32 0.03125, %v1867_v32  ;;  %v1892_v39 = vsel %vm255_vm2, %v1885_v35, 0.0 }
 0xb4c   :  { %1893 = vadd.xlane.f32.xlu0 %v1892_v39  ;;  %v1870_v63 = vpop.xlane.xlu1 %1869 }
 0xb4d   :  { %v1881_v40 = vsub.f32 %v5604_v2, %v1876_v11  ;;  %v1877_v17 = vmul.f32 0.03125, %v1870_v63 }
 0xb4f   :  { %v1882_v1 = vsub.f32 %v5607_v12, %v1877_v17  ;;  %v1886_v56 = vmul.f32 %v1881_v40, %v1881_v40 }
 0xb51   :  { %v1895_v20 = vsel %vm255_vm2, %v1886_v56, 0.0  ;;  %v1887_v25 = vmul.f32 %v1882_v1, %v1882_v1 }
 0xb52   :  { %1896 = vadd.xlane.f32.xlu1 %v1895_v20  ;;  %v5661_v20 = vld [vmem:[#allocation11 + $0xc] ss:$0 sm:$0xff] }
 0xb53   :  { %v1898_v8 = vsel %vm255_vm2, %v1887_v25, 0.0 }
 0xb54   :  { %1899 = vadd.xlane.f32.xlu0 %v1898_v8  ;;  %v3583_v8 = vld [vmem:[#allocation11 + $0xd] ss:$0 sm:$0xff] }
 0xb9c   :  { %v1873_v15 = vpop.xlane.xlu0 %1872 }
 0xb9d   :  { %v1878_v37 = vmul.f32 0.03125, %v1873_v15 }
 0xb9f   :  { %v1883_v52 = vsub.f32 %v5614_v51, %v1878_v37 }
 0xba1   :  { %v1888_v18 = vmul.f32 %v1883_v52, %v1883_v52 }
 0xba3   :  { %v1901_v7 = vsel %vm255_vm2, %v1888_v18, 0.0 }
 0xba4   :  { %1902 = vadd.xlane.f32.xlu1 %v1901_v7 }
 0xbd7   :  { %v1891_v48 = vpop.xlane.xlu1 %1890 }
 0xbd8   :  { %v1904_v58 = vmul.f32 0.03125, %v1891_v48 }
 0xbd9   :  { %v1894_v59 = vpop.xlane.xlu0 %1893 }
 0xbda   :  { %v1909_v23 = vadd.f32 1e-06, %v1904_v58  ;;  %v1905_v24 = vmul.f32 0.03125, %v1894_v59 }
 0xbdc   :  { %4562 = vrsqrt.f32 %v1909_v23  ;;  %v1910_v13 = vadd.f32 1e-06, %v1905_v24 }
 0xbde   :  { %4564 = vrsqrt.f32 %v1910_v13 }
 0xbdf   :  { %v1897_v61 = vpop.xlane.xlu1 %1896 }
 0xbe0   :  { %v1906_v33 = vmul.f32 0.03125, %v1897_v61 }
 0xbe1   :  { %v1900_v10 = vpop.xlane.xlu0 %1899 }
 0xbe2   :  { %v1911_v42 = vadd.f32 1e-06, %v1906_v33  ;;  %v1907_v22 = vmul.f32 0.03125, %v1900_v10 }
 0xbe4   :  { %4566 = vrsqrt.f32 %v1911_v42  ;;  %v1912_v53 = vadd.f32 1e-06, %v1907_v22 }
 0xbe6   :  { %v4563_v16 = vpop.eup %4562  ;;  %4568 = vrsqrt.f32 %v1912_v53 }
 0xbe7   :  { %v1919_v43 = vmul.f32 %v4563_v16, %v1879_v31 }
 0xbe8   :  { %v4565_v19 = vpop.eup %4564 }
 0xbe9   :  { %v1928_v9 = vmul.f32 %v3575_v62, %v1919_v43  ;;  %v1920_v30 = vmul.f32 %v4565_v19, %v1880_v50  ;;  %v4441_v50 = vld [vmem:[#allocation8 + $0x98] sm:$0xff]  }
 0xbeb   :  { %v1929_v41 = vmul.f32 %v3575_v62, %v1920_v30  ;;  %v1937_v26 = vadd.f32 %v3576_v38, %v1928_v9 }
 0xbed   :  { %v1938_v21 = vadd.f32 %v3576_v38, %v1929_v41 }
 0xbee   :  { %v4567_v4 = vpop.eup %4566 }
 0xbef   :  { %v1921_v55 = vmul.f32 %v4567_v4, %v1881_v40  ;;  %v1942_v5 = vpack.c.bf16 %v1938_v21, %v1937_v26 }
 0xbf0   :  { %v4569_v44 = vpop.eup %4568 }
 0xbf1   :  { %v1922_v47 = vmul.f32 %v4569_v44, %v1882_v1  ;;  %4086 = vmatmul.mubr.msk.bf16.vlgmr.msra.gmra.mrb[84].mxu0 %vm255_vm2, %v1942_v5  ;;  %4102 = vmatmul.mubr.msk.bf16.vlgmr.msra.gmra.mrb[60].mxu1 %vm255_vm2, %v1942_v5  ;;  %v1930_v49 = vmul.f32 %v3575_v62, %v1921_v55 }
 0xbf2   :  { %4089 = vmatprep.mubr.msk.bf16.mxu0 %vm4854_vm0, %v4853_v0  ;;  %4105 = vmatprep.mubr.msk.bf16.mxu1 %vm4854_vm0, %v4853_v0 }
 0xbf3   :  { %v1931_v31 = vmul.f32 %v3575_v62, %v1922_v47  ;;  %4114 = vmatpush3.bf16.msra.mxu0 %v4440_v29  ;;  %v1939_v54 = vadd.f32 %v3576_v38, %v1930_v49 }
 0xbf4   :  { %4115 = vmatprep.subr.bf16.mxu0 %v4853_v0 }
 0xbf5   :  { %v1940_v28 = vadd.f32 %v3576_v38, %v1931_v31 }
 0xbf7   :  { %v1943_v35 = vpack.c.bf16 %v1940_v28, %v1939_v54  ;;  %4116 = vmatpush3.bf16.msra.mxu0 %v4441_v50  ;;  %v3589_v54 = vld [vmem:[#allocation11 + $0xe] ss:$0 sm:$0xff] }
 0xbf8   :  { %4147 = vmatprep.subr.bf16.mxu0 %v4853_v0 }
 0xbf9   :  { %4090 = vmatmul.mubr.msk.bf16.gmra.mrb[88].mxu0 %vm255_vm2, %v1943_v35  ;;  %4106 = vmatmul.mubr.msk.bf16.gmra.mrb[64].mxu1 %vm255_vm2, %v1943_v35 }
 0xbfa   :  { %4093 = vmatprep.mubr.msk.bf16.mxu0 %vm4854_vm0, %v4853_v0  ;;  %4109 = vmatprep.mubr.msk.bf16.mxu1 %vm4854_vm0, %v4853_v0 }
 0xc31   :  { %v1903_v32 = vpop.xlane.xlu1 %1902 }
 0xc32   :  { %v1908_v11 = vmul.f32 0.03125, %v1903_v32 }
 0xc34   :  { %v1913_v39 = vadd.f32 1e-06, %v1908_v11 }
 0xc36   :  { %4570 = vrsqrt.f32 %v1913_v39 }
 0xc40   :  { %v4571_v63 = vpop.eup %4570 }
 0xc41   :  { %v1923_v40 = vmul.f32 %v4571_v63, %v1883_v52 }
 0xc43   :  { %v1932_v17 = vmul.f32 %v3575_v62, %v1923_v40 }
 0xc45   :  { %v1941_v1 = vadd.f32 %v3576_v38, %v1932_v17 }
 0xc47   :  { %v1944_v56 = vpack.c.bf16 %v1941_v1, %v1941_v1 }
 0xc49   :  { %4094 = vmatmul.mubr.msk.bf16.gmra.mrb[92].mxu0 %vm255_vm2, %v1944_v56  ;;  %4110 = vmatmul.mubr.msk.bf16.gmra.mrb[68].mxu1 %vm255_vm2, %v1944_v56 }
 0xc4a   :  { %4117 = vmatprep.mubr.msk.bf16.mxu0 %vm4854_vm0, %v4853_v0  ;;  %4135 = vmatprep.mubr.msk.bf16.mxu1 %vm4854_vm0, %v4853_v0 }
 0xc51   :  { %4118 = vmatmul.mubr.msk.bf16.vlgmr.msra.gmra.mrb[96].mxu0 %vm255_vm2, %v1942_v5 }
 0xc52   :  { %4121 = vmatprep.mubr.msk.bf16.mxu0 %vm4854_vm0, %v4853_v0 }
 0xc59   :  { %4122 = vmatmul.mubr.msk.bf16.gmra.mrb[100].mxu0 %vm255_vm2, %v1943_v35 }
 0xc5a   :  { %4125 = vmatprep.mubr.msk.bf16.mxu0 %vm4854_vm0, %v4853_v0 }
 0xc61   :  { %4126 = vmatmul.mubr.msk.bf16.gmra.mrb[104].mxu0 %vm255_vm2, %v1944_v56 }
 0xc62   :  { %4153 = vmatprep.mubr.msk.bf16.mxu0 %vm4854_vm0, %v4853_v0 }
 0xcc4   :  { %v2005_v25 = vpop.f32.mrb[84].mxu0  ;;  %v2078_v14 = vpop.f32.mrb[60].mxu1 }
 0xcc5   :  { %v4087_v60 = vpop.f32.mrb[85].mxu0  ;;  %v4103_v45 = vpop.f32.mrb[61].mxu1  ;;  %v2006_v37 = vadd.f32 %v5661_v20, %v2005_v25  ;;  %v2079_v52 = vadd.f32 %v3583_v8, %v2078_v14 }
 0xcc6   :  { %v2008_v57 = vpop.f32.mrb[86].mxu0  ;;  %v2081_v15 = vpop.f32.mrb[62].mxu1 }
 0xcc7   :  { %v2009_v18 = vadd.f32 %v5661_v20, %v2008_v57  ;;  %v2082_v7 = vadd.f32 %v3583_v8, %v2081_v15  ;;  %v4088_v48 = vpop.f32.mrb[87].mxu0  ;;  %v4104_v58 = vpop.f32.mrb[63].mxu1 }
 0xcc9   :  { %v5665_v59 = vpack.c.bf16 %v2009_v18, %v2006_v37  ;;  %v2176_v23 = vpack.c.bf16 %v2082_v7, %v2079_v52 }
 0xccb   :  { %v5668_v61 = vsel %vm255_vm2, %v2176_v23, 0  ;;  %v2182_v11 = vmul.bf16 %v5665_v59, %v5133_v3  ;;  %v2320_v39 = vmul.bf16 %v5665_v59, %v5135_v6 }
 0xccc   :  { %v2013_v24 = vpop.f32.mrb[88].mxu0  ;;  %v2086_v13 = vpop.f32.mrb[64].mxu1  ;;  %4130 = vmatpush3.bf16.xpose.msra.mxu1 %v5668_v61  ;;  %4148 = vmatpush3.bf16.xpose.msra.mxu0 %v5668_v61 }
 0xccd   :  { %v4091_v33 = vpop.f32.mrb[89].mxu0  ;;  %v4107_v10 = vpop.f32.mrb[65].mxu1  ;;  %4131 = vmatprep.subr.bf16.mxu1 %v4853_v0  ;;  %4149 = vmatprep.subr.bf16.mxu0 %v4853_v0  ;;  %v2014_v53 = vadd.f32 %v5661_v20, %v2013_v24  ;;  %v2087_v16 = vadd.f32 %v3583_v8, %v2086_v13 }
 0xcce   :  { %v2016_v42 = vpop.f32.mrb[90].mxu0  ;;  %v2089_v22 = vpop.f32.mrb[66].mxu1 }
 0xccf   :  { %v2017_v62 = vadd.f32 %v5661_v20, %v2016_v42  ;;  %v2090_v43 = vadd.f32 %v3583_v8, %v2089_v22  ;;  %v4092_v19 = vpop.f32.mrb[91].mxu0  ;;  %v4108_v9 = vpop.f32.mrb[67].mxu1 }
 0xcd1   :  { %v5676_v30 = vpack.c.bf16 %v2017_v62, %v2014_v53  ;;  %v2177_v38 = vpack.c.bf16 %v2090_v43, %v2087_v16  ;;  %v2585_v16 = vmul.bf16 %v5665_v59, %v5186_v27 }
 0xcd3   :  { %v5679_v41 = vsel %vm255_vm2, %v2177_v38, 0  ;;  %v2183_v60 = vmul.bf16 %v5676_v30, %v5133_v3  ;;  %v2321_v52 = vmul.bf16 %v5676_v30, %v5135_v6  ;;  %v2788_v43 = vmul.bf16 %v5676_v30, %v5210_v34  ;;  %v5777_v38 = vld [vmem:[#allocation7] sm:$0xff] }
 0xcd4   :  { %4132 = vmatpush3.bf16.xpose.msra.mxu1 %v5679_v41  ;;  %4150 = vmatpush3.bf16.xpose.msra.mxu0 %v5679_v41 }
 0xcd5   :  { %4133 = vmatprep.subr.bf16.mxu1 %v4853_v0  ;;  %4151 = vmatprep.subr.bf16.mxu0 %v4853_v0 }
 0xd1c   :  { %v2021_v26 = vpop.f32.mrb[92].mxu0  ;;  %v2094_v21 = vpop.f32.mrb[68].mxu1 }
 0xd1d   :  { %v2095_v4 = vadd.f32 %v3583_v8, %v2094_v21  ;;  %v4095_v55 = vpop.f32.mrb[93].mxu0  ;;  %v4111_v5 = vpop.f32.mrb[69].mxu1  ;;  %v2022_v45 = vadd.f32 %v5661_v20, %v2021_v26 }
 0xd1e   :  { %v2024_v29 = vpop.f32.mrb[94].mxu0  ;;  %v2097_v44 = vpop.f32.mrb[70].mxu1  ;;  %v5782_v55 = vld [vmem:[#allocation7 + $0x8] sm:$0xff] }
 0xd1f   :  { %v2178_v47 = vpack.c.bf16 %v2095_v4, %v2095_v4  ;;  %v4096_v49 = vpop.f32.mrb[95].mxu0  ;;  %v4112_v31 = vpop.f32.mrb[71].mxu1  ;;  %v2175_v7 = vpack.c.bf16 %v2022_v45, %v2022_v45 }
 0xd21   :  { %v5686_v50 = vsel %vm255_vm2, %v2178_v47, 0  ;;  %v2184_v10 = vmul.bf16 %v2175_v7, %v5133_v3  ;;  %v2322_v42 = vmul.bf16 %v2175_v7, %v5135_v6  ;;  %v2587_v62 = vmul.bf16 %v2175_v7, %v5186_v27 }
 0xd22   :  { %4134 = vmatpush3.bf16.xpose.msra.mxu1 %v5686_v50  ;;  %4152 = vmatpush3.bf16.xpose.msra.mxu0 %v5686_v50  ;;  %v2789_v19 = vmul.bf16 %v2175_v7, %v5210_v34 }
 0xd23   :  { %4201 = vmatprep.subr.bf16.mxu0 %v4853_v0  ;;  %4165 = vmatprep.subr.bf16.mxu1 %v4853_v0 }
 0xd24   :  { %v2151_v28 = vpop.f32.mrb[96].mxu0 }
 0xd25   :  { %v4119_v35 = vpop.f32.mrb[97].mxu0  ;;  %v2152_v63 = vadd.f32 %v3589_v54, %v2151_v28 }
 0xd26   :  { %v2154_v32 = vpop.f32.mrb[98].mxu0 }
 0xd27   :  { %v2155_v40 = vadd.f32 %v3589_v54, %v2154_v32  ;;  %v4120_v17 = vpop.f32.mrb[99].mxu0 }
 0xd29   :  { %v5696_v1 = vpack.c.bf16 %v2155_v40, %v2152_v63  ;;  %4136 = vmatmul.mubr.msk.bf16.vlgmr.msra.gmra.mrb[72].mxu1 %vm255_vm2, %v2182_v11  ;;  %4154 = vmatmul.mubr.msk.bf16.vlgmr.msra.gmra.mrb[108].mxu0 %vm255_vm2, %v2320_v39  ;;  %v5796_v63 = vld [vmem:[#allocation7 + $0x18] sm:$0xff] }
 0xd2a   :  { %4202 = vmatpush3.bf16.xpose.msra.mxu0 %v5668_v61  ;;  %4139 = vmatprep.mubr.msk.bf16.mxu1 %vm4854_vm0, %v4853_v0 }
 0xd2b   :  { %v2446_v56 = vmul.bf16 %v5696_v1, %v5135_v6  ;;  %4157 = vmatprep.mubr.msk.bf16.mxu0 %vm4854_vm0, %v4853_v0  ;;  %4203 = vmatprep.subr.bf16.mxu0 %v4853_v0 }
 0xd2c   :  { %v2159_v25 = vpop.f32.mrb[100].mxu0 }
 0xd2d   :  { %v4123_v8 = vpop.f32.mrb[101].mxu0  ;;  %4166 = vmatpush3.bf16.msra.mxu1 %v2446_v56  ;;  %v2160_v57 = vadd.f32 %v3589_v54, %v2159_v25 }
 0xd2e   :  { %v2162_v14 = vpop.f32.mrb[102].mxu0  ;;  %4167 = vmatprep.subr.bf16.mxu1 %v4853_v0 }
 0xd2f   :  { %v2163_v15 = vadd.f32 %v3589_v54, %v2162_v14  ;;  %v4124_v37 = vpop.f32.mrb[103].mxu0 }
 0xd31   :  { %v5714_v18 = vpack.c.bf16 %v2163_v15, %v2160_v57  ;;  %4140 = vmatmul.mubr.msk.bf16.gmra.mrb[76].mxu1 %vm255_vm2, %v2183_v60  ;;  %4158 = vmatmul.mubr.msk.bf16.gmra.mrb[112].mxu0 %vm255_vm2, %v2321_v52  ;;  %v5811_v15 = vld [vmem:[#allocation7 + $0x20] sm:$0xff] }
 0xd32   :  { %4204 = vmatpush3.bf16.xpose.msra.mxu0 %v5679_v41  ;;  %4143 = vmatprep.mubr.msk.bf16.mxu1 %vm4854_vm0, %v4853_v0 }
 0xd33   :  { %v2447_v20 = vmul.bf16 %v5714_v18, %v5135_v6  ;;  %4161 = vmatprep.mubr.msk.bf16.mxu0 %vm4854_vm0, %v4853_v0  ;;  %4205 = vmatprep.subr.bf16.mxu0 %v4853_v0 }
 0xd34   :  { %v2167_v48 = vpop.f32.mrb[104].mxu0 }
 0xd35   :  { %v2168_v58 = vadd.f32 %v3589_v54, %v2167_v48  ;;  %v4127_v23 = vpop.f32.mrb[105].mxu0  ;;  %4168 = vmatpush3.bf16.msra.mxu1 %v2447_v20  ;;  %v5791_v54 = vld [vmem:[#allocation7 + $0x10] sm:$0xff] }
 0xd36   :  { %v2170_v24 = vpop.f32.mrb[106].mxu0  ;;  %4169 = vmatprep.subr.bf16.mxu1 %v4853_v0 }
 0xd37   :  { %v5727_v13 = vpack.c.bf16 %v2168_v58, %v2168_v58  ;;  %v4128_v33 = vpop.f32.mrb[107].mxu0 }
 0xd39   :  { %4144 = vmatmul.mubr.msk.bf16.gmra.mrb[80].mxu1 %vm255_vm2, %v2184_v10  ;;  %4162 = vmatmul.mubr.msk.bf16.gmra.mrb[116].mxu0 %vm255_vm2, %v2322_v42  ;;  %v2448_v22 = vmul.bf16 %v5727_v13, %v5135_v6  ;;  %v2586_v6 = vmul.bf16 %v5676_v30, %v5186_v27 }
 0xd3a   :  { %4206 = vmatpush3.bf16.xpose.msra.mxu0 %v5686_v50  ;;  %4207 = vmatprep.mubr.msk.bf16.mxu0 %vm4854_vm0, %v4853_v0 }
 0xd3b   :  { %v2459_v53 = vsel %vm871_vm3, %v2448_v22, 0  ;;  %4237 = vmatprep.subr.bf16.mxu0 %v4853_v0  ;;  %4171 = vmatprep.mubr.msk.bf16.mxu1 %vm4854_vm0, %v4853_v0 }
 0xd3c   :  { %4170 = vmatpush3.bf16.msra.mxu1 %v2459_v53 }
 0xd3d   :  { %4183 = vmatprep.subr.bf16.mxu1 %v4853_v0 }
 0xd41   :  { %4208 = vmatmul.mubr.msk.bf16.vlgmr.msra.gmra.mrb[120].mxu0 %vm255_vm2, %v2585_v16 }
 0xd42   :  { %4238 = vmatpush3.bf16.xpose.msra.mxu0 %v5668_v61  ;;  %4211 = vmatprep.mubr.msk.bf16.mxu0 %vm4854_vm0, %v4853_v0  ;;  %v2787_v61 = vmul.bf16 %v5665_v59, %v5210_v34 }
 0xd43   :  { %4239 = vmatprep.subr.bf16.mxu0 %v4853_v0 }
 0xd49   :  { %4212 = vmatmul.mubr.msk.bf16.gmra.mrb[124].mxu0 %vm255_vm2, %v2586_v6 }
 0xd4a   :  { %4240 = vmatpush3.bf16.xpose.msra.mxu0 %v5679_v41  ;;  %4215 = vmatprep.mubr.msk.bf16.mxu0 %vm4854_vm0, %v4853_v0 }
 0xd4b   :  { %4241 = vmatprep.subr.bf16.mxu0 %v4853_v0 }
 0xd51   :  { %4216 = vmatmul.mubr.msk.bf16.gmra.mrb[128].mxu0 %vm255_vm2, %v2587_v62 }
 0xd52   :  { %4242 = vmatpush3.bf16.xpose.msra.mxu0 %v5686_v50  ;;  %4243 = vmatprep.mubr.msk.bf16.mxu0 %vm4854_vm0, %v4853_v0 }
 0xd53   :  { %4273 = vmatprep.subr.bf16.mxu0 %v4853_v0 }
 0xd59   :  { %4244 = vmatmul.mubr.msk.bf16.vlgmr.msra.gmra.mrb[132].mxu0 %vm255_vm2, %v2787_v61 }
 0xd5a   :  { %4247 = vmatprep.mubr.msk.bf16.mxu0 %vm4854_vm0, %v4853_v0 }
 0xd61   :  { %4248 = vmatmul.mubr.msk.bf16.gmra.mrb[136].mxu0 %vm255_vm2, %v2788_v43 }
 0xd62   :  { %4251 = vmatprep.mubr.msk.bf16.mxu0 %vm4854_vm0, %v4853_v0 }
 0xd69   :  { %4252 = vmatmul.mubr.msk.bf16.gmra.mrb[140].mxu0 %vm255_vm2, %v2789_v19 }
 0xd6a   :  { %4277 = vmatprep.mubr.msk.bf16.mxu0 %vm4854_vm0, %v4853_v0 }
 0xdfc   :  { %v2237_v59 = vpop.f32.mrb[72].mxu1  ;;  %v2366_v9 = vpop.f32.mrb[108].mxu0 }
 0xdfd   :  { %v5780_v41 = vadd.f32 %v5777_v38, %v2366_v9  ;;  %v4137_v30 = vpop.f32.mrb[73].mxu1  ;;  %v4155_v26 = vpop.f32.mrb[109].mxu0  ;;  %v5804_v8 = vadd.f32 %v5777_v38, %v2237_v59 }
 0xdfe   :  { %v2240_v21 = vpop.f32.mrb[74].mxu1  ;;  %v2369_v4 = vpop.f32.mrb[110].mxu0 }
 0xdff   :  { %v5785_v5 = vadd.f32 %v5782_v55, %v2369_v4  ;;  %v4138_v29 = vpop.f32.mrb[75].mxu1  ;;  %v4156_v44 = vpop.f32.mrb[111].mxu0  ;;  %v2388_v47 = vsel %vm664_vm4, %v5780_v41, -inf  ;;  %v2259_v20 = vsel %vm664_vm4, %v5804_v8, -inf  ;;  %v5819_v23 = vadd.f32 %v5782_v55, %v2240_v21 }
 0xe00   :  { %2389 = vmax.xlane.f32.xlu0 %v2388_v47 }
 0xe01   :  { %v2391_v49 = vsel %vm664_vm4, %v5785_v5, -inf  ;;  %v2262_v16 = vsel %vm664_vm4, %v5819_v23, -inf }
 0xe02   :  { %2392 = vmax.xlane.f32.xlu1 %v2391_v49 }
 0xe04   :  { %v2245_v31 = vpop.f32.mrb[76].mxu1  ;;  %v2374_v50 = vpop.f32.mrb[112].mxu0 }
 0xe05   :  { %v5794_v28 = vadd.f32 %v5791_v54, %v2374_v50  ;;  %v4141_v35 = vpop.f32.mrb[77].mxu1  ;;  %v4159_v32 = vpop.f32.mrb[113].mxu0  ;;  %v5809_v57 = vadd.f32 %v5791_v54, %v2245_v31 }
 0xe06   :  { %v2248_v11 = vpop.f32.mrb[78].mxu1  ;;  %v2377_v39 = vpop.f32.mrb[114].mxu0 }
 0xe07   :  { %v5799_v40 = vadd.f32 %v5796_v63, %v2377_v39  ;;  %v4142_v17 = vpop.f32.mrb[79].mxu1  ;;  %v4160_v56 = vpop.f32.mrb[115].mxu0  ;;  %v2394_v25 = vsel %vm664_vm4, %v5794_v28, -inf  ;;  %v2265_v22 = vsel %vm664_vm4, %v5809_v57, -inf  ;;  %v5829_v53 = vadd.f32 %v5796_v63, %v2248_v11 }
 0xe08   :  { %2395 = vmax.xlane.f32.xlu0 %v2394_v25 }
 0xe09   :  { %v2397_v14 = vsel %vm664_vm4, %v5799_v40, -inf  ;;  %v2268_v30 = vsel %vm664_vm4, %v5829_v53, -inf }
 0xe0a   :  { %2398 = vmax.xlane.f32.xlu1 %v2397_v14 }
 0xe0c   :  { %v2253_v60 = vpop.f32.mrb[80].mxu1  ;;  %v2382_v45 = vpop.f32.mrb[116].mxu0 }
 0xe0d   :  { %v5814_v37 = vadd.f32 %v5811_v15, %v2382_v45  ;;  %v4145_v52 = vpop.f32.mrb[81].mxu1  ;;  %v4163_v7 = vpop.f32.mrb[117].mxu0  ;;  %v5824_v42 = vadd.f32 %v5811_v15, %v2253_v60 }
 0xe0e   :  { %v2256_v48 = vpop.f32.mrb[82].mxu1  ;;  %2260 = vmax.xlane.f32.xlu1 %v2259_v20  ;;  %v2385_v58 = vpop.f32.mrb[118].mxu0 }
 0xe0f   :  { %v4146_v24 = vpop.f32.mrb[83].mxu1  ;;  %v4164_v33 = vpop.f32.mrb[119].mxu0  ;;  %v2400_v10 = vsel %vm664_vm4, %v5814_v37, -inf  ;;  %v2271_v61 = vsel %vm664_vm4, %v5824_v42, -inf }
 0xe10   :  { %2401 = vmax.xlane.f32.xlu0 %v2400_v10 }
 0xe12   :  { %2266 = vmax.xlane.f32.xlu1 %v2265_v22 }
 0xe14   :  { %2263 = vmax.xlane.f32.xlu0 %v2262_v16  ;;  %v2631_v6 = vpop.f32.mrb[120].mxu0 }
 0xe15   :  { %v4209_v62 = vpop.f32.mrb[121].mxu0  ;;  %v5836_v19 = vadd.f32 %v5777_v38, %v2631_v6 }
 0xe16   :  { %2272 = vmax.xlane.f32.xlu1 %v2271_v61  ;;  %v2634_v43 = vpop.f32.mrb[122].mxu0 }
 0xe17   :  { %v5839_v59 = vadd.f32 %v5782_v55, %v2634_v43  ;;  %v4210_v9 = vpop.f32.mrb[123].mxu0  ;;  %v2653_v21 = vsel %vm664_vm4, %v5836_v19, -inf }
 0xe18   :  { %2269 = vmax.xlane.f32.xlu0 %v2268_v30 }
 0xe19   :  { %v2656_v26 = vsel %vm664_vm4, %v5839_v59, -inf }
 0xe1a   :  { %2657 = vmax.xlane.f32.xlu1 %v2656_v26 }
 0xe1c   :  { %2654 = vmax.xlane.f32.xlu0 %v2653_v21  ;;  %v2639_v4 = vpop.f32.mrb[124].mxu0 }
 0xe1d   :  { %v5848_v29 = vadd.f32 %v5791_v54, %v2639_v4  ;;  %v4213_v44 = vpop.f32.mrb[125].mxu0 }
 0xe1e   :  { %v2642_v47 = vpop.f32.mrb[126].mxu0 }
 0xe1f   :  { %v5851_v49 = vadd.f32 %v5796_v63, %v2642_v47  ;;  %v4214_v31 = vpop.f32.mrb[127].mxu0  ;;  %v2659_v50 = vsel %vm664_vm4, %v5848_v29, -inf }
 0xe20   :  { %2660 = vmax.xlane.f32.xlu0 %v2659_v50 }
 0xe21   :  { %v2662_v35 = vsel %vm664_vm4, %v5851_v49, -inf }
 0xe22   :  { %2663 = vmax.xlane.f32.xlu1 %v2662_v35 }
 0xe24   :  { %v2647_v32 = vpop.f32.mrb[128].mxu0 }
 0xe25   :  { %v5858_v11 = vadd.f32 %v5811_v15, %v2647_v32  ;;  %v4217_v39 = vpop.f32.mrb[129].mxu0 }
 0xe26   :  { %v2650_v17 = vpop.f32.mrb[130].mxu0 }
 0xe27   :  { %v4218_v56 = vpop.f32.mrb[131].mxu0  ;;  %v2665_v25 = vsel %vm664_vm4, %v5858_v11, -inf }
 0xe28   :  { %2666 = vmax.xlane.f32.xlu0 %v2665_v25 }
 0xe2c   :  { %v2833_v14 = vpop.f32.mrb[132].mxu0 }
 0xe2d   :  { %v5863_v60 = vadd.f32 %v5777_v38, %v2833_v14  ;;  %v4245_v45 = vpop.f32.mrb[133].mxu0 }
 0xe2e   :  { %v2836_v52 = vpop.f32.mrb[134].mxu0 }
 0xe2f   :  { %v5866_v7 = vadd.f32 %v5782_v55, %v2836_v52  ;;  %v4246_v20 = vpop.f32.mrb[135].mxu0  ;;  %v2855_v48 = vsel %vm664_vm4, %v5863_v60, -inf }
 0xe30   :  { %2856 = vmax.xlane.f32.xlu1 %v2855_v48 }
 0xe31   :  { %v2858_v58 = vsel %vm664_vm4, %v5866_v7, -inf }
 0xe32   :  { %2859 = vmax.xlane.f32.xlu0 %v2858_v58 }
 0xe34   :  { %v5872_v24 = vpop.f32.mrb[136].mxu0 }
 0xe35   :  { %v4249_v33 = vpop.f32.mrb[137].mxu0 }
 0xe36   :  { %v5874_v10 = vpop.f32.mrb[138].mxu0 }
 0xe37   :  { %v4250_v38 = vpop.f32.mrb[139].mxu0 }
 0xe3c   :  { %v5876_v22 = vpop.f32.mrb[140].mxu0 }
 0xe3d   :  { %v4253_v16 = vpop.f32.mrb[141].mxu0 }
 0xe3e   :  { %v2852_v55 = vpop.f32.mrb[142].mxu0 }
 0xe3f   :  { %v4254_v6 = vpop.f32.mrb[143].mxu0 }
 0xe8d   :  { %v2390_v62 = vpop.xlane.xlu0 %2389 }
 0xe8e   :  { %v2403_v61 = vsub.f32 %v5780_v41, %v2390_v62 }
 0xe8f   :  { %v2393_v43 = vpop.xlane.xlu1 %2392 }
 0xe90   :  { %v2408_v9 = vmul.f32 1.442695, %v2403_v61  ;;  %v2404_v30 = vsub.f32 %v5785_v5, %v2393_v43 }
 0xe92   :  { %4572 = vpow2.f32 %v2408_v9  ;;  %v2410_v26 = vmul.f32 1.442695, %v2404_v30 }
 0xe94   :  { %4574 = vpow2.f32 %v2410_v26 }
 0xe95   :  { %v2396_v21 = vpop.xlane.xlu0 %2395 }
 0xe96   :  { %v2405_v4 = vsub.f32 %v5794_v28, %v2396_v21 }
 0xe97   :  { %v2399_v44 = vpop.xlane.xlu1 %2398 }
 0xe98   :  { %v2412_v47 = vmul.f32 1.442695, %v2405_v4  ;;  %v2406_v31 = vsub.f32 %v5799_v40, %v2399_v44 }
 0xe9a   :  { %4576 = vpow2.f32 %v2412_v47  ;;  %v2414_v50 = vmul.f32 1.442695, %v2406_v31 }
 0xe9b   :  { %v2261_v35 = vpop.xlane.xlu1 %2260 }
 0xe9c   :  { %v5882_v32 = vpop.eup %4572  ;;  %4578 = vpow2.f32 %v2414_v50  ;;  %v2274_v41 = vsub.f32 %v5804_v8, %v2261_v35 }
 0xe9d   :  { %v2402_v39 = vpop.xlane.xlu0 %2401  ;;  %v2418_v5 = vsel %vm664_vm4, %v5882_v32, 0.0 }
 0xe9e   :  { %v5887_v17 = vpop.eup %4574  ;;  %v2279_v56 = vmul.f32 1.442695, %v2274_v41  ;;  %v2407_v28 = vsub.f32 %v5814_v37, %v2402_v39  ;;  %2419 = vadd.xlane.f32.xlu1 %v2418_v5 }
 0xe9f   :  { %v2267_v25 = vpop.xlane.xlu1 %2266  ;;  %v2421_v40 = vsel %vm664_vm4, %v5887_v17, 0.0 }
 0xea0   :  { %4580 = vpow2.f32 %v2279_v56  ;;  %v2416_v14 = vmul.f32 1.442695, %v2407_v28  ;;  %v2276_v45 = vsub.f32 %v5809_v57, %v2267_v25  ;;  %2422 = vadd.xlane.f32.xlu0 %v2421_v40 }
 0xea1   :  { %v2264_v8 = vpop.xlane.xlu0 %2263 }
 0xea2   :  { %4582 = vpow2.f32 %v2416_v14  ;;  %v2283_v52 = vmul.f32 1.442695, %v2276_v45  ;;  %v2275_v20 = vsub.f32 %v5819_v23, %v2264_v8 }
 0xea3   :  { %v2273_v48 = vpop.xlane.xlu1 %2272 }
 0xea4   :  { %v5894_v58 = vpop.eup %4576  ;;  %4584 = vpow2.f32 %v2283_v52  ;;  %v2281_v37 = vmul.f32 1.442695, %v2275_v20  ;;  %v2278_v33 = vsub.f32 %v5824_v42, %v2273_v48 }
 0xea5   :  { %v2270_v38 = vpop.xlane.xlu0 %2269  ;;  %v2424_v16 = vsel %vm664_vm4, %v5894_v58, 0.0 }
 0xea6   :  { %v5899_v55 = vpop.eup %4578  ;;  %4586 = vpow2.f32 %v2281_v37  ;;  %v2287_v57 = vmul.f32 1.442695, %v2278_v33  ;;  %v2277_v6 = vsub.f32 %v5829_v53, %v2270_v38  ;;  %2425 = vadd.xlane.f32.xlu1 %v2424_v16 }
 0xea7   :  { %v2658_v62 = vpop.xlane.xlu1 %2657  ;;  %v2427_v23 = vsel %vm664_vm4, %v5899_v55, 0.0 }
 0xea8   :  { %4588 = vpow2.f32 %v2287_v57  ;;  %v2285_v61 = vmul.f32 1.442695, %v2277_v6  ;;  %v2669_v43 = vsub.f32 %v5839_v59, %v2658_v62  ;;  %2428 = vadd.xlane.f32.xlu0 %v2427_v23 }
 0xea9   :  { %v2655_v42 = vpop.xlane.xlu0 %2654 }
 0xeaa   :  { %v5905_v9 = vpop.eup %4580  ;;  %4590 = vpow2.f32 %v2285_v61  ;;  %v2675_v30 = vmul.f32 1.442695, %v2669_v43  ;;  %v2668_v26 = vsub.f32 %v5836_v19, %v2655_v42 }
 0xeab   :  { %v2289_v53 = vsel %vm664_vm4, %v5905_v9, 0.0 }
 0xeac   :  { %v5910_v21 = vpop.eup %4582  ;;  %4592 = vpow2.f32 %v2675_v30  ;;  %v2673_v4 = vmul.f32 1.442695, %v2668_v26  ;;  %2290 = vadd.xlane.f32.xlu0 %v2289_v53  ;;  %v5967_v53 = vadd.f32 %v5796_v63, %v5874_v10 }
 0xead   :  { %v2661_v44 = vpop.xlane.xlu0 %2660  ;;  %v2430_v59 = vsel %vm664_vm4, %v5910_v21, 0.0 }
 0xeae   :  { %v5914_v47 = vpop.eup %4584  ;;  %4594 = vpow2.f32 %v2673_v4  ;;  %v2670_v31 = vsub.f32 %v5848_v29, %v2661_v44  ;;  %2431 = vadd.xlane.f32.xlu1 %v2430_v59  ;;  %v5973_v44 = vadd.f32 %v5811_v15, %v5876_v22 }
 0xeaf   :  { %v2664_v50 = vpop.xlane.xlu1 %2663  ;;  %v2295_v19 = vsel %vm664_vm4, %v5914_v47, 0.0 }
 0xeb0   :  { %v5919_v35 = vpop.eup %4586  ;;  %v2677_v41 = vmul.f32 1.442695, %v2670_v31  ;;  %v2671_v39 = vsub.f32 %v5851_v49, %v2664_v50  ;;  %2296 = vadd.xlane.f32.xlu0 %v2295_v19  ;;  %v2867_v63 = vsel %vm664_vm4, %v5973_v44, -inf }
 0xeb1   :  { %v2292_v5 = vsel %vm664_vm4, %v5919_v35, 0.0 }
 0xeb2   :  { %v5924_v56 = vpop.eup %4588  ;;  %4596 = vpow2.f32 %v2677_v41  ;;  %v2679_v28 = vmul.f32 1.442695, %v2671_v39  ;;  %2293 = vadd.xlane.f32.xlu1 %v2292_v5 }
 0xeb3   :  { %v2301_v29 = vsel %vm664_vm4, %v5924_v56, 0.0 }
 0xeb4   :  { %v5928_v25 = vpop.eup %4590  ;;  %4598 = vpow2.f32 %v2679_v28  ;;  %2302 = vadd.xlane.f32.xlu0 %v2301_v29  ;;  %v2317_v28 = vmul.bf16 %v5696_v1, %v5133_v3 }
 0xeb5   :  { %v2667_v40 = vpop.xlane.xlu0 %2666  ;;  %v2298_v49 = vsel %vm664_vm4, %v5928_v25, 0.0 }
 0xeb6   :  { %v5932_v14 = vpop.eup %4592  ;;  %v2672_v45 = vsub.f32 %v5858_v11, %v2667_v40  ;;  %2299 = vadd.xlane.f32.xlu1 %v2298_v49 }
 0xeb7   :  { %v2686_v8 = vsel %vm664_vm4, %v5932_v14, 0.0 }
 0xeb8   :  { %v5937_v52 = vpop.eup %4594  ;;  %v2681_v20 = vmul.f32 1.442695, %v2672_v45  ;;  %2687 = vadd.xlane.f32.xlu0 %v2686_v8 }
 0xeb9   :  { %v2683_v48 = vsel %vm664_vm4, %v5937_v52, 0.0 }
 0xeba   :  { %4600 = vpow2.f32 %v2681_v20  ;;  %2684 = vadd.xlane.f32.xlu1 %v2683_v48  ;;  %v2319_v20 = vmul.bf16 %v5727_v13, %v5133_v3 }
 0xebc   :  { %v5941_v37 = vpop.eup %4596 }
 0xebd   :  { %v2857_v33 = vpop.xlane.xlu1 %2856  ;;  %v2689_v38 = vsel %vm664_vm4, %v5941_v37, 0.0 }
 0xebe   :  { %v5945_v11 = vpop.eup %4598  ;;  %v2870_v16 = vsub.f32 %v5863_v60, %v2857_v33  ;;  %2690 = vadd.xlane.f32.xlu1 %v2689_v38  ;;  %v5959_v60 = vadd.f32 %v5791_v54, %v5872_v24  ;;  %v2864_v24 = vsel %vm664_vm4, %v5967_v53, -inf  ;;  %v2527_v33 = vsel %vm871_vm3, %v2319_v20, 0 }
 0xebf   :  { %v2860_v57 = vpop.xlane.xlu0 %2859  ;;  %v2692_v6 = vsel %vm664_vm4, %v5945_v11, 0.0 }
 0xec0   :  { %v2875_v62 = vmul.f32 1.442695, %v2870_v16  ;;  %v2871_v23 = vsub.f32 %v5866_v7, %v2860_v57  ;;  %2693 = vadd.xlane.f32.xlu0 %v2692_v6  ;;  %v2861_v54 = vsel %vm664_vm4, %v5959_v60, -inf }
 0xec2   :  { %4602 = vpow2.f32 %v2875_v62  ;;  %v2877_v61 = vmul.f32 1.442695, %v2871_v23 }
 0xec4   :  { %v5951_v43 = vpop.eup %4600  ;;  %4604 = vpow2.f32 %v2877_v61 }
 0xec5   :  { %v2695_v42 = vsel %vm664_vm4, %v5951_v43, 0.0 }
 0xec6   :  { %2696 = vadd.xlane.f32.xlu1 %v2695_v42 }
 0xecc   :  { %v5955_v30 = vpop.eup %4602 }
 0xecd   :  { %v2885_v26 = vsel %vm664_vm4, %v5955_v30, 0.0 }
 0xece   :  { %v5963_v7 = vpop.eup %4604  ;;  %2886 = vadd.xlane.f32.xlu0 %v2885_v26 }
 0xecf   :  { %v2888_v4 = vsel %vm664_vm4, %v5963_v7, 0.0 }
 0xed0   :  { %2889 = vadd.xlane.f32.xlu1 %v2888_v4 }
 0xed2   :  { %2862 = vmax.xlane.f32.xlu0 %v2861_v54  ;;  %v2711_v54 = vmul.bf16 %v5696_v1, %v5186_v27 }
 0xed4   :  { %2865 = vmax.xlane.f32.xlu1 %v2864_v24 }
 0xed6   :  { %2868 = vmax.xlane.f32.xlu0 %v2867_v63 }
 0xf2b   :  { %v2420_v10 = vpop.xlane.xlu1 %2419 }
 0xf2c   :  { %4606 = vrcp.f32 %v2420_v10 }
 0xf2d   :  { %v2423_v59 = vpop.xlane.xlu0 %2422 }
 0xf2e   :  { %4608 = vrcp.f32 %v2423_v59 }
 0xf33   :  { %v2426_v31 = vpop.xlane.xlu1 %2425 }
 0xf34   :  { %4610 = vrcp.f32 %v2426_v31 }
 0xf35   :  { %v2429_v15 = vpop.xlane.xlu0 %2428 }
 0xf36   :  { %v4607_v22 = vpop.eup %4606  ;;  %4612 = vrcp.f32 %v2429_v15  ;;  %v2713_v15 = vmul.bf16 %v5727_v13, %v5186_v27 }
 0xf37   :  { %v2438_v19 = vmul.f32 %v4607_v22, %v5882_v32  ;;  %v2318_v32 = vmul.bf16 %v5714_v18, %v5133_v3 }
 0xf38   :  { %v4609_v50 = vpop.eup %4608 }
 0xf39   :  { %v2439_v41 = vmul.f32 %v4609_v50, %v5887_v17  ;;  %v2291_v17 = vpop.xlane.xlu0 %2290 }
 0xf3b   :  { %v2443_v39 = vpack.c.bf16 %v2439_v41, %v2438_v19  ;;  %v2432_v5 = vpop.xlane.xlu1 %2431 }
 0xf3c   :  { %4614 = vrcp.f32 %v2432_v5 }
 0xf3d   :  { %4172 = vmatmul.mubr.msk.bf16.vlgmr.msra.gmra.mrb[84].mxu1 %vm664_vm4, %v2443_v39 }
 0xf3e   :  { %v4611_v29 = vpop.eup %4610  ;;  %4184 = vmatpush3.bf16.msra.mxu1 %v2317_v28  ;;  %4175 = vmatprep.mubr.msk.bf16.mxu1 %vm4854_vm0, %v4853_v0 }
 0xf3f   :  { %v2294_v40 = vpop.xlane.xlu1 %2293  ;;  %4185 = vmatprep.subr.bf16.mxu1 %v4853_v0  ;;  %v2440_v45 = vmul.f32 %v4611_v29, %v5894_v58  ;;  %v2297_v58 = vpop.xlane.xlu0 %2296 }
 0xf40   :  { %v4613_v49 = vpop.eup %4612  ;;  %4616 = vrcp.f32 %v2294_v40 }
 0xf41   :  { %v2441_v8 = vmul.f32 %v4613_v49, %v5899_v55  ;;  %4618 = vrcp.f32 %v2291_v17 }
 0xf42   :  { %4186 = vmatpush3.bf16.msra.mxu1 %v2318_v32 }
 0xf43   :  { %4187 = vmatprep.subr.bf16.mxu1 %v4853_v0  ;;  %v2444_v48 = vpack.c.bf16 %v2441_v8, %v2440_v45  ;;  %v2300_v55 = vpop.xlane.xlu1 %2299  ;;  %v2303_v6 = vpop.xlane.xlu0 %2302 }
 0xf44   :  { %4620 = vrcp.f32 %v2300_v55  ;;  %v2914_v55 = vmul.bf16 %v5714_v18, %v5210_v34 }
 0xf45   :  { %4176 = vmatmul.mubr.msk.bf16.gmra.mrb[88].mxu1 %vm664_vm4, %v2444_v48  ;;  %4622 = vrcp.f32 %v2297_v58 }
 0xf46   :  { %v4615_v38 = vpop.eup %4614  ;;  %4188 = vmatpush3.bf16.msra.mxu1 %v2527_v33  ;;  %4179 = vmatprep.mubr.msk.bf16.mxu1 %vm4854_vm0, %v4853_v0  ;;  %4624 = vrcp.f32 %v2303_v6  ;;  %v2913_v33 = vmul.bf16 %v5696_v1, %v5210_v34 }
 0xf47   :  { %v2442_v16 = vmul.f32 %v4615_v38, %v5910_v21  ;;  %4219 = vmatprep.subr.bf16.mxu1 %v4853_v0  ;;  %v2685_v61 = vpop.xlane.xlu1 %2684  ;;  %v2688_v26 = vpop.xlane.xlu0 %2687 }
 0xf48   :  { %4626 = vrcp.f32 %v2685_v61 }
 0xf49   :  { %v2445_v3 = vpack.c.bf16 %v2442_v16, %v2442_v16  ;;  %4628 = vrcp.f32 %v2688_v26  ;;  %v4443_v26 = vld [vmem:[#allocation8 + $0xa8] sm:$0xff]  }
 0xf4a   :  { %v4617_v57 = vpop.eup %4616 }
 0xf4b   :  { %v4619_v62 = vpop.eup %4618  ;;  %v2310_v23 = vmul.f32 %v4617_v57, %v5919_v35  ;;  %v2691_v24 = vpop.xlane.xlu1 %2690  ;;  %v2712_v35 = vmul.bf16 %v5714_v18, %v5186_v27 }
 0xf4c   :  { %v2309_v42 = vmul.f32 %v4619_v62, %v5905_v9 }
 0xf4d   :  { %4180 = vmatmul.mubr.msk.bf16.gmra.mrb[92].mxu1 %vm664_vm4, %v2445_v3  ;;  %v2694_v10 = vpop.xlane.xlu0 %2693  ;;  %v2915_v3 = vmul.bf16 %v5727_v13, %v5210_v34 }
 0xf4e   :  { %4189 = vmatprep.mubr.msk.bf16.mxu1 %vm4854_vm0, %v4853_v0  ;;  %v2314_v21 = vpack.c.bf16 %v2310_v23, %v2309_v42  ;;  %v4621_v4 = vpop.eup %4620  ;;  %4630 = vrcp.f32 %v2694_v10 }
 0xf4f   :  { %v4623_v63 = vpop.eup %4622  ;;  %v2312_v9 = vmul.f32 %v4621_v4, %v5928_v25  ;;  %v2724_v25 = vsel %vm871_vm3, %v2713_v15, 0  ;;  %4632 = vrcp.f32 %v2691_v24  ;;  %v2926_v18 = vsel %vm871_vm3, %v2915_v3, 0 }
 0xf50   :  { %v2311_v31 = vmul.f32 %v4623_v63, %v5914_v47  ;;  %v4625_v19 = vpop.eup %4624 }
 0xf51   :  { %v2313_v27 = vmul.f32 %v4625_v19, %v5924_v56 }
 0xf52   :  { %v2315_v50 = vpack.c.bf16 %v2312_v9, %v2311_v31  ;;  %v4627_v32 = vpop.eup %4626 }
 0xf53   :  { %v2697_v59 = vpop.xlane.xlu1 %2696  ;;  %v2316_v49 = vpack.c.bf16 %v2313_v27, %v2313_v27  ;;  %v4629_v56 = vpop.eup %4628 }
 0xf55   :  { %4190 = vmatmul.mubr.msk.bf16.vlgmr.msra.gmra.mrb[84].mxu1 %vm664_vm4, %v2314_v21 }
 0xf56   :  { %4220 = vmatpush3.bf16.msra.mxu1 %v2711_v54  ;;  %4193 = vmatprep.mubr.msk.bf16.mxu1 %vm4854_vm0, %v4853_v0 }
 0xf57   :  { %4221 = vmatprep.subr.bf16.mxu1 %v4853_v0 }
 0xf58   :  { %v4631_v48 = vpop.eup %4630 }
 0xf5a   :  { %4222 = vmatpush3.bf16.msra.mxu1 %v2712_v35 }
 0xf5b   :  { %v2887_v22 = vpop.xlane.xlu0 %2886  ;;  %4223 = vmatprep.subr.bf16.mxu1 %v4853_v0 }
 0xf5d   :  { %v2890_v41 = vpop.xlane.xlu1 %2889  ;;  %4194 = vmatmul.mubr.msk.bf16.gmra.mrb[88].mxu1 %vm664_vm4, %v2315_v50 }
 0xf5e   :  { %4224 = vmatpush3.bf16.msra.mxu1 %v2724_v25  ;;  %4197 = vmatprep.mubr.msk.bf16.mxu1 %vm4854_vm0, %v4853_v0 }
 0xf5f   :  { %v2863_v47 = vpop.xlane.xlu0 %2862  ;;  %4255 = vmatprep.subr.bf16.mxu1 %v4853_v0 }
 0xf60   :  { %v2872_v39 = vsub.f32 %v5959_v60, %v2863_v47  ;;  %v2703_v60 = vmul.f32 %v4627_v32, %v5937_v52 }
 0xf61   :  { %v2866_v5 = vpop.xlane.xlu1 %2865 }
 0xf62   :  { %v2879_v28 = vmul.f32 1.442695, %v2872_v39  ;;  %v2873_v29 = vsub.f32 %v5967_v53, %v2866_v5  ;;  %v2704_v53 = vmul.f32 %v4629_v56, %v5932_v14  ;;  %v2706_v14 = vmul.f32 %v4631_v48, %v5945_v11 }
 0xf63   :  { %v2869_v40 = vpop.xlane.xlu0 %2868 }
 0xf64   :  { %4634 = vpow2.f32 %v2879_v28  ;;  %v2881_v17 = vmul.f32 1.442695, %v2873_v29  ;;  %v2874_v45 = vsub.f32 %v5973_v44, %v2869_v40  ;;  %v2708_v20 = vpack.c.bf16 %v2704_v53, %v2703_v60  ;;  %v4633_v44 = vpop.eup %4632 }
 0xf65   :  { %4198 = vmatmul.mubr.msk.bf16.gmra.mrb[92].mxu1 %vm664_vm4, %v2316_v49  ;;  %v2705_v16 = vmul.f32 %v4633_v44, %v5941_v37 }
 0xf66   :  { %4636 = vpow2.f32 %v2881_v17  ;;  %v2883_v8 = vmul.f32 1.442695, %v2874_v45  ;;  %4225 = vmatprep.mubr.msk.bf16.mxu1 %vm4854_vm0, %v4853_v0  ;;  %v3624_v45 = vld [vmem:[#allocation11 + $0xf] ss:$0 sm:$0xff] }
 0xf67   :  { %v2709_v6 = vpack.c.bf16 %v2706_v14, %v2705_v16 }
 0xf68   :  { %4638 = vpow2.f32 %v2883_v8 }
 0xf69   :  { %4640 = vrcp.f32 %v2697_v59 }
 0xf6a   :  { %4642 = vrcp.f32 %v2890_v41 }
 0xf6b   :  { %4644 = vrcp.f32 %v2887_v22 }
 0xf6d   :  { %4226 = vmatmul.mubr.msk.bf16.vlgmr.msra.gmra.mrb[84].mxu1 %vm664_vm4, %v2708_v20 }
 0xf6e   :  { %v4635_v38 = vpop.eup %4634  ;;  %4256 = vmatpush3.bf16.msra.mxu1 %v2913_v33  ;;  %4229 = vmatprep.mubr.msk.bf16.mxu1 %vm4854_vm0, %v4853_v0 }
 0xf6f   :  { %4257 = vmatprep.subr.bf16.mxu1 %v4853_v0  ;;  %v2891_v52 = vsel %vm664_vm4, %v4635_v38, 0.0 }
 0xf70   :  { %v4637_v58 = vpop.eup %4636  ;;  %2892 = vadd.xlane.f32.xlu1 %v2891_v52 }
 0xf71   :  { %v2894_v1 = vsel %vm664_vm4, %v4637_v58, 0.0 }
 0xf72   :  { %v4639_v57 = vpop.eup %4638  ;;  %4258 = vmatpush3.bf16.msra.mxu1 %v2914_v55  ;;  %2895 = vadd.xlane.f32.xlu0 %v2894_v1 }
 0xf73   :  { %4259 = vmatprep.subr.bf16.mxu1 %v4853_v0  ;;  %v2897_v11 = vsel %vm664_vm4, %v4639_v57, 0.0  ;;  %v4641_v62 = vpop.eup %4640 }
 0xf74   :  { %2898 = vadd.xlane.f32.xlu1 %v2897_v11  ;;  %v2707_v34 = vmul.f32 %v4641_v62, %v5951_v43  ;;  %v4643_v37 = vpop.eup %4642  ;;  %v4442_v43 = vld [vmem:[#allocation8 + $0xa0] sm:$0xff]  }
 0xf75   :  { %4230 = vmatmul.mubr.msk.bf16.gmra.mrb[88].mxu1 %vm664_vm4, %v2709_v6  ;;  %v4645_v23 = vpop.eup %4644  ;;  %v2906_v61 = vmul.f32 %v4643_v37, %v5963_v7  ;;  %4274 = vmatpush3.bf16.msra.mxu0 %v4442_v43 }
 0xf76   :  { %4260 = vmatpush3.bf16.msra.mxu1 %v2926_v18  ;;  %4233 = vmatprep.mubr.msk.bf16.mxu1 %vm4854_vm0, %v4853_v0  ;;  %v2710_v13 = vpack.c.bf16 %v2707_v34, %v2707_v34  ;;  %v2905_v42 = vmul.f32 %v4645_v23, %v5955_v30 }
 0xf77   :  { %4305 = vmatprep.subr.bf16.mxu1 %v4853_v0  ;;  %4275 = vmatprep.subr.bf16.mxu0 %v4853_v0 }
 0xf78   :  { %v2910_v21 = vpack.c.bf16 %v2906_v61, %v2905_v42 }
 0xf79   :  { %4276 = vmatpush3.bf16.msra.mxu0 %v4443_v26 }
 0xf7a   :  { %4289 = vmatprep.subr.bf16.mxu0 %v4853_v0 }
 0xf7d   :  { %4234 = vmatmul.mubr.msk.bf16.gmra.mrb[92].mxu1 %vm664_vm4, %v2710_v13 }
 0xf7e   :  { %4261 = vmatprep.mubr.msk.bf16.mxu1 %vm4854_vm0, %v4853_v0 }
 0xf85   :  { %4262 = vmatmul.mubr.msk.bf16.vlgmr.msra.gmra.mrb[84].mxu1 %vm664_vm4, %v2910_v21 }
 0xf86   :  { %4265 = vmatprep.mubr.msk.bf16.mxu1 %vm4854_vm0, %v4853_v0 }
 0xffd   :  { %v2893_v4 = vpop.xlane.xlu1 %2892 }
 0xffe   :  { %4646 = vrcp.f32 %v2893_v4 }
 0xfff   :  { %v2896_v54 = vpop.xlane.xlu0 %2895 }
0x1000   :  { %4648 = vrcp.f32 %v2896_v54 }
0x1001   :  { %v2899_v7 = vpop.xlane.xlu1 %2898 }
0x1002   :  { %4650 = vrcp.f32 %v2899_v7  ;;  %v4444_v7 = vld [vmem:[#allocation8 + $0xb0] sm:$0xff]  }
0x1008   :  { %v4647_v30 = vpop.eup %4646 }
0x1009   :  { %v2907_v63 = vmul.f32 %v4647_v30, %v4635_v38 }
0x100a   :  { %v4649_v24 = vpop.eup %4648 }
0x100b   :  { %v2908_v10 = vmul.f32 %v4649_v24, %v4637_v58 }
0x100c   :  { %v4651_v35 = vpop.eup %4650 }
0x100d   :  { %v2911_v9 = vpack.c.bf16 %v2908_v10, %v2907_v63  ;;  %v2909_v59 = vmul.f32 %v4651_v35, %v4639_v57 }
0x100f   :  { %4266 = vmatmul.mubr.msk.bf16.gmra.mrb[88].mxu1 %vm664_vm4, %v2911_v9  ;;  %v2912_v31 = vpack.c.bf16 %v2909_v59, %v2909_v59 }
0x1010   :  { %4269 = vmatprep.mubr.msk.bf16.mxu1 %vm4854_vm0, %v4853_v0 }
0x1017   :  { %4270 = vmatmul.mubr.msk.bf16.gmra.mrb[92].mxu1 %vm664_vm4, %v2912_v31 }
0x1018   :  { %4313 = vmatprep.mubr.msk.bf16.mxu1 %vm4854_vm0, %v4853_v0 }
0x1058   :  { %v2962_v15 = vpop.f32.mrb[84].mxu1 }
0x1059   :  { %v4263_v22 = vpop.f32.mrb[85].mxu1 }
0x105a   :  { %v2965_v50 = vpop.f32.mrb[86].mxu1 }
0x105b   :  { %v2989_v19 = vpack.c.bf16 %v2965_v50, %v2962_v15  ;;  %v4264_v41 = vpop.f32.mrb[87].mxu1 }
0x105d   :  { %4278 = vmatmul.mubr.msk.bf16.vlgmr.msra.gmra.mrb[144].mxu0 %vm255_vm2, %v2989_v19 }
0x105e   :  { %4281 = vmatprep.mubr.msk.bf16.mxu0 %vm4854_vm0, %v4853_v0  ;;  %4290 = vmatpush3.bf16.msra.mxu0 %v4444_v7 }
0x105f   :  { %4291 = vmatprep.subr.bf16.mxu0 %v4853_v0 }
0x10e2   :  { %v2970_v25 = vpop.f32.mrb[88].mxu1 }
0x10e3   :  { %v4267_v47 = vpop.f32.mrb[89].mxu1 }
0x10e4   :  { %v2973_v27 = vpop.f32.mrb[90].mxu1 }
0x10e5   :  { %v2990_v39 = vpack.c.bf16 %v2973_v27, %v2970_v25  ;;  %v4268_v5 = vpop.f32.mrb[91].mxu1 }
0x10e7   :  { %4282 = vmatmul.mubr.msk.bf16.gmra.mrb[148].mxu0 %vm255_vm2, %v2990_v39 }
0x10e8   :  { %4285 = vmatprep.mubr.msk.bf16.mxu0 %vm4854_vm0, %v4853_v0 }
0x10ea   :  { %v2978_v28 = vpop.f32.mrb[92].mxu1 }
0x10eb   :  { %v4271_v29 = vpop.f32.mrb[93].mxu1  ;;  %v2991_v49 = vpack.c.bf16 %v2978_v28, %v2978_v28 }
0x10ec   :  { %v2981_v40 = vpop.f32.mrb[94].mxu1 }
0x10ed   :  { %v4272_v32 = vpop.f32.mrb[95].mxu1 }
0x10ef   :  { %4286 = vmatmul.mubr.msk.bf16.gmra.mrb[152].mxu0 %vm255_vm2, %v2991_v49  ;;  %v3625_v49 = vld [vmem:[#allocation11 + $0x10] ss:$0 sm:$0xff] }
0x10f0   :  { %4293 = vmatprep.mubr.msk.bf16.mxu0 %vm4854_vm0, %v4853_v0 }
0x1130   :  { %v3047_v17 = vpop.f32.mrb[144].mxu0 }
0x1131   :  { %v3069_v56 = vadd.f32 %v3047_v17, %v5594_v36  ;;  %v4279_v8 = vpop.f32.mrb[145].mxu0 }
0x1132   :  { %v3050_v60 = vpop.f32.mrb[146].mxu0 }
0x1133   :  { %v6082_v53 = vadd.f32 %v3624_v45, %v3069_v56  ;;  %v3070_v20 = vadd.f32 %v3050_v60, %v5597_v46  ;;  %v4280_v48 = vpop.f32.mrb[147].mxu0  ;;  %v3626_v60 = vld [vmem:[#allocation11 + $0x11] ss:$0 sm:$0xff] }
0x1135   :  { %v3080_v33 = vadd.f32 %v3624_v45, %v3070_v20  ;;  %v3086_v44 = vsel %vm255_vm2, %v6082_v53, 0.0 }
0x1136   :  { %3087 = vadd.xlane.f32.xlu0 %v3086_v44 }
0x1137   :  { %v3089_v38 = vsel %vm255_vm2, %v3080_v33, 0.0 }
0x1138   :  { %3090 = vadd.xlane.f32.xlu1 %v3089_v38  ;;  %v4446_v38 = vld [vmem:[#allocation8 + $0xc0] sm:$0xff]  }
0x1139   :  { %4306 = vmatpush3.bf16.msra.mxu1 %v4446_v38 }
0x113a   :  { %4307 = vmatprep.subr.bf16.mxu1 %v4853_v0 }
0x11ba   :  { %v3055_v52 = vpop.f32.mrb[148].mxu0 }
0x11bb   :  { %v4283_v14 = vpop.f32.mrb[149].mxu0  ;;  %v3071_v6 = vadd.f32 %v3055_v52, %v5604_v2  ;;  %v4447_v52 = vld [vmem:[#allocation8 + $0xc8] sm:$0xff]  }
0x11bc   :  { %v3058_v58 = vpop.f32.mrb[150].mxu0  ;;  %4308 = vmatpush3.bf16.msra.mxu1 %v4447_v52  ;;  %v4448_v14 = vld [vmem:[#allocation8 + $0xd0] sm:$0xff]  }
0x11bd   :  { %v4284_v55 = vpop.f32.mrb[151].mxu0  ;;  %v3072_v34 = vadd.f32 %v3058_v58, %v5607_v12  ;;  %v3081_v23 = vadd.f32 %v3624_v45, %v3071_v6  ;;  %4309 = vmatprep.subr.bf16.mxu1 %v4853_v0  ;;  %v4449_v58 = vld [vmem:[#allocation8 + $0xd8] sm:$0xff]  }
0x11bf   :  { %v3082_v43 = vadd.f32 %v3624_v45, %v3072_v34  ;;  %v3092_v2 = vsel %vm255_vm2, %v3081_v23, 0.0 }
0x11c0   :  { %4310 = vmatpush3.bf16.msra.mxu1 %v4448_v14 }
0x11c1   :  { %v3095_v54 = vsel %vm255_vm2, %v3082_v43, 0.0  ;;  %4311 = vmatprep.subr.bf16.mxu1 %v4853_v0 }
0x11c2   :  { %v3063_v36 = vpop.f32.mrb[152].mxu0 }
0x11c3   :  { %v3088_v1 = vpop.xlane.xlu0 %3087  ;;  %v4287_v16 = vpop.f32.mrb[153].mxu0  ;;  %v3073_v61 = vadd.f32 %v3063_v36, %v5614_v51  ;;  %v4445_v51 = vld [vmem:[#allocation8 + $0xb8] sm:$0xff]  }
0x11c4   :  { %v3101_v3 = vmul.f32 0.03125, %v3088_v1  ;;  %v3066_v57 = vpop.f32.mrb[154].mxu0  ;;  %4292 = vmatpush3.bf16.msra.mxu0 %v4445_v51  ;;  %4312 = vmatpush3.bf16.msra.mxu1 %v4449_v58 }
0x11c5   :  { %v3091_v11 = vpop.xlane.xlu1 %3090  ;;  %v4288_v46 = vpop.f32.mrb[155].mxu0  ;;  %v3083_v4 = vadd.f32 %v3624_v45, %v3073_v61  ;;  %4325 = vmatprep.subr.bf16.mxu0 %v4853_v0 }
0x11c6   :  { %v3106_v62 = vsub.f32 %v6082_v53, %v3101_v3  ;;  %v3102_v18 = vmul.f32 0.03125, %v3091_v11 }
0x11c7   :  { %v3098_v12 = vsel %vm255_vm2, %v3083_v4, 0.0 }
0x11c8   :  { %v3107_v13 = vsub.f32 %v3080_v33, %v3102_v18  ;;  %v3111_v37 = vmul.f32 %v3106_v62, %v3106_v62 }
0x11ca   :  { %v3116_v42 = vsel %vm255_vm2, %v3111_v37, 0.0  ;;  %v3112_v21 = vmul.f32 %v3107_v13, %v3107_v13 }
0x11cb   :  { %3117 = vadd.xlane.f32.xlu0 %v3116_v42 }
0x11cc   :  { %v3119_v26 = vsel %vm255_vm2, %v3112_v21, 0.0 }
0x11cd   :  { %3120 = vadd.xlane.f32.xlu1 %v3119_v26 }
0x11cf   :  { %3093 = vadd.xlane.f32.xlu0 %v3092_v2 }
0x11d1   :  { %3096 = vadd.xlane.f32.xlu1 %v3095_v54 }
0x11d3   :  { %3099 = vadd.xlane.f32.xlu0 %v3098_v12  ;;  %v3627_v12 = vld [vmem:[#allocation11 + $0x12] ss:$0 sm:$0xff] }
0x1258   :  { %v3118_v30 = vpop.xlane.xlu0 %3117 }
0x1259   :  { %v3131_v24 = vmul.f32 0.03125, %v3118_v30 }
0x125a   :  { %v3121_v63 = vpop.xlane.xlu1 %3120 }
0x125b   :  { %v3136_v10 = vadd.f32 1e-06, %v3131_v24  ;;  %v3132_v9 = vmul.f32 0.03125, %v3121_v63 }
0x125c   :  { %v3094_v35 = vpop.xlane.xlu0 %3093 }
0x125d   :  { %4652 = vrsqrt.f32 %v3136_v10  ;;  %v3137_v59 = vadd.f32 1e-06, %v3132_v9  ;;  %v3103_v31 = vmul.f32 0.03125, %v3094_v35 }
0x125e   :  { %v3097_v15 = vpop.xlane.xlu1 %3096 }
0x125f   :  { %4654 = vrsqrt.f32 %v3137_v59  ;;  %v3108_v22 = vsub.f32 %v3081_v23, %v3103_v31  ;;  %v3104_v50 = vmul.f32 0.03125, %v3097_v15 }
0x1260   :  { %v3100_v19 = vpop.xlane.xlu0 %3099 }
0x1261   :  { %v3109_v41 = vsub.f32 %v3082_v43, %v3104_v50  ;;  %v3105_v25 = vmul.f32 0.03125, %v3100_v19  ;;  %v3113_v47 = vmul.f32 %v3108_v22, %v3108_v22 }
0x1263   :  { %v3110_v27 = vsub.f32 %v3083_v4, %v3105_v25  ;;  %v3122_v39 = vsel %vm255_vm2, %v3113_v47, 0.0  ;;  %v3114_v5 = vmul.f32 %v3109_v41, %v3109_v41 }
0x1264   :  { %3123 = vadd.xlane.f32.xlu1 %v3122_v39 }
0x1265   :  { %v3125_v28 = vsel %vm255_vm2, %v3114_v5, 0.0  ;;  %v3115_v29 = vmul.f32 %v3110_v27, %v3110_v27 }
0x1266   :  { %3126 = vadd.xlane.f32.xlu0 %v3125_v28 }
0x1267   :  { %v4653_v40 = vpop.eup %4652  ;;  %v3128_v32 = vsel %vm255_vm2, %v3115_v29, 0.0 }
0x1268   :  { %v3146_v17 = vmul.f32 %v4653_v40, %v3106_v62  ;;  %3129 = vadd.xlane.f32.xlu1 %v3128_v32 }
0x1269   :  { %v4655_v45 = vpop.eup %4654 }
0x126a   :  { %v3155_v56 = vmul.f32 %v3625_v49, %v3146_v17  ;;  %v3147_v8 = vmul.f32 %v4655_v45, %v3107_v13 }
0x126c   :  { %v3156_v20 = vmul.f32 %v3625_v49, %v3147_v8  ;;  %v3164_v48 = vadd.f32 %v3626_v60, %v3155_v56 }
0x126e   :  { %v3165_v33 = vadd.f32 %v3626_v60, %v3156_v20 }
0x1270   :  { %v3169_v44 = vpack.c.bf16 %v3165_v33, %v3164_v48 }
0x1272   :  { %4294 = vmatmul.mubr.msk.bf16.vlgmr.msra.gmra.mrb[156].mxu0 %vm255_vm2, %v3169_v44 }
0x1273   :  { %4297 = vmatprep.mubr.msk.bf16.mxu0 %vm4854_vm0, %v4853_v0 }
0x12f1   :  { %v3124_v55 = vpop.xlane.xlu1 %3123 }
0x12f2   :  { %v3133_v36 = vmul.f32 0.03125, %v3124_v55 }
0x12f3   :  { %v3127_v1 = vpop.xlane.xlu0 %3126 }
0x12f4   :  { %v3138_v16 = vadd.f32 1e-06, %v3133_v36  ;;  %v3134_v3 = vmul.f32 0.03125, %v3127_v1 }
0x12f5   :  { %v3130_v57 = vpop.xlane.xlu1 %3129 }
0x12f6   :  { %4656 = vrsqrt.f32 %v3138_v16  ;;  %v3139_v11 = vadd.f32 1e-06, %v3134_v3  ;;  %v3135_v46 = vmul.f32 0.03125, %v3130_v57 }
0x12f8   :  { %4658 = vrsqrt.f32 %v3139_v11  ;;  %v3140_v6 = vadd.f32 1e-06, %v3135_v46 }
0x12fa   :  { %4660 = vrsqrt.f32 %v3140_v6 }
0x1300   :  { %v4657_v62 = vpop.eup %4656 }
0x1301   :  { %v3148_v18 = vmul.f32 %v4657_v62, %v3108_v22 }
0x1302   :  { %v4659_v34 = vpop.eup %4658 }
0x1303   :  { %v3149_v13 = vmul.f32 %v4659_v34, %v3109_v41  ;;  %v3157_v37 = vmul.f32 %v3625_v49, %v3148_v18 }
0x1304   :  { %v4661_v23 = vpop.eup %4660 }
0x1305   :  { %v3158_v61 = vmul.f32 %v3625_v49, %v3149_v13  ;;  %v3150_v42 = vmul.f32 %v4661_v23, %v3110_v27  ;;  %v3166_v21 = vadd.f32 %v3626_v60, %v3157_v37 }
0x1307   :  { %v3167_v43 = vadd.f32 %v3626_v60, %v3158_v61  ;;  %v3159_v4 = vmul.f32 %v3625_v49, %v3150_v42 }
0x1309   :  { %v3170_v26 = vpack.c.bf16 %v3167_v43, %v3166_v21  ;;  %v3168_v2 = vadd.f32 %v3626_v60, %v3159_v4 }
0x130b   :  { %4298 = vmatmul.mubr.msk.bf16.gmra.mrb[160].mxu0 %vm255_vm2, %v3170_v26  ;;  %v3171_v54 = vpack.c.bf16 %v3168_v2, %v3168_v2 }
0x130c   :  { %4301 = vmatprep.mubr.msk.bf16.mxu0 %vm4854_vm0, %v4853_v0 }
0x1313   :  { %4302 = vmatmul.mubr.msk.bf16.gmra.mrb[164].mxu0 %vm255_vm2, %v3171_v54 }
0x1314   :  { %4329 = vmatprep.mubr.msk.bf16.mxu0 %vm4854_vm0, %v4853_v0 }
0x1345   :  { %v3232_v7 = vpop.f32.mrb[156].mxu0 }
0x1346   :  { %v3233_v51 = vadd.f32 %v3627_v12, %v3232_v7  ;;  %v4295_v30 = vpop.f32.mrb[157].mxu0 }
0x1347   :  { %v3235_v24 = vpop.f32.mrb[158].mxu0 }
0x1348   :  { %v3254_v63 = vmul.f32 %v3233_v51, %v3233_v51  ;;  %v3236_v10 = vadd.f32 %v3627_v12, %v3235_v24  ;;  %v4296_v9 = vpop.f32.mrb[159].mxu0  ;;  %v3633_v24 = vld [vmem:[#allocation11 + $0x13] ss:$0 sm:$0xff] }
0x134a   :  { %v3259_v35 = vmul.f32 %v3254_v63, %v3233_v51  ;;  %v3255_v59 = vmul.f32 %v3236_v10, %v3236_v10 }
0x134c   :  { %v3264_v31 = vmul.f32 0.044715, %v3259_v35  ;;  %v3260_v15 = vmul.f32 %v3255_v59, %v3236_v10 }
0x134e   :  { %v3269_v22 = vadd.f32 %v3264_v31, %v3233_v51  ;;  %v3265_v50 = vmul.f32 0.044715, %v3260_v15 }
0x1350   :  { %v3274_v19 = vmul.f32 0.7978846, %v3269_v22  ;;  %v3270_v41 = vadd.f32 %v3265_v50, %v3236_v10 }
0x1352   :  { %4662 = vtanh.f32 %v3274_v19  ;;  %v3275_v25 = vmul.f32 0.7978846, %v3270_v41 }
0x1354   :  { %4664 = vtanh.f32 %v3275_v25 }
0x135c   :  { %v4663_v47 = vpop.eup %4662 }
0x135d   :  { %v3284_v27 = vadd.f32 1.0, %v4663_v47 }
0x135e   :  { %v4665_v39 = vpop.eup %4664 }
0x135f   :  { %v3289_v5 = vmul.f32 0.5, %v3284_v27  ;;  %v3285_v28 = vadd.f32 1.0, %v4665_v39 }
0x1361   :  { %v3290_v29 = vmul.f32 0.5, %v3285_v28  ;;  %v3294_v40 = vmul.f32 %v3289_v5, %v3233_v51 }
0x1363   :  { %v3295_v49 = vmul.f32 %v3290_v29, %v3236_v10 }
0x1365   :  { %v3299_v32 = vpack.c.bf16 %v3295_v49, %v3294_v40 }
0x1367   :  { %4314 = vmatmul.mubr.msk.bf16.vlgmr.msra.gmra.mrb[96].mxu1 %vm159_vm1, %v3299_v32  ;;  %v4451_v32 = vld [vmem:[#allocation10 + $0x28] sm:$0xff]  }
0x1368   :  { %4317 = vmatprep.mubr.msk.bf16.mxu1 %vm4854_vm0, %v4853_v0 }
0x13de   :  { %v3240_v17 = vpop.f32.mrb[160].mxu0 }
0x13df   :  { %v3241_v45 = vadd.f32 %v3627_v12, %v3240_v17  ;;  %v4299_v56 = vpop.f32.mrb[161].mxu0 }
0x13e0   :  { %v3243_v8 = vpop.f32.mrb[162].mxu0 }
0x13e1   :  { %v3256_v60 = vmul.f32 %v3241_v45, %v3241_v45  ;;  %v3244_v20 = vadd.f32 %v3627_v12, %v3243_v8  ;;  %v4300_v48 = vpop.f32.mrb[163].mxu0 }
0x13e2   :  { %v3642_v48 = vld [vmem:[#allocation11 + $0x15] ss:$0 sm:$0xff] }
0x13e3   :  { %v3261_v33 = vmul.f32 %v3256_v60, %v3241_v45  ;;  %v3257_v44 = vmul.f32 %v3244_v20, %v3244_v20  ;;  %v3641_v60 = vld [vmem:[#allocation11 + $0x14] ss:$0 sm:$0xff] }
0x13e5   :  { %v3266_v38 = vmul.f32 0.044715, %v3261_v33  ;;  %v3262_v52 = vmul.f32 %v3257_v44, %v3244_v20 }
0x13e6   :  { %v3248_v14 = vpop.f32.mrb[164].mxu0 }
0x13e7   :  { %v3271_v58 = vadd.f32 %v3266_v38, %v3241_v45  ;;  %v3267_v55 = vmul.f32 0.044715, %v3262_v52  ;;  %v3249_v36 = vadd.f32 %v3627_v12, %v3248_v14  ;;  %v4303_v1 = vpop.f32.mrb[165].mxu0  ;;  %v3643_v52 = vld [vmem:[#allocation11 + $0x16] ss:$0 sm:$0xff] }
0x13e8   :  { %v3251_v16 = vpop.f32.mrb[166].mxu0 }
0x13e9   :  { %v3276_v3 = vmul.f32 0.7978846, %v3271_v58  ;;  %v3272_v57 = vadd.f32 %v3267_v55, %v3244_v20  ;;  %v3258_v11 = vmul.f32 %v3249_v36, %v3249_v36  ;;  %v4304_v46 = vpop.f32.mrb[167].mxu0 }
0x13eb   :  { %4666 = vtanh.f32 %v3276_v3  ;;  %v3277_v6 = vmul.f32 0.7978846, %v3272_v57  ;;  %v3263_v62 = vmul.f32 %v3258_v11, %v3249_v36 }
0x13ed   :  { %4668 = vtanh.f32 %v3277_v6  ;;  %v3268_v18 = vmul.f32 0.044715, %v3263_v62 }
0x13ef   :  { %v3273_v34 = vadd.f32 %v3268_v18, %v3249_v36 }
0x13f1   :  { %v3278_v13 = vmul.f32 0.7978846, %v3273_v34 }
0x13f3   :  { %4670 = vtanh.f32 %v3278_v13 }
0x13f5   :  { %v4667_v37 = vpop.eup %4666 }
0x13f6   :  { %v3286_v23 = vadd.f32 1.0, %v4667_v37 }
0x13f7   :  { %v4669_v61 = vpop.eup %4668 }
0x13f8   :  { %v3291_v42 = vmul.f32 0.5, %v3286_v23  ;;  %v3287_v21 = vadd.f32 1.0, %v4669_v61 }
0x13fa   :  { %v3292_v43 = vmul.f32 0.5, %v3287_v21  ;;  %v3296_v26 = vmul.f32 %v3291_v42, %v3241_v45 }
0x13fc   :  { %v3297_v4 = vmul.f32 %v3292_v43, %v3244_v20 }
0x13fd   :  { %v4671_v2 = vpop.eup %4670 }
0x13fe   :  { %v3300_v54 = vpack.c.bf16 %v3297_v4, %v3296_v26  ;;  %v3288_v12 = vadd.f32 1.0, %v4671_v2 }
0x1400   :  { %4318 = vmatmul.mubr.msk.bf16.gmra.mrb[100].mxu1 %vm159_vm1, %v3300_v54  ;;  %v3293_v7 = vmul.f32 0.5, %v3288_v12 }
0x1401   :  { %4321 = vmatprep.mubr.msk.bf16.mxu1 %vm4854_vm0, %v4853_v0 }
0x1402   :  { %v3298_v51 = vmul.f32 %v3293_v7, %v3249_v36 }
0x1404   :  { %v3301_v30 = vpack.c.bf16 %v3298_v51, %v3298_v51 }
0x1408   :  { %4322 = vmatmul.mubr.msk.bf16.gmra.mrb[104].mxu1 %vm159_vm1, %v3301_v30 }
0x143a   :  { %v3374_v63 = vpop.f32.mrb[96].mxu1 }
0x143b   :  { %v3375_v10 = vadd.f32 %v3633_v24, %v3374_v63  ;;  %v4315_v9 = vpop.f32.mrb[97].mxu1 }
0x143c   :  { %v3377_v35 = vpop.f32.mrb[98].mxu1 }
0x143d   :  { %v3392_v59 = vadd.f32 %v3375_v10, %v6082_v53  ;;  %v4316_v31 = vpop.f32.mrb[99].mxu1  ;;  %v4450_v53 = vld [vmem:[#allocation10 + $0x20] sm:$0xff]  }
0x143e   :  { %4326 = vmatpush3.bf16.msra.mxu0 %v4450_v53 }
0x143f   :  { %v3395_v15 = vsel %vm255_vm2, %v3392_v59, 0.0  ;;  %4327 = vmatprep.subr.bf16.mxu0 %v4853_v0 }
0x1440   :  { %3396 = vadd.xlane.f32.xlu0 %v3395_v15 }
0x1442   :  { %4328 = vmatpush3.bf16.msra.mxu0 %v4451_v32 }
0x14cd   :  { %v3397_v22 = vpop.xlane.xlu0 %3396 }
0x14ce   :  { %v3398_v50 = vmul.f32 0.03125, %v3397_v22 }
0x14d0   :  { %v3399_v19 = vsub.f32 %v3392_v59, %v3398_v50 }
0x14d2   :  { %v3400_v41 = vmul.f32 %v3399_v19, %v3399_v19 }
0x14d3   :  { %v3381_v25 = vpop.f32.mrb[100].mxu1 }
0x14d4   :  { %v4319_v47 = vpop.f32.mrb[101].mxu1  ;;  %v3401_v27 = vsel %vm255_vm2, %v3400_v41, 0.0 }
0x14d5   :  { %3402 = vadd.xlane.f32.xlu1 %v3401_v27  ;;  %v3383_v39 = vpop.f32.mrb[102].mxu1 }
0x14d6   :  { %v4320_v5 = vpop.f32.mrb[103].mxu1 }
0x14db   :  { %v3387_v28 = vpop.f32.mrb[104].mxu1 }
0x14dc   :  { %v4323_v29 = vpop.f32.mrb[105].mxu1 }
0x14dd   :  { %v3389_v40 = vpop.f32.mrb[106].mxu1 }
0x14de   :  { %v4324_v49 = vpop.f32.mrb[107].mxu1 }
0x1562   :  { %v3403_v17 = vpop.xlane.xlu1 %3402 }
0x1563   :  { %v3404_v45 = vmul.f32 0.03125, %v3403_v17 }
0x1565   :  { %v3405_v56 = vadd.f32 1e-06, %v3404_v45 }
0x1567   :  { %4672 = vrsqrt.f32 %v3405_v56 }
0x1571   :  { %v4673_v8 = vpop.eup %4672 }
0x1572   :  { %v3407_v20 = vmul.f32 %v4673_v8, %v3399_v19 }
0x1574   :  { %v3412_v33 = vmul.f32 %v3641_v60, %v3407_v20 }
0x1576   :  { %v3417_v44 = vadd.f32 %v3642_v48, %v3412_v33 }
0x1578   :  { %v3418_v38 = vpack.c.bf16 %v3417_v44, %v3417_v44 }
0x157a   :  { %4330 = vmatmul.mubr.msk.bf16.vlgmr.msra.gmra.mrb[168].mxu0 %vm255_vm2, %v3418_v38 }
0x164d   :  { %v3477_v14 = vpop.f32.mrb[168].mxu0 }
0x164e   :  { %v3478_v0 = vadd.f32 %v3643_v52, %v3477_v14  ;;  %v4331_v58 = vpop.f32.mrb[169].mxu0 }
0x164f   :  { %v3480_v55 = vpop.f32.mrb[170].mxu0 }
0x1650   :  { %3483 = vst [vmem:[#allocation13] sm:$0xff] %v3478_v0  ;;  %v4332_v36 = vpop.f32.mrb[171].mxu0 }
0x1651   :  { %4822 = shalt.err (!%p4819_p10)
}
0x1652   :  { %s4823_s25 = scalar_lea.hbm %s6144_s6, 128 }
0x1653   :  { %p4824_p11 = scmp.ne.s32.totalorder %s6144_s6, %s4823_s25  ;;  %p4827_p12 = scmp.lt.u32.totalorder %s4823_s25, %s6144_s6 }
0x1655   :  { %p4829_p13 = pnand %p4827_p12, %p4824_p11 }
0x1657   :  { %4832 = shalt.err (!%p4829_p13)
}
0x1658   :  { %3493 = dma.vmem_to_hbm [thread:$0]  %s3491_s9, 128, %s6144_s6, [#allocation4]  }
0x1659   :  { %4841 = dma.done.wait [#allocation4], 128  }
0x165a   :  { %4842 = vsyncadd [#allocation4], 4294967168 }
0x165b   :  { %3497 = vsyncpa [#allocation3], 1 }
0x165c   :  { %3498 = vsyncpa [#allocation6], 1 }
0x165d   :  { %3499 = vsyncpa [#allocation9], 1 }
0x165e   :  { %3500 = vsyncpa [#allocation12], 1 }
0x165f   :  { %3501 = vsyncpa [#allocation4], 1 }

</bundles_post_ra>
